<compile_context>
chip_gen: v5e
topology: v5e:2x2
jax: 0.10.0
libtpu: 0.0.40
codegen_flags: <defaults>
</compile_context>

<pallas_src>
from functools import partial

import jax
import jax.numpy as jnp
from jax.experimental import pallas as pl
from jax.experimental.pallas import tpu as pltpu

NEG_SLOPE = 0.2
BN_EPS = 1e-5
LANE = 128
SUBLANE = 16                        # bf16 sublane packing
FUSED_Y_BUDGET = 16 * 1024 * 1024   # VMEM-resident y cap for the fused BN path (v7x-safe)


def _round_up(x, m):
    return (x + m - 1) // m * m


def _cdiv(a, b):
    return -(-a // b)


def _vmem_limit_bytes():
    # Generation-aware scoped-VMEM limit: ~48 MiB on v7x (64 MiB/TC), ~96 MiB on
    # v5e/v6e (128 MiB). Falls back to a v7x-safe value if the query fails.
    try:
        cap = int(pltpu.get_tpu_info().vmem_capacity_bytes)
    except Exception:
        cap = 64 * 1024 * 1024
    return min(max(cap * 3 // 4, 32 * 1024 * 1024), 100 * 1024 * 1024)


VMEM_LIMIT_BYTES = _vmem_limit_bytes()


def _compiler_params(dims):
    return pltpu.CompilerParams(dimension_semantics=dims,
                                vmem_limit_bytes=VMEM_LIMIT_BYTES)


def _pick_tile_m(m, k_pad):
    # Per-layer M tile: large enough to amortize the ~0.35us/step overhead, small
    # enough that each layer gets an even grid count >= 2 (v7x dual-TC), larger rows
    # allowed when the K dimension is small (v6e/v7x 256-wide MXU utilization).
    cap = 1024 if k_pad <= 256 else 512
    return max(SUBLANE, min(cap, _round_up(_cdiv(m, 2), SUBLANE)))


# ----------------------------------------------------------------------------
# Pallas kernels
# ----------------------------------------------------------------------------
def _gemm_lrelu_kernel(x_ref, w_ref, o_ref):
    # x_ref: [TILE_M, K_pad] bf16, w_ref: [K_pad, C_pad] bf16 (weight-stationary)
    y = jnp.dot(x_ref[...], w_ref[...], preferred_element_type=jnp.float32)
    o_ref[...] = jnp.maximum(y, NEG_SLOPE * y).astype(o_ref.dtype)


def _gemm_stats_kernel(x_ref, w_ref, y_ref, stats_ref):
    # GEMM + per-tile partial BN statistics; y is stored bf16 (stats from f32 acc).
    y = jnp.dot(x_ref[...], w_ref[...], preferred_element_type=jnp.float32)
    y_ref[...] = y.astype(y_ref.dtype)
    s = jnp.sum(y, axis=0, keepdims=True)        # [1, C_pad]
    ss = jnp.sum(y * y, axis=0, keepdims=True)   # [1, C_pad]
    stats_ref[0] = jnp.concatenate([s, ss], axis=0)   # direct 2-row write


def _bn_act_kernel(y_ref, ss_ref, o_ref):
    # y_ref: [TILE_M, C_pad] bf16; ss_ref: [2, C_pad] f32 (row0=scale, row1=shift).
    y = y_ref[...].astype(jnp.float32)
    z = y * ss_ref[0:1, :] + ss_ref[1:2, :]
    o_ref[...] = jnp.maximum(z, NEG_SLOPE * z).astype(o_ref.dtype)


def _gemm_bn_lrelu_fused_kernel(x_ref, w_ref, gb_ref, o_ref,
                                y_scr, stats_scr, sc_scr, *, inv_m):
    # Fused conv-GEMM + BatchNorm(batch stats) + LeakyReLU, two passes over M tiles:
    #   pass 0: GEMM tile -> y_scr (bf16, VMEM resident), accumulate f32 sum/sumsq
    #   pass 1: finalize scale/shift once, normalize + activate, write output.
    p = pl.program_id(0)
    i = pl.program_id(1)

    @pl.when(p == 0)
    def _():
        @pl.when(i == 0)
        def _():
            stats_scr[...] = jnp.zeros_like(stats_scr)

        y = jnp.dot(x_ref[...], w_ref[...], preferred_element_type=jnp.float32)
        s = jnp.sum(y, axis=0, keepdims=True)
        ss = jnp.sum(y * y, axis=0, keepdims=True)
        stats_scr[...] += jnp.concatenate([s, ss], axis=0)
        y_scr[i] = y.astype(y_scr.dtype)

    @pl.when(p == 1)
    def _():
        @pl.when(i == 0)
        def _():
            mean = stats_scr[0:1, :] * inv_m
            var = jnp.maximum(stats_scr[1:2, :] * inv_m - mean * mean, 0.0)
            scale = gb_ref[0:1, :] * jax.lax.rsqrt(var + BN_EPS)
            shift = gb_ref[1:2, :] - mean * scale
            sc_scr[...] = jnp.concatenate([scale, shift], axis=0)

        y = y_scr[i].astype(jnp.float32)
        z = y * sc_scr[0:1, :] + sc_scr[1:2, :]
        o_ref[...] = jnp.maximum(z, NEG_SLOPE * z).astype(o_ref.dtype)


# ----------------------------------------------------------------------------
# pallas_call wrappers
# ----------------------------------------------------------------------------
def _prep_operands(patches, w_pt):
    # patches: [M, K] (K = k*k*C_in, column order (kh, kw, C_in))
    # w_pt: PyTorch conv weight [C_out, C_in, k, k]
    c_out, c_in, k, _ = w_pt.shape
    m, kk = patches.shape
    k_pad = _round_up(kk, LANE)
    c_pad = _round_up(c_out, LANE)
    tile_m = _pick_tile_m(m, k_pad)
    m_pad = _round_up(m, tile_m)
    xb = jnp.pad(patches.astype(jnp.bfloat16), ((0, m_pad - m), (0, k_pad - kk)))
    w2d = jnp.transpose(w_pt, (2, 3, 1, 0)).reshape(kk, c_out)   # (kh,kw,Cin) x Cout
    wb = jnp.pad(w2d.astype(jnp.bfloat16), ((0, k_pad - kk), (0, c_pad - c_out)))
    return xb, wb, m_pad, k_pad, c_pad, tile_m


def _conv_lrelu_gemm(xb, wb, m_pad, k_pad, c_pad, tile_m, out_dtype):
    grid = (m_pad // tile_m,)
    return pl.pallas_call(
        _gemm_lrelu_kernel,
        out_shape=jax.ShapeDtypeStruct((m_pad, c_pad), out_dtype),
        grid_spec=pltpu.PrefetchScalarGridSpec(
            num_scalar_prefetch=0, grid=grid,
            in_specs=[pl.BlockSpec((tile_m, k_pad), lambda i: (i, 0)),
                      pl.BlockSpec((k_pad, c_pad), lambda i: (0, 0))],
            out_specs=pl.BlockSpec((tile_m, c_pad), lambda i: (i, 0))),
        compiler_params=_compiler_params(("parallel",)),
        cost_estimate=pl.CostEstimate(
            flops=2 * m_pad * k_pad * c_pad, transcendentals=0,
            bytes_accessed=(xb.size + wb.size) * 2 + m_pad * c_pad * 2),
    )(xb, wb)


def _conv_bn_fused(xb, wb, gb, m_true, m_pad, k_pad, c_pad, tile_m, num_tiles,
                   out_dtype):
    grid = (2, num_tiles)   # (pass, M tile); both sequential (shared VMEM scratch)
    return pl.pallas_call(
        partial(_gemm_bn_lrelu_fused_kernel, inv_m=1.0 / m_true),
        out_shape=jax.ShapeDtypeStruct((m_pad, c_pad), out_dtype),
        grid_spec=pltpu.PrefetchScalarGridSpec(
            num_scalar_prefetch=0, grid=grid,
            in_specs=[
                # x only needed on pass 0; pin to block 0 on pass 1 (revisit -> no DMA)
                pl.BlockSpec((tile_m, k_pad), lambda p, i: (i * (1 - p), 0)),
                pl.BlockSpec((k_pad, c_pad), lambda p, i: (0, 0)),
                pl.BlockSpec((2, c_pad), lambda p, i: (0, 0)),
            ],
            # output only written on pass 1; keep block 0 resident during pass 0
            out_specs=pl.BlockSpec((tile_m, c_pad), lambda p, i: (i * p, 0)),
            scratch_shapes=[pltpu.VMEM((num_tiles, tile_m, c_pad), jnp.bfloat16),
                            pltpu.VMEM((2, c_pad), jnp.float32),
                            pltpu.VMEM((2, c_pad), jnp.float32)]),
        compiler_params=_compiler_params(("arbitrary", "arbitrary")),
        cost_estimate=pl.CostEstimate(
            flops=2 * m_pad * k_pad * c_pad, transcendentals=c_pad,
            bytes_accessed=xb.size * 2 + wb.size * 2 + gb.size * 4
            + m_pad * c_pad * 2),
    )(xb, wb, gb)


def _conv_bn_two_pass(xb, wb, gb, m_true, m_pad, k_pad, c_pad, tile_m, num_tiles,
                      out_dtype):
    grid = (num_tiles,)
    y, stats = pl.pallas_call(
        _gemm_stats_kernel,
        out_shape=(jax.ShapeDtypeStruct((m_pad, c_pad), jnp.bfloat16),
                   jax.ShapeDtypeStruct((num_tiles, 2, c_pad), jnp.float32)),
        grid_spec=pltpu.PrefetchScalarGridSpec(
            num_scalar_prefetch=0, grid=grid,
            in_specs=[pl.BlockSpec((tile_m, k_pad), lambda i: (i, 0)),
                      pl.BlockSpec((k_pad, c_pad), lambda i: (0, 0))],
            out_specs=[pl.BlockSpec((tile_m, c_pad), lambda i: (i, 0)),
                       pl.BlockSpec((1, 2, c_pad), lambda i: (i, 0, 0))]),
        compiler_params=_compiler_params(("parallel",)),
        cost_estimate=pl.CostEstimate(
            flops=2 * m_pad * k_pad * c_pad, transcendentals=0,
            bytes_accessed=xb.size * 2 + wb.size * 2 + m_pad * c_pad * 2
            + num_tiles * 2 * c_pad * 4),
    )(xb, wb)

    # Tiny plain-JAX reduce of the per-tile partials -> f32 scale/shift.
    # Zero-padded M rows contribute exactly zero (no conv bias); divide by m_true.
    s = jnp.sum(stats[:, 0, :], axis=0)
    ss = jnp.sum(stats[:, 1, :], axis=0)
    mean = s / m_true
    var = jnp.maximum(ss / m_true - mean * mean, 0.0)
    scale = gb[0] * jax.lax.rsqrt(var + BN_EPS)
    shift = gb[1] - mean * scale
    ssv = jnp.stack([scale, shift], axis=0)       # [2, c_pad] f32 (f32 math on v5e)

    return pl.pallas_call(
        _bn_act_kernel,
        out_shape=jax.ShapeDtypeStruct((m_pad, c_pad), out_dtype),
        grid_spec=pltpu.PrefetchScalarGridSpec(
            num_scalar_prefetch=0, grid=grid,
            in_specs=[pl.BlockSpec((tile_m, c_pad), lambda i: (i, 0)),
                      pl.BlockSpec((2, c_pad), lambda i: (0, 0))],
            out_specs=pl.BlockSpec((tile_m, c_pad), lambda i: (i, 0))),
        compiler_params=_compiler_params(("parallel",)),
        cost_estimate=pl.CostEstimate(
            flops=3 * m_pad * c_pad, transcendentals=0,
            bytes_accessed=m_pad * c_pad * 2 + 2 * c_pad * 4 + m_pad * c_pad * 2),
    )(y, ssv)


# ----------------------------------------------------------------------------
# Plain-JAX glue: NHWC im2col + layer plumbing
# ----------------------------------------------------------------------------
def im2col_nhwc(x, k, stride, pad):
    # x: [N, H, W, C] -> patches [N*Ho*Wo, k*k*C], column order (kh, kw, C)
    n, h, w, c = x.shape
    xp = jnp.pad(x, ((0, 0), (pad, pad), (pad, pad), (0, 0)))
    ho = (h + 2 * pad - k) // stride + 1
    wo = (w + 2 * pad - k) // stride + 1
    cols = []
    for i in range(k):
        for j in range(k):
            cols.append(xp[:, i:i + stride * ho:stride, j:j + stride * wo:stride, :])
    cols = jnp.stack(cols, axis=3)                 # [N, Ho, Wo, k*k, C]
    return cols.reshape(n * ho * wo, k * k * c), ho, wo


def conv_lrelu(x_nhwc, w_pt, *, stride, pad, out_dtype=jnp.bfloat16):
    n = x_nhwc.shape[0]
    c_out = w_pt.shape[0]
    k = w_pt.shape[2]
    patches, ho, wo = im2col_nhwc(x_nhwc, k, stride, pad)
    m = patches.shape[0]
    xb, wb, m_pad, k_pad, c_pad, tile_m = _prep_operands(patches, w_pt)
    y = _conv_lrelu_gemm(xb, wb, m_pad, k_pad, c_pad, tile_m, out_dtype)
    return y[:m, :c_out].reshape(n, ho, wo, c_out)


def conv_bn_lrelu(x_nhwc, w_pt, gamma, beta, *, stride, pad,
                  fused_budget=FUSED_Y_BUDGET, out_dtype=jnp.bfloat16):
    n = x_nhwc.shape[0]
    c_out = w_pt.shape[0]
    k = w_pt.shape[2]
    patches, ho, wo = im2col_nhwc(x_nhwc, k, stride, pad)
    m = patches.shape[0]
    xb, wb, m_pad, k_pad, c_pad, tile_m = _prep_operands(patches, w_pt)
    num_tiles = m_pad // tile_m
    gb = jnp.stack([jnp.pad(gamma.astype(jnp.float32), (0, c_pad - c_out)),
                    jnp.pad(beta.astype(jnp.float32), (0, c_pad - c_out))], axis=0)

    resident_bytes = m_pad * c_pad * 2   # bf16 y kept resident in VMEM (fused path)
    if resident_bytes <= fused_budget:
        y = _conv_bn_fused(xb, wb, gb, m, m_pad, k_pad, c_pad, tile_m, num_tiles,
                           out_dtype)
    else:
        y = _conv_bn_two_pass(xb, wb, gb, m, m_pad, k_pad, c_pad, tile_m, num_tiles,
                              out_dtype)
    return y[:m, :c_out].reshape(n, ho, wo, c_out)


def improved_discriminator_forward(x, params, *, fused_bn_budget=FUSED_Y_BUDGET):
    # x: NCHW (PyTorch layout). Single transpose to NHWC + bf16 cast, then
    # channels-last bf16 end-to-end.
    y = jnp.transpose(x, (0, 2, 3, 1)).astype(jnp.bfloat16)
    y = conv_lrelu(y, params["w1"], stride=2, pad=1)
    y = conv_bn_lrelu(y, params["w2"], params["g2"], params["b2"], stride=2, pad=1,
                      fused_budget=fused_bn_budget)
    y = conv_bn_lrelu(y, params["w3"], params["g3"], params["b3"], stride=2, pad=1,
                      fused_budget=fused_bn_budget)
    y = conv_bn_lrelu(y, params["w4"], params["g4"], params["b4"], stride=2, pad=1,
                      fused_budget=fused_bn_budget)

    # Final Conv2d(fd*8 -> 1, k=4, s=1, p=0) + Sigmoid head: M = N*Ho*Wo (tiny) and
    # C_out = 1, so a padded MXU pallas_call would waste ~32000x work plus a launch;
    # per the perf review it runs as a plain f32 dot + sigmoid.
    w5 = params["w5"]
    patches, ho, wo = im2col_nhwc(y, 4, 1, 0)
    w5v = jnp.transpose(w5, (2, 3, 1, 0)).reshape(-1, w5.shape[0]).astype(jnp.float32)
    logits = jnp.dot(patches.astype(jnp.float32), w5v)          # [N*Ho*Wo, 1]
    out = jax.nn.sigmoid(logits)
    return out.reshape(-1, 1).squeeze(1)    # matches out.view(-1, 1).squeeze(1)


# ----------------------------------------------------------------------------
# Independent pure-JAX reference (lax.conv, f32) for correctness checking
# ----------------------------------------------------------------------------
def _ref_conv(x, w, stride, pad):
    return jax.lax.conv_general_dilated(
        x, w, window_strides=(stride, stride),
        padding=[(pad, pad), (pad, pad)],
        dimension_numbers=("NCHW", "OIHW", "NCHW"))


def _ref_bn(y, gamma, beta):
    mean = jnp.mean(y, axis=(0, 2, 3), keepdims=True)
    var = jnp.mean(jnp.square(y - mean), axis=(0, 2, 3), keepdims=True)
    return (y - mean) * jax.lax.rsqrt(var + BN_EPS) * gamma[None, :, None, None] \
        + beta[None, :, None, None]


def _ref_lrelu(y):
    return jnp.where(y >= 0.0, y, NEG_SLOPE * y)


def reference_forward(x, params):
    y = _ref_lrelu(_ref_conv(x, params["w1"], 2, 1))
    y = _ref_lrelu(_ref_bn(_ref_conv(y, params["w2"], 2, 1), params["g2"], params["b2"]))
    y = _ref_lrelu(_ref_bn(_ref_conv(y, params["w3"], 2, 1), params["g3"], params["b3"]))
    y = _ref_lrelu(_ref_bn(_ref_conv(y, params["w4"], 2, 1), params["g4"], params["b4"]))
    y = jax.nn.sigmoid(_ref_conv(y, params["w5"], 1, 0))
    return y.reshape(-1, 1).squeeze(1)


# ----------------------------------------------------------------------------
# Deterministic parameter init + demo
# ----------------------------------------------------------------------------
def init_params(key, img_channels, features_d):
    ks = jax.random.split(key, 12)
    fd = features_d

    def w(k, co, ci):
        return 0.02 * jax.random.normal(k, (co, ci, 4, 4), jnp.float32)

    def gb(kg, kb, c):
        return (1.0 + 0.1 * jax.random.normal(kg, (c,), jnp.float32),
                0.1 * jax.random.normal(kb, (c,), jnp.float32))

    g2, b2 = gb(ks[5], ks[6], fd * 2)
    g3, b3 = gb(ks[7], ks[8], fd * 4)
    g4, b4 = gb(ks[9], ks[10], fd * 8)
    return {
        "w1": w(ks[0], fd, img_channels),
        "w2": w(ks[1], fd * 2, fd), "g2": g2, "b2": b2,
        "w3": w(ks[2], fd * 4, fd * 2), "g3": g3, "b3": b3,
        "w4": w(ks[3], fd * 8, fd * 4), "g4": g4, "b4": b4,
        "w5": w(ks[4], 1, fd * 8),
    }


if __name__ == "__main__":
    key = jax.random.PRNGKey(0)
    k_param, k_x = jax.random.split(key)

    # DCGAN discriminator topology (4 stride-2 convs + final 4x4 valid conv)
    # requires a 64x64 input to be shape-consistent.
    batch, img_channels, img_size, features_d = 2, 1, 64, 8
    params = init_params(k_param, img_channels, features_d)
    x = jax.random.normal(k_x, (batch, img_channels, img_size, img_size), jnp.float32)

    # Default path: fused single-kernel BN (VMEM-resident y).
    fwd = jax.jit(improved_discriminator_forward)
    out = jax.block_until_ready(fwd(x, params))
    assert out.shape == (batch,), out.shape

    # Also exercise the two-kernel BN fallback (used when y would not fit VMEM).
    fwd_fallback = jax.jit(partial(improved_discriminator_forward, fused_bn_budget=0))
    out_fb = jax.block_until_ready(fwd_fallback(x, params))

    ref = jax.block_until_ready(reference_forward(x, params))
    # bf16 MXU inputs / bf16 activations vs f32 lax.conv reference -> loose tolerance.
    assert jnp.allclose(out, ref, atol=4e-2, rtol=4e-2), (out, ref)
    assert jnp.allclose(out_fb, ref, atol=4e-2, rtol=4e-2), (out_fb, ref)

    print("KERNEL_OK")
</pallas_src>

<mosaic_0001>
module attributes {stable_mosaic.version = 11 : i64} {
  func.func @_gemm_lrelu_kernel(%arg0: i32, %arg1: memref<1024x128xbf16, #tpu.memory_space<vmem>>, %arg2: memref<128x128xbf16, #tpu.memory_space<vmem>>, %arg3: memref<1024x128xbf16, #tpu.memory_space<vmem>>) attributes {dimension_semantics = [#tpu.dimension_semantics<parallel>], iteration_bounds = array<i64: 2>, scalar_prefetch = 0 : i64, scratch_operands = 0 : i64, tpu.core_type = #tpu.core_type<tc>, window_params = [{transform_indices = @transform_0, window_bounds = array<i64: 1024, 128>}, {pipeline_mode = #tpu.pipeline_mode<synchronous>, transform_indices = @transform_1, window_bounds = array<i64: 128, 128>}, {transform_indices = @transform_2, window_bounds = array<i64: 1024, 128>}]} {
    %c0 = arith.constant 0 : index
    %c0_0 = arith.constant 0 : index
    %0 = vector.load %arg1[%c0, %c0_0] : memref<1024x128xbf16, #tpu.memory_space<vmem>>, vector<1024x128xbf16>
    %c0_1 = arith.constant 0 : index
    %c0_2 = arith.constant 0 : index
    %1 = vector.load %arg2[%c0_1, %c0_2] : memref<128x128xbf16, #tpu.memory_space<vmem>>, vector<128x128xbf16>
    %cst = arith.constant dense<0.000000e+00> : vector<1024x128xf32>
    %2 = tpu.matmul %0, %1, %cst {dimension_numbers = #tpu.dot_dimension_numbers<[1], [0], [0], [1], [0, 0, 1, 1], [], []>} : vector<1024x128xbf16>, vector<128x128xbf16>, vector<1024x128xf32> -> vector<1024x128xf32>
    %cst_3 = arith.constant 2.000000e-01 : f32
    %3 = vector.broadcast %cst_3 : f32 to vector<1024x128xf32>
    %4 = arith.mulf %3, %2 : vector<1024x128xf32>
    %5 = arith.maximumf %2, %4 : vector<1024x128xf32>
    %6 = arith.truncf %5 : vector<1024x128xf32> to vector<1024x128xbf16>
    %c0_4 = arith.constant 0 : index
    %c0_5 = arith.constant 0 : index
    %7 = vector.load %arg3[%c0_4, %c0_5] : memref<1024x128xbf16, #tpu.memory_space<vmem>>, vector<1024x128xbf16>
    tpu.vector_store %arg3[%c0_4, %c0_5], %6 {strides = array<i32>} : memref<1024x128xbf16, #tpu.memory_space<vmem>>, vector<1024x128xbf16>,
    return
  }
  func.func @transform_0(%arg0: i32) -> (i32, i32) {
    %c0_i32 = arith.constant 0 : i32
    %c0_i32_0 = arith.constant 0 : i32
    return %arg0, %c0_i32 : i32, i32
  }
  func.func @transform_1(%arg0: i32) -> (i32, i32) {
    %c0_i32 = arith.constant 0 : i32
    %c0_i32_0 = arith.constant 0 : i32
    %c0_i32_1 = arith.constant 0 : i32
    return %c0_i32, %c0_i32_0 : i32, i32
  }
  func.func @transform_2(%arg0: i32) -> (i32, i32) {
    %c0_i32 = arith.constant 0 : i32
    %c0_i32_0 = arith.constant 0 : i32
    return %arg0, %c0_i32 : i32, i32
  }
}

module attributes {stable_mosaic.version = 11 : i64} {
  func.func @_gemm_bn_lrelu_fused_kernel(%arg0: i32, %arg1: i32, %arg2: memref<256x128xbf16, #tpu.memory_space<vmem>>, %arg3: memref<128x128xbf16, #tpu.memory_space<vmem>>, %arg4: memref<2x128xf32, #tpu.memory_space<vmem>>, %arg5: memref<256x128xbf16, #tpu.memory_space<vmem>>, %arg6: memref<2x256x128xbf16, #tpu.memory_space<vmem>>, %arg7: memref<2x128xf32, #tpu.memory_space<vmem>>, %arg8: memref<2x128xf32, #tpu.memory_space<vmem>>) attributes {dimension_semantics = [#tpu.dimension_semantics<arbitrary>, #tpu.dimension_semantics<arbitrary>], iteration_bounds = array<i64: 2, 2>, scalar_prefetch = 0 : i64, scratch_operands = 3 : i64, tpu.core_type = #tpu.core_type<tc>, window_params = [{transform_indices = @transform_0, window_bounds = array<i64: 256, 128>}, {pipeline_mode = #tpu.pipeline_mode<synchronous>, transform_indices = @transform_1, window_bounds = array<i64: 128, 128>}, {pipeline_mode = #tpu.pipeline_mode<synchronous>, transform_indices = @transform_2, window_bounds = array<i64: 2, 128>}, {transform_indices = @transform_3, window_bounds = array<i64: 256, 128>}]} {
    %c0_i32 = arith.constant 0 : i32
    %0 = arith.cmpi eq, %arg0, %c0_i32 : i32
    %1 = arith.extui %0 : i1 to i32
    %c0_i32_0 = arith.constant 0 : i32
    %2 = arith.cmpi ne, %1, %c0_i32_0 : i32
    scf.if %2 {
      %c0_i32_2 = arith.constant 0 : i32
      %6 = arith.cmpi eq, %arg1, %c0_i32_2 : i32
      %7 = arith.extui %6 : i1 to i32
      %c0_i32_3 = arith.constant 0 : i32
      %8 = arith.cmpi ne, %7, %c0_i32_3 : i32
      scf.if %8 {
        %cst_15 = arith.constant 0.000000e+00 : f32
        %26 = vector.broadcast %cst_15 : f32 to vector<2x128xf32>
        %c0_16 = arith.constant 0 : index
        %c0_17 = arith.constant 0 : index
        %27 = vector.load %arg7[%c0_16, %c0_17] : memref<2x128xf32, #tpu.memory_space<vmem>>, vector<2x128xf32>
        tpu.vector_store %arg7[%c0_16, %c0_17], %26 {strides = array<i32>} : memref<2x128xf32, #tpu.memory_space<vmem>>, vector<2x128xf32>,
      } else {
      }
      %c0 = arith.constant 0 : index
      %c0_4 = arith.constant 0 : index
      %9 = vector.load %arg2[%c0, %c0_4] : memref<256x128xbf16, #tpu.memory_space<vmem>>, vector<256x128xbf16>
      %c0_5 = arith.constant 0 : index
      %c0_6 = arith.constant 0 : index
      %10 = vector.load %arg3[%c0_5, %c0_6] : memref<128x128xbf16, #tpu.memory_space<vmem>>, vector<128x128xbf16>
      %cst = arith.constant dense<0.000000e+00> : vector<256x128xf32>
      %11 = tpu.matmul %9, %10, %cst {dimension_numbers = #tpu.dot_dimension_numbers<[1], [0], [0], [1], [0, 0, 1, 1], [], []>} : vector<256x128xbf16>, vector<128x128xbf16>, vector<256x128xf32> -> vector<256x128xf32>
      %cst_7 = arith.constant dense<0.000000e+00> : vector<128xf32>
      %12 = vector.multi_reduction <add>, %11, %cst_7 [0] : vector<256x128xf32> to vector<128xf32>
      %13 = vector.shape_cast %12 : vector<128xf32> to vector<1x128xf32>
      %14 = arith.mulf %11, %11 : vector<256x128xf32>
      %cst_8 = arith.constant dense<0.000000e+00> : vector<128xf32>
      %15 = vector.multi_reduction <add>, %14, %cst_8 [0] : vector<256x128xf32> to vector<128xf32>
      %16 = vector.shape_cast %15 : vector<128xf32> to vector<1x128xf32>
      %c0_9 = arith.constant 0 : index
      %c0_10 = arith.constant 0 : index
      %17 = vector.load %arg7[%c0_9, %c0_10] : memref<2x128xf32, #tpu.memory_space<vmem>>, vector<2x128xf32>
      %18 = tpu.concatenate %13, %16 in 0 : vector<1x128xf32>, vector<1x128xf32> -> vector<2x128xf32>
      %19 = arith.addf %17, %18 : vector<2x128xf32>
      %c0_11 = arith.constant 0 : index
      %c0_12 = arith.constant 0 : index
      %20 = vector.load %arg7[%c0_11, %c0_12] : memref<2x128xf32, #tpu.memory_space<vmem>>, vector<2x128xf32>
      tpu.vector_store %arg7[%c0_11, %c0_12], %19 {strides = array<i32>} : memref<2x128xf32, #tpu.memory_space<vmem>>, vector<2x128xf32>,
      %21 = arith.truncf %11 : vector<256x128xf32> to vector<256x128xbf16>
      %22 = arith.index_cast %arg1 : i32 to index
      %c0_13 = arith.constant 0 : index
      %c0_14 = arith.constant 0 : index
      %23 = vector.load %arg6[%22, %c0_13, %c0_14] : memref<2x256x128xbf16, #tpu.memory_space<vmem>>, vector<1x256x128xbf16>
      %24 = vector.shape_cast %23 : vector<1x256x128xbf16> to vector<256x128xbf16>
      %25 = vector.shape_cast %21 : vector<256x128xbf16> to vector<1x256x128xbf16>
      tpu.vector_store %arg6[%22, %c0_13, %c0_14], %25 {strides = array<i32>} : memref<2x256x128xbf16, #tpu.memory_space<vmem>>, vector<1x256x128xbf16>,
    } else {
    }
    %c1_i32 = arith.constant 1 : i32
    %3 = arith.cmpi eq, %arg0, %c1_i32 : i32
    %4 = arith.extui %3 : i1 to i32
    %c0_i32_1 = arith.constant 0 : i32
    %5 = arith.cmpi ne, %4, %c0_i32_1 : i32
    scf.if %5 {
      %c0_i32_2 = arith.constant 0 : i32
      %6 = arith.cmpi eq, %arg1, %c0_i32_2 : i32
      %7 = arith.extui %6 : i1 to i32
      %c0_i32_3 = arith.constant 0 : i32
      %8 = arith.cmpi ne, %7, %c0_i32_3 : i32
      scf.if %8 {
        %c0_10 = arith.constant 0 : index
        %c0_11 = arith.constant 0 : index
        %24 = vector.load %arg7[%c0_10, %c0_11] : memref<2x128xf32, #tpu.memory_space<vmem>>, vector<1x128xf32>
        %cst_12 = arith.constant 0.001953125 : f32
        %25 = vector.broadcast %cst_12 : f32 to vector<1x128xf32>
        %26 = arith.mulf %24, %25 : vector<1x128xf32>
        %c1_13 = arith.constant 1 : index
        %c0_14 = arith.constant 0 : index
        %27 = vector.load %arg7[%c1_13, %c0_14] : memref<2x128xf32, #tpu.memory_space<vmem>>, vector<1x128xf32>
        %cst_15 = arith.constant 0.001953125 : f32
        %28 = vector.broadcast %cst_15 : f32 to vector<1x128xf32>
        %29 = arith.mulf %27, %28 : vector<1x128xf32>
        %30 = arith.mulf %26, %26 : vector<1x128xf32>
        %31 = arith.subf %29, %30 : vector<1x128xf32>
        %cst_16 = arith.constant 0.000000e+00 : f32
        %32 = vector.broadcast %cst_16 : f32 to vector<1x128xf32>
        %33 = arith.maximumf %31, %32 : vector<1x128xf32>
        %c0_17 = arith.constant 0 : index
        %c0_18 = arith.constant 0 : index
        %34 = vector.load %arg4[%c0_17, %c0_18] : memref<2x128xf32, #tpu.memory_space<vmem>>, vector<1x128xf32>
        %cst_19 = arith.constant 9.99999974E-6 : f32
        %35 = vector.broadcast %cst_19 : f32 to vector<1x128xf32>
        %36 = arith.addf %33, %35 : vector<1x128xf32>
        %37 = math.rsqrt %36 : vector<1x128xf32>
        %38 = arith.mulf %34, %37 : vector<1x128xf32>
        %c1_20 = arith.constant 1 : index
        %c0_21 = arith.constant 0 : index
        %39 = vector.load %arg4[%c1_20, %c0_21] : memref<2x128xf32, #tpu.memory_space<vmem>>, vector<1x128xf32>
        %40 = arith.mulf %26, %38 : vector<1x128xf32>
        %41 = arith.subf %39, %40 : vector<1x128xf32>
        %42 = tpu.concatenate %38, %41 in 0 : vector<1x128xf32>, vector<1x128xf32> -> vector<2x128xf32>
        %c0_22 = arith.constant 0 : index
        %c0_23 = arith.constant 0 : index
        %43 = vector.load %arg8[%c0_22, %c0_23] : memref<2x128xf32, #tpu.memory_space<vmem>>, vector<2x128xf32>
        tpu.vector_store %arg8[%c0_22, %c0_23], %42 {strides = array<i32>} : memref<2x128xf32, #tpu.memory_space<vmem>>, vector<2x128xf32>,
      } else {
      }
      %9 = arith.index_cast %arg1 : i32 to index
      %c0 = arith.constant 0 : index
      %c0_4 = arith.constant 0 : index
      %10 = vector.load %arg6[%9, %c0, %c0_4] : memref<2x256x128xbf16, #tpu.memory_space<vmem>>, vector<1x256x128xbf16>
      %11 = vector.shape_cast %10 : vector<1x256x128xbf16> to vector<256x128xbf16>
      %12 = arith.extf %11 : vector<256x128xbf16> to vector<256x128xf32>
      %c0_5 = arith.constant 0 : index
      %c0_6 = arith.constant 0 : index
      %13 = vector.load %arg8[%c0_5, %c0_6] : memref<2x128xf32, #tpu.memory_space<vmem>>, vector<1x128xf32>
      %14 = vector.broadcast %13 : vector<1x128xf32> to vector<256x128xf32>
      %15 = arith.mulf %12, %14 : vector<256x128xf32>
      %c1 = arith.constant 1 : index
      %c0_7 = arith.constant 0 : index
      %16 = vector.load %arg8[%c1, %c0_7] : memref<2x128xf32, #tpu.memory_space<vmem>>, vector<1x128xf32>
      %17 = vector.broadcast %16 : vector<1x128xf32> to vector<256x128xf32>
      %18 = arith.addf %15, %17 : vector<256x128xf32>
      %cst = arith.constant 2.000000e-01 : f32
      %19 = vector.broadcast %cst : f32 to vector<256x128xf32>
      %20 = arith.mulf %19, %18 : vector<256x128xf32>
      %21 = arith.maximumf %18, %20 : vector<256x128xf32>
      %22 = arith.truncf %21 : vector<256x128xf32> to vector<256x128xbf16>
      %c0_8 = arith.constant 0 : index
      %c0_9 = arith.constant 0 : index
      %23 = vector.load %arg5[%c0_8, %c0_9] : memref<256x128xbf16, #tpu.memory_space<vmem>>, vector<256x128xbf16>
      tpu.vector_store %arg5[%c0_8, %c0_9], %22 {strides = array<i32>} : memref<256x128xbf16, #tpu.memory_space<vmem>>, vector<256x128xbf16>,
    } else {
    }
    return
  }
  func.func @transform_0(%arg0: i32, %arg1: i32) -> (i32, i32) {
    %c1_i32 = arith.constant 1 : i32
    %0 = arith.subi %c1_i32, %arg0 : i32
    %1 = arith.muli %arg1, %0 : i32
    %c0_i32 = arith.constant 0 : i32
    %c0_i32_0 = arith.constant 0 : i32
    return %1, %c0_i32 : i32, i32
  }
  func.func @transform_1(%arg0: i32, %arg1: i32) -> (i32, i32) {
    %c0_i32 = arith.constant 0 : i32
    %c0_i32_0 = arith.constant 0 : i32
    %c0_i32_1 = arith.constant 0 : i32
    return %c0_i32, %c0_i32_0 : i32, i32
  }
  func.func @transform_2(%arg0: i32, %arg1: i32) -> (i32, i32) {
    %c0_i32 = arith.constant 0 : i32
    %c0_i32_0 = arith.constant 0 : i32
    %c0_i32_1 = arith.constant 0 : i32
    return %c0_i32, %c0_i32_0 : i32, i32
  }
  func.func @transform_3(%arg0: i32, %arg1: i32) -> (i32, i32) {
    %0 = arith.muli %arg1, %arg0 : i32
    %c0_i32 = arith.constant 0 : i32
    %c0_i32_0 = arith.constant 0 : i32
    return %0, %c0_i32 : i32, i32
  }
}

module attributes {stable_mosaic.version = 11 : i64} {
  func.func @_gemm_bn_lrelu_fused_kernel(%arg0: i32, %arg1: i32, %arg2: memref<64x256xbf16, #tpu.memory_space<vmem>>, %arg3: memref<256x128xbf16, #tpu.memory_space<vmem>>, %arg4: memref<2x128xf32, #tpu.memory_space<vmem>>, %arg5: memref<64x128xbf16, #tpu.memory_space<vmem>>, %arg6: memref<2x64x128xbf16, #tpu.memory_space<vmem>>, %arg7: memref<2x128xf32, #tpu.memory_space<vmem>>, %arg8: memref<2x128xf32, #tpu.memory_space<vmem>>) attributes {dimension_semantics = [#tpu.dimension_semantics<arbitrary>, #tpu.dimension_semantics<arbitrary>], iteration_bounds = array<i64: 2, 2>, scalar_prefetch = 0 : i64, scratch_operands = 3 : i64, tpu.core_type = #tpu.core_type<tc>, window_params = [{transform_indices = @transform_0, window_bounds = array<i64: 64, 256>}, {pipeline_mode = #tpu.pipeline_mode<synchronous>, transform_indices = @transform_1, window_bounds = array<i64: 256, 128>}, {pipeline_mode = #tpu.pipeline_mode<synchronous>, transform_indices = @transform_2, window_bounds = array<i64: 2, 128>}, {transform_indices = @transform_3, window_bounds = array<i64: 64, 128>}]} {
    %c0_i32 = arith.constant 0 : i32
    %0 = arith.cmpi eq, %arg0, %c0_i32 : i32
    %1 = arith.extui %0 : i1 to i32
    %c0_i32_0 = arith.constant 0 : i32
    %2 = arith.cmpi ne, %1, %c0_i32_0 : i32
    scf.if %2 {
      %c0_i32_2 = arith.constant 0 : i32
      %6 = arith.cmpi eq, %arg1, %c0_i32_2 : i32
      %7 = arith.extui %6 : i1 to i32
      %c0_i32_3 = arith.constant 0 : i32
      %8 = arith.cmpi ne, %7, %c0_i32_3 : i32
      scf.if %8 {
        %cst_15 = arith.constant 0.000000e+00 : f32
        %26 = vector.broadcast %cst_15 : f32 to vector<2x128xf32>
        %c0_16 = arith.constant 0 : index
        %c0_17 = arith.constant 0 : index
        %27 = vector.load %arg7[%c0_16, %c0_17] : memref<2x128xf32, #tpu.memory_space<vmem>>, vector<2x128xf32>
        tpu.vector_store %arg7[%c0_16, %c0_17], %26 {strides = array<i32>} : memref<2x128xf32, #tpu.memory_space<vmem>>, vector<2x128xf32>,
      } else {
      }
      %c0 = arith.constant 0 : index
      %c0_4 = arith.constant 0 : index
      %9 = vector.load %arg2[%c0, %c0_4] : memref<64x256xbf16, #tpu.memory_space<vmem>>, vector<64x256xbf16>
      %c0_5 = arith.constant 0 : index
      %c0_6 = arith.constant 0 : index
      %10 = vector.load %arg3[%c0_5, %c0_6] : memref<256x128xbf16, #tpu.memory_space<vmem>>, vector<256x128xbf16>
      %cst = arith.constant dense<0.000000e+00> : vector<64x128xf32>
      %11 = tpu.matmul %9, %10, %cst {dimension_numbers = #tpu.dot_dimension_numbers<[1], [0], [0], [1], [0, 0, 1, 1], [], []>} : vector<64x256xbf16>, vector<256x128xbf16>, vector<64x128xf32> -> vector<64x128xf32>
      %cst_7 = arith.constant dense<0.000000e+00> : vector<128xf32>
      %12 = vector.multi_reduction <add>, %11, %cst_7 [0] : vector<64x128xf32> to vector<128xf32>
      %13 = vector.shape_cast %12 : vector<128xf32> to vector<1x128xf32>
      %14 = arith.mulf %11, %11 : vector<64x128xf32>
      %cst_8 = arith.constant dense<0.000000e+00> : vector<128xf32>
      %15 = vector.multi_reduction <add>, %14, %cst_8 [0] : vector<64x128xf32> to vector<128xf32>
      %16 = vector.shape_cast %15 : vector<128xf32> to vector<1x128xf32>
      %c0_9 = arith.constant 0 : index
      %c0_10 = arith.constant 0 : index
      %17 = vector.load %arg7[%c0_9, %c0_10] : memref<2x128xf32, #tpu.memory_space<vmem>>, vector<2x128xf32>
      %18 = tpu.concatenate %13, %16 in 0 : vector<1x128xf32>, vector<1x128xf32> -> vector<2x128xf32>
      %19 = arith.addf %17, %18 : vector<2x128xf32>
      %c0_11 = arith.constant 0 : index
      %c0_12 = arith.constant 0 : index
      %20 = vector.load %arg7[%c0_11, %c0_12] : memref<2x128xf32, #tpu.memory_space<vmem>>, vector<2x128xf32>
      tpu.vector_store %arg7[%c0_11, %c0_12], %19 {strides = array<i32>} : memref<2x128xf32, #tpu.memory_space<vmem>>, vector<2x128xf32>,
      %21 = arith.truncf %11 : vector<64x128xf32> to vector<64x128xbf16>
      %22 = arith.index_cast %arg1 : i32 to index
      %c0_13 = arith.constant 0 : index
      %c0_14 = arith.constant 0 : index
      %23 = vector.load %arg6[%22, %c0_13, %c0_14] : memref<2x64x128xbf16, #tpu.memory_space<vmem>>, vector<1x64x128xbf16>
      %24 = vector.shape_cast %23 : vector<1x64x128xbf16> to vector<64x128xbf16>
      %25 = vector.shape_cast %21 : vector<64x128xbf16> to vector<1x64x128xbf16>
      tpu.vector_store %arg6[%22, %c0_13, %c0_14], %25 {strides = array<i32>} : memref<2x64x128xbf16, #tpu.memory_space<vmem>>, vector<1x64x128xbf16>,
    } else {
    }
    %c1_i32 = arith.constant 1 : i32
    %3 = arith.cmpi eq, %arg0, %c1_i32 : i32
    %4 = arith.extui %3 : i1 to i32
    %c0_i32_1 = arith.constant 0 : i32
    %5 = arith.cmpi ne, %4, %c0_i32_1 : i32
    scf.if %5 {
      %c0_i32_2 = arith.constant 0 : i32
      %6 = arith.cmpi eq, %arg1, %c0_i32_2 : i32
      %7 = arith.extui %6 : i1 to i32
      %c0_i32_3 = arith.constant 0 : i32
      %8 = arith.cmpi ne, %7, %c0_i32_3 : i32
      scf.if %8 {
        %c0_10 = arith.constant 0 : index
        %c0_11 = arith.constant 0 : index
        %24 = vector.load %arg7[%c0_10, %c0_11] : memref<2x128xf32, #tpu.memory_space<vmem>>, vector<1x128xf32>
        %cst_12 = arith.constant 7.812500e-03 : f32
        %25 = vector.broadcast %cst_12 : f32 to vector<1x128xf32>
        %26 = arith.mulf %24, %25 : vector<1x128xf32>
        %c1_13 = arith.constant 1 : index
        %c0_14 = arith.constant 0 : index
        %27 = vector.load %arg7[%c1_13, %c0_14] : memref<2x128xf32, #tpu.memory_space<vmem>>, vector<1x128xf32>
        %cst_15 = arith.constant 7.812500e-03 : f32
        %28 = vector.broadcast %cst_15 : f32 to vector<1x128xf32>
        %29 = arith.mulf %27, %28 : vector<1x128xf32>
        %30 = arith.mulf %26, %26 : vector<1x128xf32>
        %31 = arith.subf %29, %30 : vector<1x128xf32>
        %cst_16 = arith.constant 0.000000e+00 : f32
        %32 = vector.broadcast %cst_16 : f32 to vector<1x128xf32>
        %33 = arith.maximumf %31, %32 : vector<1x128xf32>
        %c0_17 = arith.constant 0 : index
        %c0_18 = arith.constant 0 : index
        %34 = vector.load %arg4[%c0_17, %c0_18] : memref<2x128xf32, #tpu.memory_space<vmem>>, vector<1x128xf32>
        %cst_19 = arith.constant 9.99999974E-6 : f32
        %35 = vector.broadcast %cst_19 : f32 to vector<1x128xf32>
        %36 = arith.addf %33, %35 : vector<1x128xf32>
        %37 = math.rsqrt %36 : vector<1x128xf32>
        %38 = arith.mulf %34, %37 : vector<1x128xf32>
        %c1_20 = arith.constant 1 : index
        %c0_21 = arith.constant 0 : index
        %39 = vector.load %arg4[%c1_20, %c0_21] : memref<2x128xf32, #tpu.memory_space<vmem>>, vector<1x128xf32>
        %40 = arith.mulf %26, %38 : vector<1x128xf32>
        %41 = arith.subf %39, %40 : vector<1x128xf32>
        %42 = tpu.concatenate %38, %41 in 0 : vector<1x128xf32>, vector<1x128xf32> -> vector<2x128xf32>
        %c0_22 = arith.constant 0 : index
        %c0_23 = arith.constant 0 : index
        %43 = vector.load %arg8[%c0_22, %c0_23] : memref<2x128xf32, #tpu.memory_space<vmem>>, vector<2x128xf32>
        tpu.vector_store %arg8[%c0_22, %c0_23], %42 {strides = array<i32>} : memref<2x128xf32, #tpu.memory_space<vmem>>, vector<2x128xf32>,
      } else {
      }
      %9 = arith.index_cast %arg1 : i32 to index
      %c0 = arith.constant 0 : index
      %c0_4 = arith.constant 0 : index
      %10 = vector.load %arg6[%9, %c0, %c0_4] : memref<2x64x128xbf16, #tpu.memory_space<vmem>>, vector<1x64x128xbf16>
      %11 = vector.shape_cast %10 : vector<1x64x128xbf16> to vector<64x128xbf16>
      %12 = arith.extf %11 : vector<64x128xbf16> to vector<64x128xf32>
      %c0_5 = arith.constant 0 : index
      %c0_6 = arith.constant 0 : index
      %13 = vector.load %arg8[%c0_5, %c0_6] : memref<2x128xf32, #tpu.memory_space<vmem>>, vector<1x128xf32>
      %14 = vector.broadcast %13 : vector<1x128xf32> to vector<64x128xf32>
      %15 = arith.mulf %12, %14 : vector<64x128xf32>
      %c1 = arith.constant 1 : index
      %c0_7 = arith.constant 0 : index
      %16 = vector.load %arg8[%c1, %c0_7] : memref<2x128xf32, #tpu.memory_space<vmem>>, vector<1x128xf32>
      %17 = vector.broadcast %16 : vector<1x128xf32> to vector<64x128xf32>
      %18 = arith.addf %15, %17 : vector<64x128xf32>
      %cst = arith.constant 2.000000e-01 : f32
      %19 = vector.broadcast %cst : f32 to vector<64x128xf32>
      %20 = arith.mulf %19, %18 : vector<64x128xf32>
      %21 = arith.maximumf %18, %20 : vector<64x128xf32>
      %22 = arith.truncf %21 : vector<64x128xf32> to vector<64x128xbf16>
      %c0_8 = arith.constant 0 : index
      %c0_9 = arith.constant 0 : index
      %23 = vector.load %arg5[%c0_8, %c0_9] : memref<64x128xbf16, #tpu.memory_space<vmem>>, vector<64x128xbf16>
      tpu.vector_store %arg5[%c0_8, %c0_9], %22 {strides = array<i32>} : memref<64x128xbf16, #tpu.memory_space<vmem>>, vector<64x128xbf16>,
    } else {
    }
    return
  }
  func.func @transform_0(%arg0: i32, %arg1: i32) -> (i32, i32) {
    %c1_i32 = arith.constant 1 : i32
    %0 = arith.subi %c1_i32, %arg0 : i32
    %1 = arith.muli %arg1, %0 : i32
    %c0_i32 = arith.constant 0 : i32
    %c0_i32_0 = arith.constant 0 : i32
    return %1, %c0_i32 : i32, i32
  }
  func.func @transform_1(%arg0: i32, %arg1: i32) -> (i32, i32) {
    %c0_i32 = arith.constant 0 : i32
    %c0_i32_0 = arith.constant 0 : i32
    %c0_i32_1 = arith.constant 0 : i32
    return %c0_i32, %c0_i32_0 : i32, i32
  }
  func.func @transform_2(%arg0: i32, %arg1: i32) -> (i32, i32) {
    %c0_i32 = arith.constant 0 : i32
    %c0_i32_0 = arith.constant 0 : i32
    %c0_i32_1 = arith.constant 0 : i32
    return %c0_i32, %c0_i32_0 : i32, i32
  }
  func.func @transform_3(%arg0: i32, %arg1: i32) -> (i32, i32) {
    %0 = arith.muli %arg1, %arg0 : i32
    %c0_i32 = arith.constant 0 : i32
    %c0_i32_0 = arith.constant 0 : i32
    return %0, %c0_i32 : i32, i32
  }
}

module attributes {stable_mosaic.version = 11 : i64} {
  func.func @_gemm_bn_lrelu_fused_kernel(%arg0: i32, %arg1: i32, %arg2: memref<16x512xbf16, #tpu.memory_space<vmem>>, %arg3: memref<512x128xbf16, #tpu.memory_space<vmem>>, %arg4: memref<2x128xf32, #tpu.memory_space<vmem>>, %arg5: memref<16x128xbf16, #tpu.memory_space<vmem>>, %arg6: memref<2x16x128xbf16, #tpu.memory_space<vmem>>, %arg7: memref<2x128xf32, #tpu.memory_space<vmem>>, %arg8: memref<2x128xf32, #tpu.memory_space<vmem>>) attributes {dimension_semantics = [#tpu.dimension_semantics<arbitrary>, #tpu.dimension_semantics<arbitrary>], iteration_bounds = array<i64: 2, 2>, scalar_prefetch = 0 : i64, scratch_operands = 3 : i64, tpu.core_type = #tpu.core_type<tc>, window_params = [{transform_indices = @transform_0, window_bounds = array<i64: 16, 512>}, {pipeline_mode = #tpu.pipeline_mode<synchronous>, transform_indices = @transform_1, window_bounds = array<i64: 512, 128>}, {pipeline_mode = #tpu.pipeline_mode<synchronous>, transform_indices = @transform_2, window_bounds = array<i64: 2, 128>}, {transform_indices = @transform_3, window_bounds = array<i64: 16, 128>}]} {
    %c0_i32 = arith.constant 0 : i32
    %0 = arith.cmpi eq, %arg0, %c0_i32 : i32
    %1 = arith.extui %0 : i1 to i32
    %c0_i32_0 = arith.constant 0 : i32
    %2 = arith.cmpi ne, %1, %c0_i32_0 : i32
    scf.if %2 {
      %c0_i32_2 = arith.constant 0 : i32
      %6 = arith.cmpi eq, %arg1, %c0_i32_2 : i32
      %7 = arith.extui %6 : i1 to i32
      %c0_i32_3 = arith.constant 0 : i32
      %8 = arith.cmpi ne, %7, %c0_i32_3 : i32
      scf.if %8 {
        %cst_15 = arith.constant 0.000000e+00 : f32
        %26 = vector.broadcast %cst_15 : f32 to vector<2x128xf32>
        %c0_16 = arith.constant 0 : index
        %c0_17 = arith.constant 0 : index
        %27 = vector.load %arg7[%c0_16, %c0_17] : memref<2x128xf32, #tpu.memory_space<vmem>>, vector<2x128xf32>
        tpu.vector_store %arg7[%c0_16, %c0_17], %26 {strides = array<i32>} : memref<2x128xf32, #tpu.memory_space<vmem>>, vector<2x128xf32>,
      } else {
      }
      %c0 = arith.constant 0 : index
      %c0_4 = arith.constant 0 : index
      %9 = vector.load %arg2[%c0, %c0_4] : memref<16x512xbf16, #tpu.memory_space<vmem>>, vector<16x512xbf16>
      %c0_5 = arith.constant 0 : index
      %c0_6 = arith.constant 0 : index
      %10 = vector.load %arg3[%c0_5, %c0_6] : memref<512x128xbf16, #tpu.memory_space<vmem>>, vector<512x128xbf16>
      %cst = arith.constant dense<0.000000e+00> : vector<16x128xf32>
      %11 = tpu.matmul %9, %10, %cst {dimension_numbers = #tpu.dot_dimension_numbers<[1], [0], [0], [1], [0, 0, 1, 1], [], []>} : vector<16x512xbf16>, vector<512x128xbf16>, vector<16x128xf32> -> vector<16x128xf32>
      %cst_7 = arith.constant dense<0.000000e+00> : vector<128xf32>
      %12 = vector.multi_reduction <add>, %11, %cst_7 [0] : vector<16x128xf32> to vector<128xf32>
      %13 = vector.shape_cast %12 : vector<128xf32> to vector<1x128xf32>
      %14 = arith.mulf %11, %11 : vector<16x128xf32>
      %cst_8 = arith.constant dense<0.000000e+00> : vector<128xf32>
      %15 = vector.multi_reduction <add>, %14, %cst_8 [0] : vector<16x128xf32> to vector<128xf32>
      %16 = vector.shape_cast %15 : vector<128xf32> to vector<1x128xf32>
      %c0_9 = arith.constant 0 : index
      %c0_10 = arith.constant 0 : index
      %17 = vector.load %arg7[%c0_9, %c0_10] : memref<2x128xf32, #tpu.memory_space<vmem>>, vector<2x128xf32>
      %18 = tpu.concatenate %13, %16 in 0 : vector<1x128xf32>, vector<1x128xf32> -> vector<2x128xf32>
      %19 = arith.addf %17, %18 : vector<2x128xf32>
      %c0_11 = arith.constant 0 : index
      %c0_12 = arith.constant 0 : index
      %20 = vector.load %arg7[%c0_11, %c0_12] : memref<2x128xf32, #tpu.memory_space<vmem>>, vector<2x128xf32>
      tpu.vector_store %arg7[%c0_11, %c0_12], %19 {strides = array<i32>} : memref<2x128xf32, #tpu.memory_space<vmem>>, vector<2x128xf32>,
      %21 = arith.truncf %11 : vector<16x128xf32> to vector<16x128xbf16>
      %22 = arith.index_cast %arg1 : i32 to index
      %c0_13 = arith.constant 0 : index
      %c0_14 = arith.constant 0 : index
      %23 = vector.load %arg6[%22, %c0_13, %c0_14] : memref<2x16x128xbf16, #tpu.memory_space<vmem>>, vector<1x16x128xbf16>
      %24 = vector.shape_cast %23 : vector<1x16x128xbf16> to vector<16x128xbf16>
      %25 = vector.shape_cast %21 : vector<16x128xbf16> to vector<1x16x128xbf16>
      tpu.vector_store %arg6[%22, %c0_13, %c0_14], %25 {strides = array<i32>} : memref<2x16x128xbf16, #tpu.memory_space<vmem>>, vector<1x16x128xbf16>,
    } else {
    }
    %c1_i32 = arith.constant 1 : i32
    %3 = arith.cmpi eq, %arg0, %c1_i32 : i32
    %4 = arith.extui %3 : i1 to i32
    %c0_i32_1 = arith.constant 0 : i32
    %5 = arith.cmpi ne, %4, %c0_i32_1 : i32
    scf.if %5 {
      %c0_i32_2 = arith.constant 0 : i32
      %6 = arith.cmpi eq, %arg1, %c0_i32_2 : i32
      %7 = arith.extui %6 : i1 to i32
      %c0_i32_3 = arith.constant 0 : i32
      %8 = arith.cmpi ne, %7, %c0_i32_3 : i32
      scf.if %8 {
        %c0_10 = arith.constant 0 : index
        %c0_11 = arith.constant 0 : index
        %24 = vector.load %arg7[%c0_10, %c0_11] : memref<2x128xf32, #tpu.memory_space<vmem>>, vector<1x128xf32>
        %cst_12 = arith.constant 3.125000e-02 : f32
        %25 = vector.broadcast %cst_12 : f32 to vector<1x128xf32>
        %26 = arith.mulf %24, %25 : vector<1x128xf32>
        %c1_13 = arith.constant 1 : index
        %c0_14 = arith.constant 0 : index
        %27 = vector.load %arg7[%c1_13, %c0_14] : memref<2x128xf32, #tpu.memory_space<vmem>>, vector<1x128xf32>
        %cst_15 = arith.constant 3.125000e-02 : f32
        %28 = vector.broadcast %cst_15 : f32 to vector<1x128xf32>
        %29 = arith.mulf %27, %28 : vector<1x128xf32>
        %30 = arith.mulf %26, %26 : vector<1x128xf32>
        %31 = arith.subf %29, %30 : vector<1x128xf32>
        %cst_16 = arith.constant 0.000000e+00 : f32
        %32 = vector.broadcast %cst_16 : f32 to vector<1x128xf32>
        %33 = arith.maximumf %31, %32 : vector<1x128xf32>
        %c0_17 = arith.constant 0 : index
        %c0_18 = arith.constant 0 : index
        %34 = vector.load %arg4[%c0_17, %c0_18] : memref<2x128xf32, #tpu.memory_space<vmem>>, vector<1x128xf32>
        %cst_19 = arith.constant 9.99999974E-6 : f32
        %35 = vector.broadcast %cst_19 : f32 to vector<1x128xf32>
        %36 = arith.addf %33, %35 : vector<1x128xf32>
        %37 = math.rsqrt %36 : vector<1x128xf32>
        %38 = arith.mulf %34, %37 : vector<1x128xf32>
        %c1_20 = arith.constant 1 : index
        %c0_21 = arith.constant 0 : index
        %39 = vector.load %arg4[%c1_20, %c0_21] : memref<2x128xf32, #tpu.memory_space<vmem>>, vector<1x128xf32>
        %40 = arith.mulf %26, %38 : vector<1x128xf32>
        %41 = arith.subf %39, %40 : vector<1x128xf32>
        %42 = tpu.concatenate %38, %41 in 0 : vector<1x128xf32>, vector<1x128xf32> -> vector<2x128xf32>
        %c0_22 = arith.constant 0 : index
        %c0_23 = arith.constant 0 : index
        %43 = vector.load %arg8[%c0_22, %c0_23] : memref<2x128xf32, #tpu.memory_space<vmem>>, vector<2x128xf32>
        tpu.vector_store %arg8[%c0_22, %c0_23], %42 {strides = array<i32>} : memref<2x128xf32, #tpu.memory_space<vmem>>, vector<2x128xf32>,
      } else {
      }
      %9 = arith.index_cast %arg1 : i32 to index
      %c0 = arith.constant 0 : index
      %c0_4 = arith.constant 0 : index
      %10 = vector.load %arg6[%9, %c0, %c0_4] : memref<2x16x128xbf16, #tpu.memory_space<vmem>>, vector<1x16x128xbf16>
      %11 = vector.shape_cast %10 : vector<1x16x128xbf16> to vector<16x128xbf16>
      %12 = arith.extf %11 : vector<16x128xbf16> to vector<16x128xf32>
      %c0_5 = arith.constant 0 : index
      %c0_6 = arith.constant 0 : index
      %13 = vector.load %arg8[%c0_5, %c0_6] : memref<2x128xf32, #tpu.memory_space<vmem>>, vector<1x128xf32>
      %14 = vector.broadcast %13 : vector<1x128xf32> to vector<16x128xf32>
      %15 = arith.mulf %12, %14 : vector<16x128xf32>
      %c1 = arith.constant 1 : index
      %c0_7 = arith.constant 0 : index
      %16 = vector.load %arg8[%c1, %c0_7] : memref<2x128xf32, #tpu.memory_space<vmem>>, vector<1x128xf32>
      %17 = vector.broadcast %16 : vector<1x128xf32> to vector<16x128xf32>
      %18 = arith.addf %15, %17 : vector<16x128xf32>
      %cst = arith.constant 2.000000e-01 : f32
      %19 = vector.broadcast %cst : f32 to vector<16x128xf32>
      %20 = arith.mulf %19, %18 : vector<16x128xf32>
      %21 = arith.maximumf %18, %20 : vector<16x128xf32>
      %22 = arith.truncf %21 : vector<16x128xf32> to vector<16x128xbf16>
      %c0_8 = arith.constant 0 : index
      %c0_9 = arith.constant 0 : index
      %23 = vector.load %arg5[%c0_8, %c0_9] : memref<16x128xbf16, #tpu.memory_space<vmem>>, vector<16x128xbf16>
      tpu.vector_store %arg5[%c0_8, %c0_9], %22 {strides = array<i32>} : memref<16x128xbf16, #tpu.memory_space<vmem>>, vector<16x128xbf16>,
    } else {
    }
    return
  }
  func.func @transform_0(%arg0: i32, %arg1: i32) -> (i32, i32) {
    %c1_i32 = arith.constant 1 : i32
    %0 = arith.subi %c1_i32, %arg0 : i32
    %1 = arith.muli %arg1, %0 : i32
    %c0_i32 = arith.constant 0 : i32
    %c0_i32_0 = arith.constant 0 : i32
    return %1, %c0_i32 : i32, i32
  }
  func.func @transform_1(%arg0: i32, %arg1: i32) -> (i32, i32) {
    %c0_i32 = arith.constant 0 : i32
    %c0_i32_0 = arith.constant 0 : i32
    %c0_i32_1 = arith.constant 0 : i32
    return %c0_i32, %c0_i32_0 : i32, i32
  }
  func.func @transform_2(%arg0: i32, %arg1: i32) -> (i32, i32) {
    %c0_i32 = arith.constant 0 : i32
    %c0_i32_0 = arith.constant 0 : i32
    %c0_i32_1 = arith.constant 0 : i32
    return %c0_i32, %c0_i32_0 : i32, i32
  }
  func.func @transform_3(%arg0: i32, %arg1: i32) -> (i32, i32) {
    %0 = arith.muli %arg1, %arg0 : i32
    %c0_i32 = arith.constant 0 : i32
    %c0_i32_0 = arith.constant 0 : i32
    return %0, %c0_i32 : i32, i32
  }
}

</mosaic_0001>

<bundles_post_ra>
// kernel: improved_discriminator_forward.4
= control target key start
LH: loop header
LB: loop body
LE: loop exit
PB: predicated region body
PF: predicated region fallthrough
CT: control target
= control target key end

     0   :  { %s2429_s9 = smov 0   ;;  %s2609_s0 = inlined_call_operand.vmem [shape: bf16[2048,128], index: 0, kind: input, shape index: {}]   ;;  %s2610_s1 = inlined_call_operand.vmem [shape: bf16[128,128], index: 1, kind: input, shape index: {}]   ;;  %s2611_s2 = inlined_call_operand.vmem [shape: bf16[2048,128], index: 2, kind: output, shape index: {}]  }
   0x1 LB: > { %s1620_s10 = sadd.s32 4294967295, %s2412_s9   ;;  %p1624_p0 = scmp.ge.s32.totalorder %s2412_s9, 1  ;;  %s2412_s9 = sphi %s2429_s9, %s12_s9  }
   0x2   : > { %p113_p1 = scmp.lt.s32.totalorder %s2412_s9, 3 }
   0x4   : > { %p114_p2 = pnand %p1624_p0, %p113_p1 }
   0x5   : > { %s1625_s19 = sshll.u32 (!%p114_p2), %s1620_s10, 7 }
   0x6   : > { %117 = sbr.rel (%p114_p2) target bundleno = 432 (0x1b0), region = 28  ;;  %p136_p3 = scmp.lt.s32.totalorder (!%p114_p2), %s1625_s19, 255 }
   0xb   : > { %v1990_v0 = vld [vmem:[%s2610_s1 + $0x38] sm:$0xff]  ;;  %v1989_v1 = vld [vmem:[%s2610_s1 + $0x30] sm:$0xff]  ;;  %v1988_v2 = vld [vmem:[%s2610_s1 + $0x28] sm:$0xff]  ;;  %s2613_s19 = smov (!%p136_p3, %s1625_s19), 255 }
   0xc   : > { %723 = vmatpush.bf16.msra.mxu0 %v1990_v0  ;;  %2374 = vmatpush.bf16.msra.mxu1 %v1990_v0  ;;  %v1987_v3 = vld [vmem:[%s2610_s1 + $0x20] sm:$0xff]  ;;  %v1986_v4 = vld [vmem:[%s2610_s1 + $0x18] sm:$0xff]  ;;  %v1985_v5 = vld [vmem:[%s2610_s1 + $0x10] sm:$0xff]  ;;  %s1626_s26 = sshll.u32 %s2613_s19, 2 }
   0xd   : > { %2375 = vmatpush.bf16.msra.mxu2 %v1990_v0  ;;  %2376 = vmatpush.bf16.msra.mxu3 %v1990_v0  ;;  %v1984_v6 = vld [vmem:[%s2610_s1 + $0x8] sm:$0xff]  ;;  %v1983_v7 = vld [vmem:[%s2610_s1] sm:$0xff]  ;;  %s2469_s3 = scalar_lea.vmem %s2609_s0, %s1626_s26  ;;  %s2512_s6 = scalar_lea.vmem %s2611_s2, %s1626_s26 }
   0xe   : > { %v1919_v8 = vld [vmem:[%s2469_s3] sm:$0xff]  ;;  %v1920_v12 = vld [vmem:[%s2469_s3 + $0x8] sm:$0xff]  ;;  %v1921_v16 = vld [vmem:[%s2469_s3 + $0x10] sm:$0xff] }
   0xf   : > { %v1935_v9 = vld [vmem:[%s2469_s3 + $0x80] sm:$0xff]  ;;  %v1936_v13 = vld [vmem:[%s2469_s3 + $0x88] sm:$0xff]  ;;  %v1937_v17 = vld [vmem:[%s2469_s3 + $0x90] sm:$0xff] }
  0x10   : > { %724 = vmatpush.bf16.msra.mxu0 %v1989_v1  ;;  %2377 = vmatpush.bf16.msra.mxu1 %v1989_v1  ;;  %v1951_v10 = vld [vmem:[%s2469_s3 + $0x100] sm:$0xff]  ;;  %v1952_v14 = vld [vmem:[%s2469_s3 + $0x108] sm:$0xff]  ;;  %v1953_v18 = vld [vmem:[%s2469_s3 + $0x110] sm:$0xff] }
  0x11   : > { %2378 = vmatpush.bf16.msra.mxu2 %v1989_v1  ;;  %2379 = vmatpush.bf16.msra.mxu3 %v1989_v1  ;;  %v1967_v11 = vld [vmem:[%s2469_s3 + $0x180] sm:$0xff]  ;;  %v1968_v15 = vld [vmem:[%s2469_s3 + $0x188] sm:$0xff]  ;;  %v1969_v19 = vld [vmem:[%s2469_s3 + $0x190] sm:$0xff] }
  0x12   : > { %v1922_v20 = vld [vmem:[%s2469_s3 + $0x18] sm:$0xff]  ;;  %v1923_v24 = vld [vmem:[%s2469_s3 + $0x20] sm:$0xff]  ;;  %v1924_v28 = vld [vmem:[%s2469_s3 + $0x28] sm:$0xff] }
  0x13   : > { %v1938_v21 = vld [vmem:[%s2469_s3 + $0x98] sm:$0xff]  ;;  %v1939_v25 = vld [vmem:[%s2469_s3 + $0xa0] sm:$0xff]  ;;  %v1940_v29 = vld [vmem:[%s2469_s3 + $0xa8] sm:$0xff] }
  0x14   : > { %725 = vmatpush.bf16.msra.mxu0 %v1988_v2  ;;  %2380 = vmatpush.bf16.msra.mxu1 %v1988_v2  ;;  %v1954_v22 = vld [vmem:[%s2469_s3 + $0x118] sm:$0xff]  ;;  %v1955_v26 = vld [vmem:[%s2469_s3 + $0x120] sm:$0xff]  ;;  %v1956_v30 = vld [vmem:[%s2469_s3 + $0x128] sm:$0xff] }
  0x15   : > { %2381 = vmatpush.bf16.msra.mxu2 %v1988_v2  ;;  %2382 = vmatpush.bf16.msra.mxu3 %v1988_v2  ;;  %v1970_v23 = vld [vmem:[%s2469_s3 + $0x198] sm:$0xff]  ;;  %v1971_v27 = vld [vmem:[%s2469_s3 + $0x1a0] sm:$0xff]  ;;  %v1972_v31 = vld [vmem:[%s2469_s3 + $0x1a8] sm:$0xff] }
  0x16   : > { %v1925_v32 = vld [vmem:[%s2469_s3 + $0x30] sm:$0xff]  ;;  %v1926_v36 = vld [vmem:[%s2469_s3 + $0x38] sm:$0xff]  ;;  %v1927_v40 = vld [vmem:[%s2469_s3 + $0x40] sm:$0xff] }
  0x17   : > { %v1941_v33 = vld [vmem:[%s2469_s3 + $0xb0] sm:$0xff]  ;;  %v1942_v37 = vld [vmem:[%s2469_s3 + $0xb8] sm:$0xff]  ;;  %v1943_v41 = vld [vmem:[%s2469_s3 + $0xc0] sm:$0xff] }
  0x18   : > { %726 = vmatpush.bf16.msra.mxu0 %v1987_v3  ;;  %2383 = vmatpush.bf16.msra.mxu1 %v1987_v3  ;;  %v1957_v34 = vld [vmem:[%s2469_s3 + $0x130] sm:$0xff]  ;;  %v1958_v38 = vld [vmem:[%s2469_s3 + $0x138] sm:$0xff]  ;;  %v1959_v44 = vld [vmem:[%s2469_s3 + $0x140] sm:$0xff] }
  0x19   : > { %2384 = vmatpush.bf16.msra.mxu2 %v1987_v3  ;;  %2385 = vmatpush.bf16.msra.mxu3 %v1987_v3  ;;  %v1973_v35 = vld [vmem:[%s2469_s3 + $0x1b0] sm:$0xff]  ;;  %v1974_v39 = vld [vmem:[%s2469_s3 + $0x1b8] sm:$0xff]  ;;  %v1975_v45 = vld [vmem:[%s2469_s3 + $0x1c0] sm:$0xff] }
  0x1a   : > { %v1928_v0 = vld [vmem:[%s2469_s3 + $0x48] sm:$0xff] }
  0x1b   : > { %v1944_v1 = vld [vmem:[%s2469_s3 + $0xc8] sm:$0xff] }
  0x1c   : > { %727 = vmatpush.bf16.msra.mxu0 %v1986_v4  ;;  %2386 = vmatpush.bf16.msra.mxu1 %v1986_v4  ;;  %v1960_v2 = vld [vmem:[%s2469_s3 + $0x148] sm:$0xff] }
  0x1d   : > { %2387 = vmatpush.bf16.msra.mxu2 %v1986_v4  ;;  %2388 = vmatpush.bf16.msra.mxu3 %v1986_v4 }
  0x20   : > { %728 = vmatpush.bf16.msra.mxu0 %v1985_v5  ;;  %2389 = vmatpush.bf16.msra.mxu1 %v1985_v5 }
  0x21   : > { %2390 = vmatpush.bf16.msra.mxu2 %v1985_v5  ;;  %2391 = vmatpush.bf16.msra.mxu3 %v1985_v5 }
  0x24   : > { %729 = vmatpush.bf16.msra.mxu0 %v1984_v6  ;;  %2392 = vmatpush.bf16.msra.mxu1 %v1984_v6 }
  0x25   : > { %2393 = vmatpush.bf16.msra.mxu2 %v1984_v6  ;;  %2394 = vmatpush.bf16.msra.mxu3 %v1984_v6 }
  0x28   : > { %730 = vmatpush.bf16.msra.mxu0 %v1983_v7  ;;  %2395 = vmatpush.bf16.msra.mxu1 %v1983_v7 }
  0x29   : > { %2396 = vmatpush.bf16.msra.mxu2 %v1983_v7  ;;  %2397 = vmatpush.bf16.msra.mxu3 %v1983_v7  ;;  %v1976_v7 = vld [vmem:[%s2469_s3 + $0x1c8] sm:$0xff] }
  0x2b   : > { %731 = vmatmul.bf16.vlgmr.msra.gmra.mxu0 %v1919_v8  ;;  %811 = vmatmul.bf16.vlgmr.msra.gmra.mxu1 %v1935_v9 }
  0x2c   : > { %891 = vmatmul.bf16.vlgmr.msra.gmra.mxu2 %v1951_v10  ;;  %971 = vmatmul.bf16.vlgmr.msra.gmra.mxu3 %v1967_v11 }
  0x3b   : > { %736 = vmatmul.bf16.gmra.mxu0 %v1920_v12  ;;  %816 = vmatmul.bf16.gmra.mxu1 %v1936_v13 }
  0x3c   : > { %896 = vmatmul.bf16.gmra.mxu2 %v1952_v14  ;;  %976 = vmatmul.bf16.gmra.mxu3 %v1968_v15 }
  0x4b   : > { %741 = vmatmul.bf16.gmra.mxu0 %v1921_v16  ;;  %821 = vmatmul.bf16.gmra.mxu1 %v1937_v17 }
  0x4c   : > { %901 = vmatmul.bf16.gmra.mxu2 %v1953_v18  ;;  %981 = vmatmul.bf16.gmra.mxu3 %v1969_v19 }
  0x5b   : > { %746 = vmatmul.bf16.gmra.mxu0 %v1922_v20  ;;  %826 = vmatmul.bf16.gmra.mxu1 %v1938_v21 }
  0x5c   : > { %906 = vmatmul.bf16.gmra.mxu2 %v1954_v22  ;;  %986 = vmatmul.bf16.gmra.mxu3 %v1970_v23 }
  0x6b   : > { %751 = vmatmul.bf16.gmra.mxu0 %v1923_v24  ;;  %831 = vmatmul.bf16.gmra.mxu1 %v1939_v25 }
  0x6c   : > { %911 = vmatmul.bf16.gmra.mxu2 %v1955_v26  ;;  %991 = vmatmul.bf16.gmra.mxu3 %v1971_v27 }
  0x7b   : > { %756 = vmatmul.bf16.gmra.mxu0 %v1924_v28  ;;  %836 = vmatmul.bf16.gmra.mxu1 %v1940_v29 }
  0x7c   : > { %916 = vmatmul.bf16.gmra.mxu2 %v1956_v30  ;;  %996 = vmatmul.bf16.gmra.mxu3 %v1972_v31 }
  0x8b   : > { %761 = vmatmul.bf16.gmra.mxu0 %v1925_v32  ;;  %841 = vmatmul.bf16.gmra.mxu1 %v1941_v33  ;;  %v1929_v32 = vld [vmem:[%s2469_s3 + $0x50] sm:$0xff] }
  0x8c   : > { %921 = vmatmul.bf16.gmra.mxu2 %v1957_v34  ;;  %1001 = vmatmul.bf16.gmra.mxu3 %v1973_v35  ;;  %v1945_v33 = vld [vmem:[%s2469_s3 + $0xd0] sm:$0xff] }
  0x8d   : > { %v1961_v34 = vld [vmem:[%s2469_s3 + $0x150] sm:$0xff] }
  0x9b   : > { %766 = vmatmul.bf16.gmra.mxu0 %v1926_v36  ;;  %846 = vmatmul.bf16.gmra.mxu1 %v1942_v37 }
  0x9c   : > { %926 = vmatmul.bf16.gmra.mxu2 %v1958_v38  ;;  %1006 = vmatmul.bf16.gmra.mxu3 %v1974_v39  ;;  %v1977_v39 = vld [vmem:[%s2469_s3 + $0x1d0] sm:$0xff] }
  0xa8   : > { %v732_v42 = vpop.f32.mrf.mxu0  ;;  %v812_v43 = vpop.f32.mrf.mxu1 }
  0xa9   : > { %v1052_v46 = vmul.f32 0.2, %v732_v42  ;;  %v1084_v47 = vmul.f32 0.2, %v812_v43 }
  0xab   : > { %771 = vmatmul.bf16.gmra.mxu0 %v1927_v40  ;;  %851 = vmatmul.bf16.gmra.mxu1 %v1943_v41  ;;  %v1180_v54 = vmax.f32 %v732_v42, %v1052_v46  ;;  %v1212_v55 = vmax.f32 %v812_v43, %v1084_v47 }
  0xac   : > { %931 = vmatmul.bf16.gmra.mxu2 %v1959_v44  ;;  %1011 = vmatmul.bf16.gmra.mxu3 %v1975_v45 }
  0xaf   : > { %v892_v48 = vpop.f32.mrf.mxu2  ;;  %v972_v49 = vpop.f32.mrf.mxu3 }
  0xb0   : > { %v734_v50 = vpop.f32.mrf.mxu0  ;;  %v814_v51 = vpop.f32.mrf.mxu1  ;;  %v1116_v60 = vmul.f32 0.2, %v892_v48  ;;  %v1148_v61 = vmul.f32 0.2, %v972_v49 }
  0xb1   : > { %v1053_v52 = vmul.f32 0.2, %v734_v50  ;;  %v1085_v53 = vmul.f32 0.2, %v814_v51 }
  0xb2   : > { %v1244_v8 = vmax.f32 %v892_v48, %v1116_v60  ;;  %v1276_v9 = vmax.f32 %v972_v49, %v1148_v61 }
  0xb3   : > { %v1181_v56 = vmax.f32 %v734_v50, %v1053_v52  ;;  %v1213_v57 = vmax.f32 %v814_v51, %v1085_v53 }
  0xb5   : > { %v1994_v58 = vpack.c.bf16 %v1181_v56, %v1180_v54  ;;  %v2074_v59 = vpack.c.bf16 %v1213_v57, %v1212_v55 }
  0xb7   : > { %1995 = vst [vmem:[%s2512_s6] sm:$0xff] %v1994_v58   ;;  %v894_v62 = vpop.f32.mrf.mxu2  ;;  %v974_v63 = vpop.f32.mrf.mxu3 }
  0xb8   : > { %2326 = vst [vmem:[%s2512_s6 + $0x80] sm:$0xff] %v2074_v59   ;;  %v1117_v3 = vmul.f32 0.2, %v894_v62  ;;  %v1149_v4 = vmul.f32 0.2, %v974_v63  ;;  %v737_v5 = vpop.f32.mrf.mxu0  ;;  %v817_v6 = vpop.f32.mrf.mxu1 }
  0xb9   : > { %v1054_v14 = vmul.f32 0.2, %v737_v5  ;;  %v1086_v15 = vmul.f32 0.2, %v817_v6 }
  0xba   : > { %v1245_v10 = vmax.f32 %v894_v62, %v1117_v3  ;;  %v1277_v11 = vmax.f32 %v974_v63, %v1149_v4 }
  0xbb   : > { %776 = vmatmul.bf16.gmra.mxu0 %v1928_v0  ;;  %856 = vmatmul.bf16.gmra.mxu1 %v1944_v1  ;;  %v1182_v22 = vmax.f32 %v737_v5, %v1054_v14  ;;  %v1214_v23 = vmax.f32 %v817_v6, %v1086_v15  ;;  %v1930_v0 = vld [vmem:[%s2469_s3 + $0x58] sm:$0xff] }
  0xbc   : > { %v2154_v12 = vpack.c.bf16 %v1245_v10, %v1244_v8  ;;  %v2234_v13 = vpack.c.bf16 %v1277_v11, %v1276_v9  ;;  %936 = vmatmul.bf16.gmra.mxu2 %v1960_v2  ;;  %1016 = vmatmul.bf16.gmra.mxu3 %v1976_v7  ;;  %v1946_v1 = vld [vmem:[%s2469_s3 + $0xd8] sm:$0xff] }
  0xbd   : > { %v1962_v2 = vld [vmem:[%s2469_s3 + $0x158] sm:$0xff] }
  0xbe   : > { %2342 = vst [vmem:[%s2512_s6 + $0x100] sm:$0xff] %v2154_v12   ;;  %v1978_v7 = vld [vmem:[%s2469_s3 + $0x1d8] sm:$0xff] }
  0xbf   : > { %2358 = vst [vmem:[%s2512_s6 + $0x180] sm:$0xff] %v2234_v13   ;;  %v897_v16 = vpop.f32.mrf.mxu2  ;;  %v977_v17 = vpop.f32.mrf.mxu3 }
  0xc0   : > { %v739_v18 = vpop.f32.mrf.mxu0  ;;  %v819_v19 = vpop.f32.mrf.mxu1  ;;  %v1118_v28 = vmul.f32 0.2, %v897_v16  ;;  %v1150_v29 = vmul.f32 0.2, %v977_v17 }
  0xc1   : > { %v1055_v20 = vmul.f32 0.2, %v739_v18  ;;  %v1087_v21 = vmul.f32 0.2, %v819_v19 }
  0xc2   : > { %v1246_v40 = vmax.f32 %v897_v16, %v1118_v28  ;;  %v1278_v41 = vmax.f32 %v977_v17, %v1150_v29 }
  0xc3   : > { %v1183_v24 = vmax.f32 %v739_v18, %v1055_v20  ;;  %v1215_v25 = vmax.f32 %v819_v19, %v1087_v21 }
  0xc5   : > { %v1999_v26 = vpack.c.bf16 %v1183_v24, %v1182_v22  ;;  %v2079_v27 = vpack.c.bf16 %v1215_v25, %v1214_v23 }
  0xc7   : > { %2311 = vst [vmem:[%s2512_s6 + $0x8] sm:$0xff] %v1999_v26   ;;  %v899_v30 = vpop.f32.mrf.mxu2  ;;  %v979_v31 = vpop.f32.mrf.mxu3 }
  0xc8   : > { %2327 = vst [vmem:[%s2512_s6 + $0x88] sm:$0xff] %v2079_v27   ;;  %v1119_v35 = vmul.f32 0.2, %v899_v30  ;;  %v1151_v36 = vmul.f32 0.2, %v979_v31  ;;  %v742_v37 = vpop.f32.mrf.mxu0  ;;  %v822_v38 = vpop.f32.mrf.mxu1 }
  0xc9   : > { %v1056_v46 = vmul.f32 0.2, %v742_v37  ;;  %v1088_v47 = vmul.f32 0.2, %v822_v38 }
  0xca   : > { %v1247_v42 = vmax.f32 %v899_v30, %v1119_v35  ;;  %v1279_v43 = vmax.f32 %v979_v31, %v1151_v36 }
  0xcb   : > { %781 = vmatmul.bf16.gmra.mxu0 %v1929_v32  ;;  %861 = vmatmul.bf16.gmra.mxu1 %v1945_v33  ;;  %v1184_v54 = vmax.f32 %v742_v37, %v1056_v46  ;;  %v1216_v55 = vmax.f32 %v822_v38, %v1088_v47  ;;  %v1931_v32 = vld [vmem:[%s2469_s3 + $0x60] sm:$0xff] }
  0xcc   : > { %v2159_v44 = vpack.c.bf16 %v1247_v42, %v1246_v40  ;;  %v2239_v45 = vpack.c.bf16 %v1279_v43, %v1278_v41  ;;  %941 = vmatmul.bf16.gmra.mxu2 %v1961_v34  ;;  %1021 = vmatmul.bf16.gmra.mxu3 %v1977_v39  ;;  %v1947_v33 = vld [vmem:[%s2469_s3 + $0xe0] sm:$0xff] }
  0xcd   : > { %v1963_v34 = vld [vmem:[%s2469_s3 + $0x160] sm:$0xff] }
  0xce   : > { %2343 = vst [vmem:[%s2512_s6 + $0x108] sm:$0xff] %v2159_v44   ;;  %v1979_v39 = vld [vmem:[%s2469_s3 + $0x1e0] sm:$0xff] }
  0xcf   : > { %2359 = vst [vmem:[%s2512_s6 + $0x188] sm:$0xff] %v2239_v45   ;;  %v902_v48 = vpop.f32.mrf.mxu2  ;;  %v982_v49 = vpop.f32.mrf.mxu3 }
  0xd0   : > { %v744_v50 = vpop.f32.mrf.mxu0  ;;  %v824_v51 = vpop.f32.mrf.mxu1  ;;  %v1120_v60 = vmul.f32 0.2, %v902_v48  ;;  %v1152_v61 = vmul.f32 0.2, %v982_v49 }
  0xd1   : > { %v1057_v52 = vmul.f32 0.2, %v744_v50  ;;  %v1089_v53 = vmul.f32 0.2, %v824_v51 }
  0xd2   : > { %v1248_v8 = vmax.f32 %v902_v48, %v1120_v60  ;;  %v1280_v9 = vmax.f32 %v982_v49, %v1152_v61 }
  0xd3   : > { %v1185_v56 = vmax.f32 %v744_v50, %v1057_v52  ;;  %v1217_v57 = vmax.f32 %v824_v51, %v1089_v53 }
  0xd5   : > { %v2004_v58 = vpack.c.bf16 %v1185_v56, %v1184_v54  ;;  %v2084_v59 = vpack.c.bf16 %v1217_v57, %v1216_v55 }
  0xd7   : > { %2312 = vst [vmem:[%s2512_s6 + $0x10] sm:$0xff] %v2004_v58   ;;  %v904_v62 = vpop.f32.mrf.mxu2  ;;  %v984_v63 = vpop.f32.mrf.mxu3 }
  0xd8   : > { %2328 = vst [vmem:[%s2512_s6 + $0x90] sm:$0xff] %v2084_v59   ;;  %v1121_v3 = vmul.f32 0.2, %v904_v62  ;;  %v1153_v4 = vmul.f32 0.2, %v984_v63  ;;  %v747_v5 = vpop.f32.mrf.mxu0  ;;  %v827_v6 = vpop.f32.mrf.mxu1 }
  0xd9   : > { %v1058_v14 = vmul.f32 0.2, %v747_v5  ;;  %v1090_v15 = vmul.f32 0.2, %v827_v6 }
  0xda   : > { %v1249_v10 = vmax.f32 %v904_v62, %v1121_v3  ;;  %v1281_v11 = vmax.f32 %v984_v63, %v1153_v4 }
  0xdb   : > { %786 = vmatmul.bf16.gmra.mxu0 %v1930_v0  ;;  %866 = vmatmul.bf16.gmra.mxu1 %v1946_v1  ;;  %v1186_v22 = vmax.f32 %v747_v5, %v1058_v14  ;;  %v1218_v23 = vmax.f32 %v827_v6, %v1090_v15  ;;  %v1932_v0 = vld [vmem:[%s2469_s3 + $0x68] sm:$0xff] }
  0xdc   : > { %v2164_v12 = vpack.c.bf16 %v1249_v10, %v1248_v8  ;;  %v2244_v13 = vpack.c.bf16 %v1281_v11, %v1280_v9  ;;  %946 = vmatmul.bf16.gmra.mxu2 %v1962_v2  ;;  %1026 = vmatmul.bf16.gmra.mxu3 %v1978_v7  ;;  %v1948_v1 = vld [vmem:[%s2469_s3 + $0xe8] sm:$0xff] }
  0xdd   : > { %v1964_v2 = vld [vmem:[%s2469_s3 + $0x168] sm:$0xff] }
  0xde   : > { %2344 = vst [vmem:[%s2512_s6 + $0x110] sm:$0xff] %v2164_v12   ;;  %v1980_v7 = vld [vmem:[%s2469_s3 + $0x1e8] sm:$0xff] }
  0xdf   : > { %2360 = vst [vmem:[%s2512_s6 + $0x190] sm:$0xff] %v2244_v13   ;;  %v907_v16 = vpop.f32.mrf.mxu2  ;;  %v987_v17 = vpop.f32.mrf.mxu3 }
  0xe0   : > { %v749_v18 = vpop.f32.mrf.mxu0  ;;  %v829_v19 = vpop.f32.mrf.mxu1  ;;  %v1122_v28 = vmul.f32 0.2, %v907_v16  ;;  %v1154_v29 = vmul.f32 0.2, %v987_v17 }
  0xe1   : > { %v1059_v20 = vmul.f32 0.2, %v749_v18  ;;  %v1091_v21 = vmul.f32 0.2, %v829_v19 }
  0xe2   : > { %v1250_v40 = vmax.f32 %v907_v16, %v1122_v28  ;;  %v1282_v41 = vmax.f32 %v987_v17, %v1154_v29 }
  0xe3   : > { %v1187_v24 = vmax.f32 %v749_v18, %v1059_v20  ;;  %v1219_v25 = vmax.f32 %v829_v19, %v1091_v21 }
  0xe5   : > { %v2009_v26 = vpack.c.bf16 %v1187_v24, %v1186_v22  ;;  %v2089_v27 = vpack.c.bf16 %v1219_v25, %v1218_v23 }
  0xe7   : > { %2313 = vst [vmem:[%s2512_s6 + $0x18] sm:$0xff] %v2009_v26   ;;  %v909_v30 = vpop.f32.mrf.mxu2  ;;  %v989_v31 = vpop.f32.mrf.mxu3 }
  0xe8   : > { %2329 = vst [vmem:[%s2512_s6 + $0x98] sm:$0xff] %v2089_v27   ;;  %v1123_v35 = vmul.f32 0.2, %v909_v30  ;;  %v1155_v36 = vmul.f32 0.2, %v989_v31  ;;  %v752_v37 = vpop.f32.mrf.mxu0  ;;  %v832_v38 = vpop.f32.mrf.mxu1 }
  0xe9   : > { %v1060_v46 = vmul.f32 0.2, %v752_v37  ;;  %v1092_v47 = vmul.f32 0.2, %v832_v38 }
  0xea   : > { %v1251_v42 = vmax.f32 %v909_v30, %v1123_v35  ;;  %v1283_v43 = vmax.f32 %v989_v31, %v1155_v36 }
  0xeb   : > { %791 = vmatmul.bf16.gmra.mxu0 %v1931_v32  ;;  %871 = vmatmul.bf16.gmra.mxu1 %v1947_v33  ;;  %v1188_v54 = vmax.f32 %v752_v37, %v1060_v46  ;;  %v1220_v55 = vmax.f32 %v832_v38, %v1092_v47  ;;  %v1933_v32 = vld [vmem:[%s2469_s3 + $0x70] sm:$0xff] }
  0xec   : > { %v2169_v44 = vpack.c.bf16 %v1251_v42, %v1250_v40  ;;  %v2249_v45 = vpack.c.bf16 %v1283_v43, %v1282_v41  ;;  %951 = vmatmul.bf16.gmra.mxu2 %v1963_v34  ;;  %1031 = vmatmul.bf16.gmra.mxu3 %v1979_v39  ;;  %v1949_v33 = vld [vmem:[%s2469_s3 + $0xf0] sm:$0xff] }
  0xed   : > { %v1965_v34 = vld [vmem:[%s2469_s3 + $0x170] sm:$0xff] }
  0xee   : > { %2345 = vst [vmem:[%s2512_s6 + $0x118] sm:$0xff] %v2169_v44   ;;  %v1981_v39 = vld [vmem:[%s2469_s3 + $0x1f0] sm:$0xff] }
  0xef   : > { %2361 = vst [vmem:[%s2512_s6 + $0x198] sm:$0xff] %v2249_v45   ;;  %v912_v48 = vpop.f32.mrf.mxu2  ;;  %v992_v49 = vpop.f32.mrf.mxu3 }
  0xf0   : > { %v754_v50 = vpop.f32.mrf.mxu0  ;;  %v834_v51 = vpop.f32.mrf.mxu1  ;;  %v1124_v60 = vmul.f32 0.2, %v912_v48  ;;  %v1156_v61 = vmul.f32 0.2, %v992_v49 }
  0xf1   : > { %v1061_v52 = vmul.f32 0.2, %v754_v50  ;;  %v1093_v53 = vmul.f32 0.2, %v834_v51 }
  0xf2   : > { %v1252_v8 = vmax.f32 %v912_v48, %v1124_v60  ;;  %v1284_v9 = vmax.f32 %v992_v49, %v1156_v61 }
  0xf3   : > { %v1189_v56 = vmax.f32 %v754_v50, %v1061_v52  ;;  %v1221_v57 = vmax.f32 %v834_v51, %v1093_v53 }
  0xf5   : > { %v2014_v58 = vpack.c.bf16 %v1189_v56, %v1188_v54  ;;  %v2094_v59 = vpack.c.bf16 %v1221_v57, %v1220_v55 }
  0xf7   : > { %2314 = vst [vmem:[%s2512_s6 + $0x20] sm:$0xff] %v2014_v58   ;;  %v914_v62 = vpop.f32.mrf.mxu2  ;;  %v994_v63 = vpop.f32.mrf.mxu3 }
  0xf8   : > { %2330 = vst [vmem:[%s2512_s6 + $0xa0] sm:$0xff] %v2094_v59   ;;  %v1125_v3 = vmul.f32 0.2, %v914_v62  ;;  %v1157_v4 = vmul.f32 0.2, %v994_v63  ;;  %v757_v5 = vpop.f32.mrf.mxu0  ;;  %v837_v6 = vpop.f32.mrf.mxu1 }
  0xf9   : > { %v1062_v14 = vmul.f32 0.2, %v757_v5  ;;  %v1094_v15 = vmul.f32 0.2, %v837_v6 }
  0xfa   : > { %v1253_v10 = vmax.f32 %v914_v62, %v1125_v3  ;;  %v1285_v11 = vmax.f32 %v994_v63, %v1157_v4 }
  0xfb   : > { %796 = vmatmul.bf16.gmra.mxu0 %v1932_v0  ;;  %876 = vmatmul.bf16.gmra.mxu1 %v1948_v1  ;;  %v1190_v22 = vmax.f32 %v757_v5, %v1062_v14  ;;  %v1222_v23 = vmax.f32 %v837_v6, %v1094_v15  ;;  %v1934_v0 = vld [vmem:[%s2469_s3 + $0x78] sm:$0xff] }
  0xfc   : > { %v2174_v12 = vpack.c.bf16 %v1253_v10, %v1252_v8  ;;  %v2254_v13 = vpack.c.bf16 %v1285_v11, %v1284_v9  ;;  %956 = vmatmul.bf16.gmra.mxu2 %v1964_v2  ;;  %1036 = vmatmul.bf16.gmra.mxu3 %v1980_v7  ;;  %v1950_v1 = vld [vmem:[%s2469_s3 + $0xf8] sm:$0xff] }
  0xfd   : > { %v1966_v2 = vld [vmem:[%s2469_s3 + $0x178] sm:$0xff] }
  0xfe   : > { %2346 = vst [vmem:[%s2512_s6 + $0x120] sm:$0xff] %v2174_v12   ;;  %v1982_v7 = vld [vmem:[%s2469_s3 + $0x1f8] sm:$0xff] }
  0xff   : > { %2362 = vst [vmem:[%s2512_s6 + $0x1a0] sm:$0xff] %v2254_v13   ;;  %v917_v16 = vpop.f32.mrf.mxu2  ;;  %v997_v17 = vpop.f32.mrf.mxu3 }
 0x100   : > { %v759_v18 = vpop.f32.mrf.mxu0  ;;  %v839_v19 = vpop.f32.mrf.mxu1  ;;  %v1126_v28 = vmul.f32 0.2, %v917_v16  ;;  %v1158_v29 = vmul.f32 0.2, %v997_v17 }
 0x101   : > { %v1063_v20 = vmul.f32 0.2, %v759_v18  ;;  %v1095_v21 = vmul.f32 0.2, %v839_v19 }
 0x102   : > { %v1254_v40 = vmax.f32 %v917_v16, %v1126_v28  ;;  %v1286_v41 = vmax.f32 %v997_v17, %v1158_v29 }
 0x103   : > { %v1191_v24 = vmax.f32 %v759_v18, %v1063_v20  ;;  %v1223_v25 = vmax.f32 %v839_v19, %v1095_v21 }
 0x105   : > { %v2019_v26 = vpack.c.bf16 %v1191_v24, %v1190_v22  ;;  %v2099_v27 = vpack.c.bf16 %v1223_v25, %v1222_v23 }
 0x107   : > { %2315 = vst [vmem:[%s2512_s6 + $0x28] sm:$0xff] %v2019_v26   ;;  %v919_v30 = vpop.f32.mrf.mxu2  ;;  %v999_v31 = vpop.f32.mrf.mxu3 }
 0x108   : > { %2331 = vst [vmem:[%s2512_s6 + $0xa8] sm:$0xff] %v2099_v27   ;;  %v1127_v35 = vmul.f32 0.2, %v919_v30  ;;  %v1159_v36 = vmul.f32 0.2, %v999_v31  ;;  %v762_v37 = vpop.f32.mrf.mxu0  ;;  %v842_v38 = vpop.f32.mrf.mxu1 }
 0x109   : > { %v1064_v46 = vmul.f32 0.2, %v762_v37  ;;  %v1096_v47 = vmul.f32 0.2, %v842_v38 }
 0x10a   : > { %v1255_v42 = vmax.f32 %v919_v30, %v1127_v35  ;;  %v1287_v43 = vmax.f32 %v999_v31, %v1159_v36 }
 0x10b   : > { %801 = vmatmul.bf16.gmra.mxu0 %v1933_v32  ;;  %881 = vmatmul.bf16.gmra.mxu1 %v1949_v33  ;;  %v1192_v54 = vmax.f32 %v762_v37, %v1064_v46  ;;  %v1224_v55 = vmax.f32 %v842_v38, %v1096_v47 }
 0x10c   : > { %v2179_v44 = vpack.c.bf16 %v1255_v42, %v1254_v40  ;;  %v2259_v45 = vpack.c.bf16 %v1287_v43, %v1286_v41  ;;  %961 = vmatmul.bf16.gmra.mxu2 %v1965_v34  ;;  %1041 = vmatmul.bf16.gmra.mxu3 %v1981_v39 }
 0x10e   : > { %2347 = vst [vmem:[%s2512_s6 + $0x128] sm:$0xff] %v2179_v44  }
 0x10f   : > { %2363 = vst [vmem:[%s2512_s6 + $0x1a8] sm:$0xff] %v2259_v45   ;;  %v922_v48 = vpop.f32.mrf.mxu2  ;;  %v1002_v49 = vpop.f32.mrf.mxu3 }
 0x110   : > { %v764_v50 = vpop.f32.mrf.mxu0  ;;  %v844_v51 = vpop.f32.mrf.mxu1  ;;  %v1128_v60 = vmul.f32 0.2, %v922_v48  ;;  %v1160_v61 = vmul.f32 0.2, %v1002_v49 }
 0x111   : > { %v1065_v52 = vmul.f32 0.2, %v764_v50  ;;  %v1097_v53 = vmul.f32 0.2, %v844_v51 }
 0x112   : > { %v1256_v8 = vmax.f32 %v922_v48, %v1128_v60  ;;  %v1288_v9 = vmax.f32 %v1002_v49, %v1160_v61 }
 0x113   : > { %v1193_v56 = vmax.f32 %v764_v50, %v1065_v52  ;;  %v1225_v57 = vmax.f32 %v844_v51, %v1097_v53 }
 0x115   : > { %v2024_v58 = vpack.c.bf16 %v1193_v56, %v1192_v54  ;;  %v2104_v59 = vpack.c.bf16 %v1225_v57, %v1224_v55 }
 0x117   : > { %2316 = vst [vmem:[%s2512_s6 + $0x30] sm:$0xff] %v2024_v58   ;;  %v924_v62 = vpop.f32.mrf.mxu2  ;;  %v1004_v63 = vpop.f32.mrf.mxu3 }
 0x118   : > { %2332 = vst [vmem:[%s2512_s6 + $0xb0] sm:$0xff] %v2104_v59   ;;  %v1129_v3 = vmul.f32 0.2, %v924_v62  ;;  %v1161_v4 = vmul.f32 0.2, %v1004_v63  ;;  %v767_v5 = vpop.f32.mrf.mxu0  ;;  %v847_v6 = vpop.f32.mrf.mxu1 }
 0x119   : > { %v1066_v14 = vmul.f32 0.2, %v767_v5  ;;  %v1098_v15 = vmul.f32 0.2, %v847_v6 }
 0x11a   : > { %v1257_v10 = vmax.f32 %v924_v62, %v1129_v3  ;;  %v1289_v11 = vmax.f32 %v1004_v63, %v1161_v4 }
 0x11b   : > { %806 = vmatmul.bf16.gmra.mxu0 %v1934_v0  ;;  %886 = vmatmul.bf16.gmra.mxu1 %v1950_v1  ;;  %v1194_v22 = vmax.f32 %v767_v5, %v1066_v14  ;;  %v1226_v23 = vmax.f32 %v847_v6, %v1098_v15 }
 0x11c   : > { %v2184_v12 = vpack.c.bf16 %v1257_v10, %v1256_v8  ;;  %v2264_v13 = vpack.c.bf16 %v1289_v11, %v1288_v9  ;;  %966 = vmatmul.bf16.gmra.mxu2 %v1966_v2  ;;  %1046 = vmatmul.bf16.gmra.mxu3 %v1982_v7 }
 0x11e   : > { %2348 = vst [vmem:[%s2512_s6 + $0x130] sm:$0xff] %v2184_v12  }
 0x11f   : > { %2364 = vst [vmem:[%s2512_s6 + $0x1b0] sm:$0xff] %v2264_v13   ;;  %v927_v16 = vpop.f32.mrf.mxu2  ;;  %v1007_v17 = vpop.f32.mrf.mxu3 }
 0x120   : > { %v769_v18 = vpop.f32.mrf.mxu0  ;;  %v849_v19 = vpop.f32.mrf.mxu1  ;;  %v1130_v28 = vmul.f32 0.2, %v927_v16  ;;  %v1162_v29 = vmul.f32 0.2, %v1007_v17 }
 0x121   : > { %v1067_v20 = vmul.f32 0.2, %v769_v18  ;;  %v1099_v21 = vmul.f32 0.2, %v849_v19 }
 0x122   : > { %v1258_v36 = vmax.f32 %v927_v16, %v1130_v28  ;;  %v1290_v37 = vmax.f32 %v1007_v17, %v1162_v29 }
 0x123   : > { %v1195_v24 = vmax.f32 %v769_v18, %v1067_v20  ;;  %v1227_v25 = vmax.f32 %v849_v19, %v1099_v21 }
 0x125   : > { %v2029_v26 = vpack.c.bf16 %v1195_v24, %v1194_v22  ;;  %v2109_v27 = vpack.c.bf16 %v1227_v25, %v1226_v23 }
 0x127   : > { %2317 = vst [vmem:[%s2512_s6 + $0x38] sm:$0xff] %v2029_v26   ;;  %v929_v30 = vpop.f32.mrf.mxu2  ;;  %v1009_v31 = vpop.f32.mrf.mxu3 }
 0x128   : > { %2333 = vst [vmem:[%s2512_s6 + $0xb8] sm:$0xff] %v2109_v27   ;;  %v1131_v32 = vmul.f32 0.2, %v929_v30  ;;  %v1163_v33 = vmul.f32 0.2, %v1009_v31  ;;  %v772_v34 = vpop.f32.mrf.mxu0  ;;  %v852_v35 = vpop.f32.mrf.mxu1 }
 0x129   : > { %v1068_v42 = vmul.f32 0.2, %v772_v34  ;;  %v1100_v43 = vmul.f32 0.2, %v852_v35 }
 0x12a   : > { %v1259_v38 = vmax.f32 %v929_v30, %v1131_v32  ;;  %v1291_v39 = vmax.f32 %v1009_v31, %v1163_v33 }
 0x12b   : > { %v1196_v50 = vmax.f32 %v772_v34, %v1068_v42  ;;  %v1228_v51 = vmax.f32 %v852_v35, %v1100_v43 }
 0x12c   : > { %v2189_v40 = vpack.c.bf16 %v1259_v38, %v1258_v36  ;;  %v2269_v41 = vpack.c.bf16 %v1291_v39, %v1290_v37 }
 0x12e   : > { %2349 = vst [vmem:[%s2512_s6 + $0x138] sm:$0xff] %v2189_v40  }
 0x12f   : > { %2365 = vst [vmem:[%s2512_s6 + $0x1b8] sm:$0xff] %v2269_v41   ;;  %v932_v44 = vpop.f32.mrf.mxu2  ;;  %v1012_v45 = vpop.f32.mrf.mxu3 }
 0x130   : > { %v774_v46 = vpop.f32.mrf.mxu0  ;;  %v854_v47 = vpop.f32.mrf.mxu1  ;;  %v1132_v56 = vmul.f32 0.2, %v932_v44  ;;  %v1164_v57 = vmul.f32 0.2, %v1012_v45 }
 0x131   : > { %v1069_v48 = vmul.f32 0.2, %v774_v46  ;;  %v1101_v49 = vmul.f32 0.2, %v854_v47 }
 0x132   : > { %v1260_v0 = vmax.f32 %v932_v44, %v1132_v56  ;;  %v1292_v1 = vmax.f32 %v1012_v45, %v1164_v57 }
 0x133   : > { %v1197_v52 = vmax.f32 %v774_v46, %v1069_v48  ;;  %v1229_v53 = vmax.f32 %v854_v47, %v1101_v49 }
 0x135   : > { %v2034_v54 = vpack.c.bf16 %v1197_v52, %v1196_v50  ;;  %v2114_v55 = vpack.c.bf16 %v1229_v53, %v1228_v51 }
 0x137   : > { %2318 = vst [vmem:[%s2512_s6 + $0x40] sm:$0xff] %v2034_v54   ;;  %v934_v58 = vpop.f32.mrf.mxu2  ;;  %v1014_v59 = vpop.f32.mrf.mxu3 }
 0x138   : > { %2334 = vst [vmem:[%s2512_s6 + $0xc0] sm:$0xff] %v2114_v55   ;;  %v1133_v60 = vmul.f32 0.2, %v934_v58  ;;  %v1165_v61 = vmul.f32 0.2, %v1014_v59  ;;  %v777_v62 = vpop.f32.mrf.mxu0  ;;  %v857_v63 = vpop.f32.mrf.mxu1 }
 0x139   : > { %v1070_v6 = vmul.f32 0.2, %v777_v62  ;;  %v1102_v7 = vmul.f32 0.2, %v857_v63 }
 0x13a   : > { %v1261_v2 = vmax.f32 %v934_v58, %v1133_v60  ;;  %v1293_v3 = vmax.f32 %v1014_v59, %v1165_v61 }
 0x13b   : > { %v1198_v14 = vmax.f32 %v777_v62, %v1070_v6  ;;  %v1230_v15 = vmax.f32 %v857_v63, %v1102_v7 }
 0x13c   : > { %v2194_v4 = vpack.c.bf16 %v1261_v2, %v1260_v0  ;;  %v2274_v5 = vpack.c.bf16 %v1293_v3, %v1292_v1 }
 0x13e   : > { %2350 = vst [vmem:[%s2512_s6 + $0x140] sm:$0xff] %v2194_v4  }
 0x13f   : > { %2366 = vst [vmem:[%s2512_s6 + $0x1c0] sm:$0xff] %v2274_v5   ;;  %v937_v8 = vpop.f32.mrf.mxu2  ;;  %v1017_v9 = vpop.f32.mrf.mxu3 }
 0x140   : > { %v779_v10 = vpop.f32.mrf.mxu0  ;;  %v859_v11 = vpop.f32.mrf.mxu1  ;;  %v1134_v20 = vmul.f32 0.2, %v937_v8  ;;  %v1166_v21 = vmul.f32 0.2, %v1017_v9 }
 0x141   : > { %v1071_v12 = vmul.f32 0.2, %v779_v10  ;;  %v1103_v13 = vmul.f32 0.2, %v859_v11 }
 0x142   : > { %v1262_v28 = vmax.f32 %v937_v8, %v1134_v20  ;;  %v1294_v29 = vmax.f32 %v1017_v9, %v1166_v21 }
 0x143   : > { %v1199_v16 = vmax.f32 %v779_v10, %v1071_v12  ;;  %v1231_v17 = vmax.f32 %v859_v11, %v1103_v13 }
 0x145   : > { %v2039_v18 = vpack.c.bf16 %v1199_v16, %v1198_v14  ;;  %v2119_v19 = vpack.c.bf16 %v1231_v17, %v1230_v15 }
 0x147   : > { %2319 = vst [vmem:[%s2512_s6 + $0x48] sm:$0xff] %v2039_v18   ;;  %v939_v22 = vpop.f32.mrf.mxu2  ;;  %v1019_v23 = vpop.f32.mrf.mxu3 }
 0x148   : > { %2335 = vst [vmem:[%s2512_s6 + $0xc8] sm:$0xff] %v2119_v19   ;;  %v1135_v24 = vmul.f32 0.2, %v939_v22  ;;  %v1167_v25 = vmul.f32 0.2, %v1019_v23  ;;  %v782_v26 = vpop.f32.mrf.mxu0  ;;  %v862_v27 = vpop.f32.mrf.mxu1 }
 0x149   : > { %v1072_v34 = vmul.f32 0.2, %v782_v26  ;;  %v1104_v35 = vmul.f32 0.2, %v862_v27 }
 0x14a   : > { %v1263_v30 = vmax.f32 %v939_v22, %v1135_v24  ;;  %v1295_v31 = vmax.f32 %v1019_v23, %v1167_v25 }
 0x14b   : > { %v1200_v42 = vmax.f32 %v782_v26, %v1072_v34  ;;  %v1232_v43 = vmax.f32 %v862_v27, %v1104_v35 }
 0x14c   : > { %v2199_v32 = vpack.c.bf16 %v1263_v30, %v1262_v28  ;;  %v2279_v33 = vpack.c.bf16 %v1295_v31, %v1294_v29 }
 0x14e   : > { %2351 = vst [vmem:[%s2512_s6 + $0x148] sm:$0xff] %v2199_v32  }
 0x14f   : > { %2367 = vst [vmem:[%s2512_s6 + $0x1c8] sm:$0xff] %v2279_v33   ;;  %v942_v36 = vpop.f32.mrf.mxu2  ;;  %v1022_v37 = vpop.f32.mrf.mxu3 }
 0x150   : > { %v784_v38 = vpop.f32.mrf.mxu0  ;;  %v864_v39 = vpop.f32.mrf.mxu1  ;;  %v1136_v48 = vmul.f32 0.2, %v942_v36  ;;  %v1168_v49 = vmul.f32 0.2, %v1022_v37 }
 0x151   : > { %v1073_v40 = vmul.f32 0.2, %v784_v38  ;;  %v1105_v41 = vmul.f32 0.2, %v864_v39 }
 0x152   : > { %v1264_v56 = vmax.f32 %v942_v36, %v1136_v48  ;;  %v1296_v57 = vmax.f32 %v1022_v37, %v1168_v49 }
 0x153   : > { %v1201_v44 = vmax.f32 %v784_v38, %v1073_v40  ;;  %v1233_v45 = vmax.f32 %v864_v39, %v1105_v41 }
 0x155   : > { %v2044_v46 = vpack.c.bf16 %v1201_v44, %v1200_v42  ;;  %v2124_v47 = vpack.c.bf16 %v1233_v45, %v1232_v43 }
 0x157   : > { %2320 = vst [vmem:[%s2512_s6 + $0x50] sm:$0xff] %v2044_v46   ;;  %v944_v50 = vpop.f32.mrf.mxu2  ;;  %v1024_v51 = vpop.f32.mrf.mxu3 }
 0x158   : > { %2336 = vst [vmem:[%s2512_s6 + $0xd0] sm:$0xff] %v2124_v47   ;;  %v1137_v52 = vmul.f32 0.2, %v944_v50  ;;  %v1169_v53 = vmul.f32 0.2, %v1024_v51  ;;  %v787_v54 = vpop.f32.mrf.mxu0  ;;  %v867_v55 = vpop.f32.mrf.mxu1 }
 0x159   : > { %v1074_v62 = vmul.f32 0.2, %v787_v54  ;;  %v1106_v63 = vmul.f32 0.2, %v867_v55 }
 0x15a   : > { %v1265_v58 = vmax.f32 %v944_v50, %v1137_v52  ;;  %v1297_v59 = vmax.f32 %v1024_v51, %v1169_v53 }
 0x15b   : > { %v1202_v6 = vmax.f32 %v787_v54, %v1074_v62  ;;  %v1234_v7 = vmax.f32 %v867_v55, %v1106_v63 }
 0x15c   : > { %v2204_v60 = vpack.c.bf16 %v1265_v58, %v1264_v56  ;;  %v2284_v61 = vpack.c.bf16 %v1297_v59, %v1296_v57 }
 0x15e   : > { %2352 = vst [vmem:[%s2512_s6 + $0x150] sm:$0xff] %v2204_v60  }
 0x15f   : > { %2368 = vst [vmem:[%s2512_s6 + $0x1d0] sm:$0xff] %v2284_v61   ;;  %v947_v0 = vpop.f32.mrf.mxu2  ;;  %v1027_v1 = vpop.f32.mrf.mxu3 }
 0x160   : > { %v789_v2 = vpop.f32.mrf.mxu0  ;;  %v869_v3 = vpop.f32.mrf.mxu1  ;;  %v1138_v12 = vmul.f32 0.2, %v947_v0  ;;  %v1170_v13 = vmul.f32 0.2, %v1027_v1 }
 0x161   : > { %v1075_v4 = vmul.f32 0.2, %v789_v2  ;;  %v1107_v5 = vmul.f32 0.2, %v869_v3 }
 0x162   : > { %v1266_v20 = vmax.f32 %v947_v0, %v1138_v12  ;;  %v1298_v21 = vmax.f32 %v1027_v1, %v1170_v13 }
 0x163   : > { %v1203_v8 = vmax.f32 %v789_v2, %v1075_v4  ;;  %v1235_v9 = vmax.f32 %v869_v3, %v1107_v5 }
 0x165   : > { %v2049_v10 = vpack.c.bf16 %v1203_v8, %v1202_v6  ;;  %v2129_v11 = vpack.c.bf16 %v1235_v9, %v1234_v7 }
 0x167   : > { %2321 = vst [vmem:[%s2512_s6 + $0x58] sm:$0xff] %v2049_v10   ;;  %v949_v14 = vpop.f32.mrf.mxu2  ;;  %v1029_v15 = vpop.f32.mrf.mxu3 }
 0x168   : > { %2337 = vst [vmem:[%s2512_s6 + $0xd8] sm:$0xff] %v2129_v11   ;;  %v1139_v16 = vmul.f32 0.2, %v949_v14  ;;  %v1171_v17 = vmul.f32 0.2, %v1029_v15  ;;  %v792_v18 = vpop.f32.mrf.mxu0  ;;  %v872_v19 = vpop.f32.mrf.mxu1 }
 0x169   : > { %v1076_v26 = vmul.f32 0.2, %v792_v18  ;;  %v1108_v27 = vmul.f32 0.2, %v872_v19 }
 0x16a   : > { %v1267_v22 = vmax.f32 %v949_v14, %v1139_v16  ;;  %v1299_v23 = vmax.f32 %v1029_v15, %v1171_v17 }
 0x16b   : > { %v1204_v34 = vmax.f32 %v792_v18, %v1076_v26  ;;  %v1236_v35 = vmax.f32 %v872_v19, %v1108_v27 }
 0x16c   : > { %v2209_v24 = vpack.c.bf16 %v1267_v22, %v1266_v20  ;;  %v2289_v25 = vpack.c.bf16 %v1299_v23, %v1298_v21 }
 0x16e   : > { %2353 = vst [vmem:[%s2512_s6 + $0x158] sm:$0xff] %v2209_v24  }
 0x16f   : > { %2369 = vst [vmem:[%s2512_s6 + $0x1d8] sm:$0xff] %v2289_v25   ;;  %v952_v28 = vpop.f32.mrf.mxu2  ;;  %v1032_v29 = vpop.f32.mrf.mxu3 }
 0x170   : > { %v794_v30 = vpop.f32.mrf.mxu0  ;;  %v874_v31 = vpop.f32.mrf.mxu1  ;;  %v1140_v40 = vmul.f32 0.2, %v952_v28  ;;  %v1172_v41 = vmul.f32 0.2, %v1032_v29 }
 0x171   : > { %v1077_v32 = vmul.f32 0.2, %v794_v30  ;;  %v1109_v33 = vmul.f32 0.2, %v874_v31 }
 0x172   : > { %v1268_v48 = vmax.f32 %v952_v28, %v1140_v40  ;;  %v1300_v49 = vmax.f32 %v1032_v29, %v1172_v41 }
 0x173   : > { %v1205_v36 = vmax.f32 %v794_v30, %v1077_v32  ;;  %v1237_v37 = vmax.f32 %v874_v31, %v1109_v33 }
 0x175   : > { %v2054_v38 = vpack.c.bf16 %v1205_v36, %v1204_v34  ;;  %v2134_v39 = vpack.c.bf16 %v1237_v37, %v1236_v35 }
 0x177   : > { %2322 = vst [vmem:[%s2512_s6 + $0x60] sm:$0xff] %v2054_v38   ;;  %v954_v42 = vpop.f32.mrf.mxu2  ;;  %v1034_v43 = vpop.f32.mrf.mxu3 }
 0x178   : > { %2338 = vst [vmem:[%s2512_s6 + $0xe0] sm:$0xff] %v2134_v39   ;;  %v1141_v44 = vmul.f32 0.2, %v954_v42  ;;  %v1173_v45 = vmul.f32 0.2, %v1034_v43  ;;  %v797_v46 = vpop.f32.mrf.mxu0  ;;  %v877_v47 = vpop.f32.mrf.mxu1 }
 0x179   : > { %v1078_v54 = vmul.f32 0.2, %v797_v46  ;;  %v1110_v55 = vmul.f32 0.2, %v877_v47 }
 0x17a   : > { %v1269_v50 = vmax.f32 %v954_v42, %v1141_v44  ;;  %v1301_v51 = vmax.f32 %v1034_v43, %v1173_v45 }
 0x17b   : > { %v1206_v62 = vmax.f32 %v797_v46, %v1078_v54  ;;  %v1238_v63 = vmax.f32 %v877_v47, %v1110_v55 }
 0x17c   : > { %v2214_v52 = vpack.c.bf16 %v1269_v50, %v1268_v48  ;;  %v2294_v53 = vpack.c.bf16 %v1301_v51, %v1300_v49 }
 0x17e   : > { %2354 = vst [vmem:[%s2512_s6 + $0x160] sm:$0xff] %v2214_v52  }
 0x17f   : > { %2370 = vst [vmem:[%s2512_s6 + $0x1e0] sm:$0xff] %v2294_v53   ;;  %v957_v56 = vpop.f32.mrf.mxu2  ;;  %v1037_v57 = vpop.f32.mrf.mxu3 }
 0x180   : > { %v799_v58 = vpop.f32.mrf.mxu0  ;;  %v879_v59 = vpop.f32.mrf.mxu1  ;;  %v1142_v4 = vmul.f32 0.2, %v957_v56  ;;  %v1174_v5 = vmul.f32 0.2, %v1037_v57 }
 0x181   : > { %v1079_v60 = vmul.f32 0.2, %v799_v58  ;;  %v1111_v61 = vmul.f32 0.2, %v879_v59 }
 0x182   : > { %v1270_v12 = vmax.f32 %v957_v56, %v1142_v4  ;;  %v1302_v13 = vmax.f32 %v1037_v57, %v1174_v5 }
 0x183   : > { %v1207_v0 = vmax.f32 %v799_v58, %v1079_v60  ;;  %v1239_v1 = vmax.f32 %v879_v59, %v1111_v61 }
 0x185   : > { %v2059_v2 = vpack.c.bf16 %v1207_v0, %v1206_v62  ;;  %v2139_v3 = vpack.c.bf16 %v1239_v1, %v1238_v63 }
 0x187   : > { %2323 = vst [vmem:[%s2512_s6 + $0x68] sm:$0xff] %v2059_v2   ;;  %v959_v6 = vpop.f32.mrf.mxu2  ;;  %v1039_v7 = vpop.f32.mrf.mxu3 }
 0x188   : > { %2339 = vst [vmem:[%s2512_s6 + $0xe8] sm:$0xff] %v2139_v3   ;;  %v1143_v8 = vmul.f32 0.2, %v959_v6  ;;  %v1175_v9 = vmul.f32 0.2, %v1039_v7  ;;  %v802_v10 = vpop.f32.mrf.mxu0  ;;  %v882_v11 = vpop.f32.mrf.mxu1 }
 0x189   : > { %v1080_v18 = vmul.f32 0.2, %v802_v10  ;;  %v1112_v19 = vmul.f32 0.2, %v882_v11 }
 0x18a   : > { %v1271_v14 = vmax.f32 %v959_v6, %v1143_v8  ;;  %v1303_v15 = vmax.f32 %v1039_v7, %v1175_v9 }
 0x18b   : > { %v1208_v26 = vmax.f32 %v802_v10, %v1080_v18  ;;  %v1240_v27 = vmax.f32 %v882_v11, %v1112_v19 }
 0x18c   : > { %v2219_v16 = vpack.c.bf16 %v1271_v14, %v1270_v12  ;;  %v2299_v17 = vpack.c.bf16 %v1303_v15, %v1302_v13 }
 0x18e   : > { %2355 = vst [vmem:[%s2512_s6 + $0x168] sm:$0xff] %v2219_v16  }
 0x18f   : > { %2371 = vst [vmem:[%s2512_s6 + $0x1e8] sm:$0xff] %v2299_v17   ;;  %v962_v20 = vpop.f32.mrf.mxu2  ;;  %v1042_v21 = vpop.f32.mrf.mxu3 }
 0x190   : > { %v804_v22 = vpop.f32.mrf.mxu0  ;;  %v884_v23 = vpop.f32.mrf.mxu1  ;;  %v1144_v32 = vmul.f32 0.2, %v962_v20  ;;  %v1176_v33 = vmul.f32 0.2, %v1042_v21 }
 0x191   : > { %v1081_v24 = vmul.f32 0.2, %v804_v22  ;;  %v1113_v25 = vmul.f32 0.2, %v884_v23 }
 0x192   : > { %v1272_v40 = vmax.f32 %v962_v20, %v1144_v32  ;;  %v1304_v41 = vmax.f32 %v1042_v21, %v1176_v33 }
 0x193   : > { %v1209_v28 = vmax.f32 %v804_v22, %v1081_v24  ;;  %v1241_v29 = vmax.f32 %v884_v23, %v1113_v25 }
 0x195   : > { %v2064_v30 = vpack.c.bf16 %v1209_v28, %v1208_v26  ;;  %v2144_v31 = vpack.c.bf16 %v1241_v29, %v1240_v27 }
 0x197   : > { %2324 = vst [vmem:[%s2512_s6 + $0x70] sm:$0xff] %v2064_v30   ;;  %v964_v34 = vpop.f32.mrf.mxu2  ;;  %v1044_v35 = vpop.f32.mrf.mxu3 }
 0x198   : > { %2340 = vst [vmem:[%s2512_s6 + $0xf0] sm:$0xff] %v2144_v31   ;;  %v1145_v36 = vmul.f32 0.2, %v964_v34  ;;  %v1177_v37 = vmul.f32 0.2, %v1044_v35  ;;  %v807_v38 = vpop.f32.mrf.mxu0  ;;  %v887_v39 = vpop.f32.mrf.mxu1 }
 0x199   : > { %v1082_v46 = vmul.f32 0.2, %v807_v38  ;;  %v1114_v47 = vmul.f32 0.2, %v887_v39 }
 0x19a   : > { %v1273_v42 = vmax.f32 %v964_v34, %v1145_v36  ;;  %v1305_v43 = vmax.f32 %v1044_v35, %v1177_v37 }
 0x19b   : > { %v1210_v54 = vmax.f32 %v807_v38, %v1082_v46  ;;  %v1242_v55 = vmax.f32 %v887_v39, %v1114_v47 }
 0x19c   : > { %v2224_v44 = vpack.c.bf16 %v1273_v42, %v1272_v40  ;;  %v2304_v45 = vpack.c.bf16 %v1305_v43, %v1304_v41 }
 0x19e   : > { %2356 = vst [vmem:[%s2512_s6 + $0x170] sm:$0xff] %v2224_v44  }
 0x19f   : > { %2372 = vst [vmem:[%s2512_s6 + $0x1f0] sm:$0xff] %v2304_v45   ;;  %v967_v48 = vpop.f32.mrf.mxu2  ;;  %v1047_v49 = vpop.f32.mrf.mxu3 }
 0x1a0   : > { %v809_v50 = vpop.f32.mrf.mxu0  ;;  %v889_v51 = vpop.f32.mrf.mxu1  ;;  %v1146_v60 = vmul.f32 0.2, %v967_v48  ;;  %v1178_v61 = vmul.f32 0.2, %v1047_v49 }
 0x1a1   : > { %v1083_v52 = vmul.f32 0.2, %v809_v50  ;;  %v1115_v53 = vmul.f32 0.2, %v889_v51 }
 0x1a2   : > { %v1274_v2 = vmax.f32 %v967_v48, %v1146_v60  ;;  %v1306_v3 = vmax.f32 %v1047_v49, %v1178_v61 }
 0x1a3   : > { %v1211_v56 = vmax.f32 %v809_v50, %v1083_v52  ;;  %v1243_v57 = vmax.f32 %v889_v51, %v1115_v53 }
 0x1a5   : > { %v2069_v58 = vpack.c.bf16 %v1211_v56, %v1210_v54  ;;  %v2149_v59 = vpack.c.bf16 %v1243_v57, %v1242_v55 }
 0x1a7   : > { %2325 = vst [vmem:[%s2512_s6 + $0x78] sm:$0xff] %v2069_v58   ;;  %v969_v62 = vpop.f32.mrf.mxu2  ;;  %v1049_v63 = vpop.f32.mrf.mxu3 }
 0x1a8   : > { %2341 = vst [vmem:[%s2512_s6 + $0xf8] sm:$0xff] %v2149_v59   ;;  %v1147_v0 = vmul.f32 0.2, %v969_v62  ;;  %v1179_v1 = vmul.f32 0.2, %v1049_v63 }
 0x1aa   : > { %v1275_v4 = vmax.f32 %v969_v62, %v1147_v0  ;;  %v1307_v5 = vmax.f32 %v1049_v63, %v1179_v1 }
 0x1ac   : > { %v2229_v6 = vpack.c.bf16 %v1275_v4, %v1274_v2  ;;  %v2309_v7 = vpack.c.bf16 %v1307_v5, %v1306_v3 }
 0x1ae   : > { %2357 = vst [vmem:[%s2512_s6 + $0x178] sm:$0xff] %v2229_v6  }
 0x1af   : > { %2373 = vst [vmem:[%s2512_s6 + $0x1f8] sm:$0xff] %v2309_v7  }
 0x1b0 PF: > { %s12_s9 = sadd.s32 1, %s2412_s9  }
 0x1b1   : > { %p9_p4 = scmp.ge.s32.totalorder %s12_s9, 4  }
 0x1b3   :  { %11 = sbr.rel (!%p9_p4) target bundleno = 1 (0x1), region = 58 }

// kernel: improved_discriminator_forward.5
= control target key start
LH: loop header
LB: loop body
LE: loop exit
PB: predicated region body
PF: predicated region fallthrough
CT: control target
= control target key end

     0   :  { %s1588_s12 = smov 0   ;;  %s1590_s13 = smov 0   ;;  %s1937_s0 = inlined_call_operand.vmem [shape: bf16[512,128], index: 0, kind: input, shape index: {}]   ;;  %s1938_s1 = inlined_call_operand.vmem [shape: bf16[128,128], index: 1, kind: input, shape index: {}]   ;;  %s1939_s2 = inlined_call_operand.vmem [shape: f32[2,128], index: 2, kind: input, shape index: {}]   ;;  %s1940_s3 = inlined_call_operand.vmem [shape: bf16[512,128], index: 3, kind: output, shape index: {}]  }
   0x1   :  { %s1592_s14 = smov 0   ;;  %s1594_s15 = smov 0  }
   0x2   :  { %s1596_s16 = smov 0  }
   0x3 LB: > { %s22_s17 = sadd.s32 1, %s1557_s14  ;;  %s25_s18 = sadd.s32 1, %s1561_s15  ;;  %s1565_s16 = sphi %s1596_s16, %s13_s16   ;;  %s1561_s15 = sphi %s1594_s15, %s1944_s15   ;;  %s1557_s14 = sphi %s1592_s14, %s1943_s14   ;;  %s1553_s13 = sphi %s1590_s13, %s1942_s13   ;;  %s1549_s12 = sphi %s1588_s12, %s1941_s12  }
   0x4   : > { %p23_p0 = scmp.ge.s32.totalorder %s22_s17, 2  ;;  %p1052_p1 = scmp.ge.s32.totalorder %s1565_s16, 1 }
   0x5   : > { %p160_p2 = scmp.lt.s32.totalorder %s1565_s16, 5 }
   0x6   : > { %s1946_s17 = smov (%p23_p0, %s22_s17), 0  ;;  %s1948_s18 = smov (!%p23_p0, %s25_s18), %s1561_s15 }
   0x7   : > { %p161_p3 = pnand %p1052_p1, %p160_p2  ;;  %p27_p4 = scmp.ge.s32.totalorder %s1948_s18, 2 }
   0x8   : > { %s187_s19 = ssub.s32 (!%p161_p3), 1, %s1553_s13  ;;  %s197_s20 = smul.u32 (!%p161_p3), %s1549_s12, %s1553_s13 }
   0x9   : > { %s1950_s18 = smov (%p27_p4, %s1948_s18), 0  ;;  %164 = sbr.rel (%p161_p3) target bundleno = 413 (0x19d), region = 32 }
   0xa   : > { %s188_s21 = smul.u32 (!%p161_p3), %s1549_s12, %s187_s19  ;;  %s1055_s22 = sshll.u32 (!%p161_p3), %s197_s20, 5 }
   0xb   : > { %p199_p5 = scmp.lt.s32.totalorder (!%p161_p3), %s1055_s22, 63  ;;  %p1057_p7 = scmp.ne.s32.totalorder (!%p161_p3), %s1553_s13, 0 }
   0xc   : > { %s1053_s23 = sshll.u32 (!%p161_p3), %s188_s21, 5 }
   0xd   : > { %p190_p6 = scmp.lt.s32.totalorder (!%p161_p3), %s1053_s23, 63 }
   0xe   : > { %s1952_s22 = smov (!%p199_p5, %s1055_s22), 63  ;;  %208 = sbr.rel (%p1057_p7) target bundleno = 308 (0x134), region = 36 }
   0xf   : > { %s1954_s23 = smov (!%p190_p6, %s1053_s23), 63  ;;  %s1056_s24 = sshll.u32 %s1952_s22, 2 }
  0x10   : > { %s1054_s25 = sshll.u32 %s1954_s23, 2  ;;  %s1629_s28 = scalar_lea.vmem %s1940_s3, %s1056_s24 }
  0x11   : > { %s1634_s4 = scalar_lea.vmem %s1937_s0, %s1054_s25  ;;  %p1058_p8 = scmp.ne.s32.totalorder (!%p1057_p7), %s1549_s12, 0 }
  0x13   : > { %212 = sbr.rel (%p1058_p8) target bundleno = 26 (0x1a), region = 40 }
  0x18   : > { %v1567_v0 = vmov 0.0  }
  0x19   : > { %213 = vst [vmem:[#allocation3] sm:$0x3] %v1567_v0 }
  0x1a PF: > { %v1186_v1 = vld [vmem:[%s1938_s1 + $0x38] sm:$0xff]  ;;  %v1185_v2 = vld [vmem:[%s1938_s1 + $0x30] sm:$0xff]  ;;  %v1184_v3 = vld [vmem:[%s1938_s1 + $0x28] sm:$0xff]  ;;  %s1187_s29 = sshll.u32 %s1549_s12, 7  ;;  %vm602_vm0 = vcmask 1040384  }
  0x1b   : > { %406 = vmatpush.bf16.msra.mxu0 %v1186_v1  ;;  %1458 = vmatpush.bf16.msra.mxu1 %v1186_v1  ;;  %v1183_v4 = vld [vmem:[%s1938_s1 + $0x20] sm:$0xff]  ;;  %v1182_v5 = vld [vmem:[%s1938_s1 + $0x18] sm:$0xff]  ;;  %v1181_v6 = vld [vmem:[%s1938_s1 + $0x10] sm:$0xff]  ;;  %s1689_s30 = scalar_lea.vmem [#allocation2], %s1187_s29 }
  0x1c   : > { %1459 = vmatpush.bf16.msra.mxu2 %v1186_v1  ;;  %1460 = vmatpush.bf16.msra.mxu3 %v1186_v1  ;;  %v1180_v7 = vld [vmem:[%s1938_s1 + $0x8] sm:$0xff]  ;;  %v1179_v8 = vld [vmem:[%s1938_s1] sm:$0xff]  ;;  %v1165_v17 = vld [vmem:[%s1634_s4 + $0x10] sm:$0xff] }
  0x1d   : > { %v1163_v9 = vld [vmem:[%s1634_s4] sm:$0xff]  ;;  %v1164_v13 = vld [vmem:[%s1634_s4 + $0x8] sm:$0xff]  ;;  %v1169_v18 = vld [vmem:[%s1634_s4 + $0x30] sm:$0xff] }
  0x1e   : > { %v1167_v10 = vld [vmem:[%s1634_s4 + $0x20] sm:$0xff]  ;;  %v1168_v14 = vld [vmem:[%s1634_s4 + $0x28] sm:$0xff]  ;;  %v1173_v19 = vld [vmem:[%s1634_s4 + $0x50] sm:$0xff] }
  0x1f   : > { %407 = vmatpush.bf16.msra.mxu0 %v1185_v2  ;;  %1461 = vmatpush.bf16.msra.mxu1 %v1185_v2  ;;  %v1171_v11 = vld [vmem:[%s1634_s4 + $0x40] sm:$0xff]  ;;  %v1172_v15 = vld [vmem:[%s1634_s4 + $0x48] sm:$0xff]  ;;  %v1177_v20 = vld [vmem:[%s1634_s4 + $0x70] sm:$0xff] }
  0x20   : > { %1462 = vmatpush.bf16.msra.mxu2 %v1185_v2  ;;  %1463 = vmatpush.bf16.msra.mxu3 %v1185_v2  ;;  %v1175_v12 = vld [vmem:[%s1634_s4 + $0x60] sm:$0xff]  ;;  %v1176_v16 = vld [vmem:[%s1634_s4 + $0x68] sm:$0xff]  ;;  %v1166_v21 = vld [vmem:[%s1634_s4 + $0x18] sm:$0xff] }
  0x21   : > { %v1170_v22 = vld [vmem:[%s1634_s4 + $0x38] sm:$0xff] }
  0x22   : > { %v1174_v23 = vld [vmem:[%s1634_s4 + $0x58] sm:$0xff] }
  0x23   : > { %408 = vmatpush.bf16.msra.mxu0 %v1184_v3  ;;  %1464 = vmatpush.bf16.msra.mxu1 %v1184_v3  ;;  %v1178_v24 = vld [vmem:[%s1634_s4 + $0x78] sm:$0xff] }
  0x24   : > { %1465 = vmatpush.bf16.msra.mxu2 %v1184_v3  ;;  %1466 = vmatpush.bf16.msra.mxu3 %v1184_v3 }
  0x27   : > { %409 = vmatpush.bf16.msra.mxu0 %v1183_v4  ;;  %1467 = vmatpush.bf16.msra.mxu1 %v1183_v4 }
  0x28   : > { %1468 = vmatpush.bf16.msra.mxu2 %v1183_v4  ;;  %1469 = vmatpush.bf16.msra.mxu3 %v1183_v4 }
  0x2b   : > { %410 = vmatpush.bf16.msra.mxu0 %v1182_v5  ;;  %1470 = vmatpush.bf16.msra.mxu1 %v1182_v5 }
  0x2c   : > { %1471 = vmatpush.bf16.msra.mxu2 %v1182_v5  ;;  %1472 = vmatpush.bf16.msra.mxu3 %v1182_v5 }
  0x2f   : > { %411 = vmatpush.bf16.msra.mxu0 %v1181_v6  ;;  %1473 = vmatpush.bf16.msra.mxu1 %v1181_v6 }
  0x30   : > { %1474 = vmatpush.bf16.msra.mxu2 %v1181_v6  ;;  %1475 = vmatpush.bf16.msra.mxu3 %v1181_v6 }
  0x33   : > { %412 = vmatpush.bf16.msra.mxu0 %v1180_v7  ;;  %1476 = vmatpush.bf16.msra.mxu1 %v1180_v7 }
  0x34   : > { %1477 = vmatpush.bf16.msra.mxu2 %v1180_v7  ;;  %1478 = vmatpush.bf16.msra.mxu3 %v1180_v7 }
  0x37   : > { %413 = vmatpush.bf16.msra.mxu0 %v1179_v8  ;;  %1479 = vmatpush.bf16.msra.mxu1 %v1179_v8 }
  0x38   : > { %1480 = vmatpush.bf16.msra.mxu2 %v1179_v8  ;;  %1481 = vmatpush.bf16.msra.mxu3 %v1179_v8 }
  0x3a   : > { %414 = vmatmul.bf16.vlgmr.msra.gmra.mxu0 %v1163_v9  ;;  %434 = vmatmul.bf16.vlgmr.msra.gmra.mxu1 %v1167_v10 }
  0x3b   : > { %454 = vmatmul.bf16.vlgmr.msra.gmra.mxu2 %v1171_v11  ;;  %474 = vmatmul.bf16.vlgmr.msra.gmra.mxu3 %v1175_v12 }
  0x4a   : > { %419 = vmatmul.bf16.gmra.mxu0 %v1164_v13  ;;  %439 = vmatmul.bf16.gmra.mxu1 %v1168_v14 }
  0x4b   : > { %459 = vmatmul.bf16.gmra.mxu2 %v1172_v15  ;;  %479 = vmatmul.bf16.gmra.mxu3 %v1176_v16 }
  0x5a   : > { %424 = vmatmul.bf16.gmra.mxu0 %v1165_v17  ;;  %444 = vmatmul.bf16.gmra.mxu1 %v1169_v18 }
  0x5b   : > { %464 = vmatmul.bf16.gmra.mxu2 %v1173_v19  ;;  %484 = vmatmul.bf16.gmra.mxu3 %v1177_v20 }
  0x6a   : > { %429 = vmatmul.bf16.gmra.mxu0 %v1166_v21  ;;  %449 = vmatmul.bf16.gmra.mxu1 %v1170_v22 }
  0x6b   : > { %469 = vmatmul.bf16.gmra.mxu2 %v1174_v23  ;;  %489 = vmatmul.bf16.gmra.mxu3 %v1178_v24 }
  0xb7   : > { %v415_v25 = vpop.f32.mrf.mxu0  ;;  %v1678_v26 = vpop.f32.mrf.mxu1 }
  0xb8   : > { %v532_v58 = vmul.f32 %v415_v25, %v415_v25 }
  0xbe   : > { %v1681_v27 = vpop.f32.mrf.mxu2  ;;  %v1685_v31 = vpop.f32.mrf.mxu3 }
  0xbf   : > { %v417_v28 = vpop.f32.mrf.mxu0  ;;  %v1683_v29 = vpop.f32.mrf.mxu1 }
  0xc0   : > { %v1192_v30 = vpack.c.bf16 %v417_v28, %v415_v25  ;;  %v1212_v32 = vpack.c.bf16 %v1683_v29, %v1678_v26  ;;  %v533_v57 = vmul.f32 %v417_v28, %v417_v28  ;;  %v495_v59 = vadd.f32 %v417_v28, %v415_v25 }
  0xc1   : > { %v540_v28 = vmul.f32 %v1678_v26, %v1678_v26 }
  0xc2   : > { %1193 = vst [vmem:[%s1689_s30] sm:$0xff] %v1192_v30   ;;  %v564_v61 = vadd.f32 %v533_v57, %v532_v58 }
  0xc3   : > { %1416 = vst [vmem:[%s1689_s30 + $0x20] sm:$0xff] %v1212_v32  }
  0xc6   : > { %v1693_v33 = vpop.f32.mrf.mxu2  ;;  %v1699_v37 = vpop.f32.mrf.mxu3 }
  0xc7   : > { %v420_v34 = vpop.f32.mrf.mxu0  ;;  %v1695_v35 = vpop.f32.mrf.mxu1  ;;  %v1232_v36 = vpack.c.bf16 %v1693_v33, %v1681_v27  ;;  %v1252_v38 = vpack.c.bf16 %v1699_v37, %v1685_v31 }
  0xc8   : > { %v534_v60 = vmul.f32 %v420_v34, %v420_v34  ;;  %v496_v62 = vadd.f32 %v495_v59, %v420_v34 }
  0xc9   : > { %1420 = vst [vmem:[%s1689_s30 + $0x40] sm:$0xff] %v1232_v36  }
  0xca   : > { %1424 = vst [vmem:[%s1689_s30 + $0x60] sm:$0xff] %v1252_v38   ;;  %v565_v4 = vadd.f32 %v564_v61, %v534_v60 }
  0xce   : > { %v1705_v39 = vpop.f32.mrf.mxu2  ;;  %v1709_v43 = vpop.f32.mrf.mxu3 }
  0xcf   : > { %v422_v40 = vpop.f32.mrf.mxu0  ;;  %v1707_v41 = vpop.f32.mrf.mxu1 }
  0xd0   : > { %v1197_v42 = vpack.c.bf16 %v422_v40, %v420_v34  ;;  %v1217_v44 = vpack.c.bf16 %v1707_v41, %v1695_v35  ;;  %v535_v63 = vmul.f32 %v422_v40, %v422_v40  ;;  %v497_v5 = vadd.f32 %v496_v62, %v422_v40 }
  0xd1   : > { %v541_v34 = vmul.f32 %v1683_v29, %v1683_v29  ;;  %v542_v40 = vmul.f32 %v1695_v35, %v1695_v35 }
  0xd2   : > { %1413 = vst [vmem:[%s1689_s30 + $0x8] sm:$0xff] %v1197_v42   ;;  %v566_v9 = vadd.f32 %v565_v4, %v535_v63  ;;  %v548_v4 = vmul.f32 %v1681_v27, %v1681_v27 }
  0xd3   : > { %1417 = vst [vmem:[%s1689_s30 + $0x28] sm:$0xff] %v1217_v44  }
  0xd6   : > { %v1715_v45 = vpop.f32.mrf.mxu2  ;;  %v1721_v49 = vpop.f32.mrf.mxu3 }
  0xd7   : > { %v425_v46 = vpop.f32.mrf.mxu0  ;;  %v1717_v47 = vpop.f32.mrf.mxu1  ;;  %v1237_v48 = vpack.c.bf16 %v1715_v45, %v1705_v39  ;;  %v1257_v50 = vpack.c.bf16 %v1721_v49, %v1709_v43 }
  0xd8   : > { %v536_v6 = vmul.f32 %v425_v46, %v425_v46  ;;  %v498_v10 = vadd.f32 %v497_v5, %v425_v46 }
  0xd9   : > { %1421 = vst [vmem:[%s1689_s30 + $0x48] sm:$0xff] %v1237_v48  }
  0xda   : > { %1425 = vst [vmem:[%s1689_s30 + $0x68] sm:$0xff] %v1257_v50   ;;  %v567_v12 = vadd.f32 %v566_v9, %v536_v6  ;;  %v549_v6 = vmul.f32 %v1693_v33, %v1693_v33 }
  0xde   : > { %v1727_v51 = vpop.f32.mrf.mxu2  ;;  %v1731_v55 = vpop.f32.mrf.mxu3 }
  0xdf   : > { %v427_v52 = vpop.f32.mrf.mxu0  ;;  %v1729_v53 = vpop.f32.mrf.mxu1 }
  0xe0   : > { %v1202_v54 = vpack.c.bf16 %v427_v52, %v425_v46  ;;  %v1222_v56 = vpack.c.bf16 %v1729_v53, %v1717_v47  ;;  %v537_v11 = vmul.f32 %v427_v52, %v427_v52  ;;  %v499_v13 = vadd.f32 %v498_v10, %v427_v52 }
  0xe2   : > { %1414 = vst [vmem:[%s1689_s30 + $0x10] sm:$0xff] %v1202_v54   ;;  %v568_v15 = vadd.f32 %v567_v12, %v537_v11  ;;  %v551_v11 = vmul.f32 %v1715_v45, %v1715_v45 }
  0xe3   : > { %1418 = vst [vmem:[%s1689_s30 + $0x30] sm:$0xff] %v1222_v56   ;;  %v544_v56 = vmul.f32 %v1717_v47, %v1717_v47 }
  0xe6   : > { %v1737_v0 = vpop.f32.mrf.mxu2  ;;  %v1741_v7 = vpop.f32.mrf.mxu3 }
  0xe7   : > { %v430_v1 = vpop.f32.mrf.mxu0  ;;  %v450_v2 = vpop.f32.mrf.mxu1  ;;  %v1242_v3 = vpack.c.bf16 %v1737_v0, %v1727_v51  ;;  %v1262_v8 = vpack.c.bf16 %v1741_v7, %v1731_v55 }
  0xe8   : > { %v538_v14 = vmul.f32 %v430_v1, %v430_v1  ;;  %v500_v16 = vadd.f32 %v499_v13, %v430_v1  ;;  %v546_v62 = vmul.f32 %v450_v2, %v450_v2 }
  0xe9   : > { %1422 = vst [vmem:[%s1689_s30 + $0x50] sm:$0xff] %v1242_v3  }
  0xea   : > { %1426 = vst [vmem:[%s1689_s30 + $0x70] sm:$0xff] %v1262_v8   ;;  %v569_v20 = vadd.f32 %v568_v15, %v538_v14 }
  0xee   : > { %v470_v17 = vpop.f32.mrf.mxu2  ;;  %v1747_v24 = vpop.f32.mrf.mxu3 }
  0xef   : > { %v432_v18 = vpop.f32.mrf.mxu0  ;;  %v452_v19 = vpop.f32.mrf.mxu1 }
  0xf0   : > { %v501_v21 = vadd.f32 %v500_v16, %v432_v18  ;;  %v539_v22 = vmul.f32 %v432_v18, %v432_v18  ;;  %v1207_v23 = vpack.c.bf16 %v432_v18, %v430_v1  ;;  %v1227_v25 = vpack.c.bf16 %v452_v19, %v450_v2 }
  0xf1   : > { %v547_v3 = vmul.f32 %v452_v19, %v452_v19  ;;  %v553_v16 = vmul.f32 %v1737_v0, %v1737_v0 }
  0xf2   : > { %v502_v30 = vadd.f32 %v501_v21, %v1678_v26  ;;  %v570_v32 = vadd.f32 %v569_v20, %v539_v22  ;;  %1415 = vst [vmem:[%s1689_s30 + $0x18] sm:$0xff] %v1207_v23   ;;  %v543_v26 = vmul.f32 %v1707_v41, %v1707_v41  ;;  %v554_v20 = vmul.f32 %v470_v17, %v470_v17 }
  0xf3   : > { %1419 = vst [vmem:[%s1689_s30 + $0x38] sm:$0xff] %v1227_v25  }
  0xf4   : > { %v503_v36 = vadd.f32 %v502_v30, %v1683_v29  ;;  %v571_v38 = vadd.f32 %v570_v32, %v540_v28 }
  0xf6   : > { %v504_v42 = vadd.f32 %v503_v36, %v1695_v35  ;;  %v572_v44 = vadd.f32 %v571_v38, %v541_v34  ;;  %v472_v46 = vpop.f32.mrf.mxu2  ;;  %v492_v54 = vpop.f32.mrf.mxu3  ;;  %v545_v35 = vmul.f32 %v1729_v53, %v1729_v53  ;;  %v559_v36 = vmul.f32 %v1721_v49, %v1721_v49 }
  0xf7   : > { %v1247_v48 = vpack.c.bf16 %v472_v46, %v470_v17  ;;  %v1267_v29 = vpack.c.bf16 %v492_v54, %v1747_v24  ;;  %v555_v23 = vmul.f32 %v472_v46, %v472_v46 }
  0xf8   : > { %v573_v50 = vadd.f32 %v572_v44, %v542_v40  ;;  %v505_v52 = vadd.f32 %v504_v42, %v1707_v41 }
  0xf9   : > { %1423 = vst [vmem:[%s1689_s30 + $0x58] sm:$0xff] %v1247_v48  }
  0xfa   : > { %v506_v57 = vadd.f32 %v505_v52, %v1717_v47  ;;  %v574_v58 = vadd.f32 %v573_v50, %v543_v26  ;;  %1427 = vst [vmem:[%s1689_s30 + $0x78] sm:$0xff] %v1267_v29   ;;  %v562_v50 = vmul.f32 %v1747_v24, %v1747_v24  ;;  %v563_v29 = vmul.f32 %v492_v54, %v492_v54 }
  0xfc   : > { %v507_v59 = vadd.f32 %v506_v57, %v1729_v53  ;;  %v575_v60 = vadd.f32 %v574_v58, %v544_v56  ;;  %v550_v53 = vmul.f32 %v1705_v39, %v1705_v39 }
  0xfe   : > { %v508_v61 = vadd.f32 %v507_v59, %v450_v2  ;;  %v576_v41 = vadd.f32 %v575_v60, %v545_v35 }
 0x100   : > { %v577_v63 = vadd.f32 %v576_v41, %v546_v62  ;;  %v509_v1 = vadd.f32 %v508_v61, %v452_v19 }
 0x102   : > { %v510_v5 = vadd.f32 %v509_v1, %v1681_v27  ;;  %v578_v47 = vadd.f32 %v577_v63, %v547_v3  ;;  %v552_v27 = vmul.f32 %v1727_v51, %v1727_v51  ;;  %v601_v3 = vld [vmem:[#allocation3] sm:$0x3] }
 0x104   : > { %v511_v8 = vadd.f32 %v510_v5, %v1693_v33  ;;  %v579_v9 = vadd.f32 %v578_v47, %v548_v4 }
 0x106   : > { %v512_v2 = vadd.f32 %v511_v8, %v1705_v39  ;;  %v580_v10 = vadd.f32 %v579_v9, %v549_v6 }
 0x108   : > { %v581_v12 = vadd.f32 %v580_v10, %v550_v53  ;;  %v513_v13 = vadd.f32 %v512_v2, %v1715_v45  ;;  %v556_v45 = vmul.f32 %v1685_v31, %v1685_v31 }
 0x10a   : > { %v514_v14 = vadd.f32 %v513_v13, %v1727_v51  ;;  %v582_v15 = vadd.f32 %v581_v12, %v551_v11  ;;  %v557_v51 = vmul.f32 %v1699_v37, %v1699_v37 }
 0x10c   : > { %v515_v33 = vadd.f32 %v514_v14, %v1737_v0  ;;  %v583_v18 = vadd.f32 %v582_v15, %v552_v27  ;;  %v558_v0 = vmul.f32 %v1709_v43, %v1709_v43 }
 0x10e   : > { %v584_v39 = vadd.f32 %v583_v18, %v553_v16  ;;  %v516_v19 = vadd.f32 %v515_v33, %v470_v17 }
 0x110   : > { %v585_v21 = vadd.f32 %v584_v39, %v554_v20  ;;  %v517_v22 = vadd.f32 %v516_v19, %v472_v46  ;;  %v561_v46 = vmul.f32 %v1741_v7, %v1741_v7 }
 0x112   : > { %v518_v25 = vadd.f32 %v517_v22, %v1685_v31  ;;  %v586_v28 = vadd.f32 %v585_v21, %v555_v23  ;;  %v560_v31 = vmul.f32 %v1731_v55, %v1731_v55 }
 0x114   : > { %v519_v30 = vadd.f32 %v518_v25, %v1699_v37  ;;  %v587_v32 = vadd.f32 %v586_v28, %v556_v45 }
 0x116   : > { %v520_v17 = vadd.f32 %v519_v30, %v1709_v43  ;;  %v588_v34 = vadd.f32 %v587_v32, %v557_v51 }
 0x118   : > { %v589_v38 = vadd.f32 %v588_v34, %v558_v0  ;;  %v521_v40 = vadd.f32 %v520_v17, %v1721_v49 }
 0x11a   : > { %v522_v42 = vadd.f32 %v521_v40, %v1731_v55  ;;  %v590_v44 = vadd.f32 %v589_v38, %v559_v36 }
 0x11c   : > { %v523_v37 = vadd.f32 %v522_v42, %v1741_v7  ;;  %v591_v48 = vadd.f32 %v590_v44, %v560_v31 }
 0x11e   : > { %v592_v43 = vadd.f32 %v591_v48, %v561_v46  ;;  %v524_v26 = vadd.f32 %v523_v37, %v1747_v24 }
 0x120   : > { %v593_v52 = vadd.f32 %v592_v43, %v562_v50  ;;  %v525_v49 = vadd.f32 %v524_v26, %v492_v54 }
 0x122   : > { %v526_v56 = vrot.slane %v525_v49, 4  ;;  %v594_v57 = vadd.f32 %v593_v52, %v563_v29 }
 0x124   : > { %v527_v58 = vadd.f32 %v526_v56, %v525_v49  ;;  %v595_v55 = vrot.slane %v594_v57, 4 }
 0x126   : > { %v528_v35 = vrot.slane %v527_v58, 2  ;;  %v596_v59 = vadd.f32 %v595_v55, %v594_v57 }
 0x128   : > { %v529_v60 = vadd.f32 %v528_v35, %v527_v58  ;;  %v597_v61 = vrot.slane %v596_v59, 2 }
 0x12a   : > { %v530_v62 = vrot.slane %v529_v60, 1  ;;  %v598_v7 = vadd.f32 %v597_v61, %v596_v59 }
 0x12c   : > { %v599_v41 = vrot.slane %v598_v7, 1  ;;  %v531_v63 = vadd.f32 %v530_v62, %v529_v60 }
 0x12e   : > { %v600_v1 = vadd.f32 %v599_v41, %v598_v7 }
 0x130   : > { %v603_v4 = vsel %vm602_vm0, %v531_v63, %v600_v1 }
 0x131   : > { %v604_v24 = vadd.f32 %v603_v4, %v601_v3 }
 0x133   : > { %605 = vst [vmem:[#allocation3] sm:$0x3] %v604_v24 }
 0x134 PF: > { %p1157_p9 = scmp.ne.s32.totalorder %s1553_s13, 1 }
 0x135   : > { %p1158_p10 = scmp.ne.s32.totalorder (!%p1157_p9), %s1549_s12, 0 }
 0x136   : > { %676 = sbr.rel (%p1157_p9) target bundleno = 413 (0x19d), region = 44 }
 0x13b   : > { %680 = sbr.rel (%p1158_p10) target bundleno = 359 (0x167), region = 48 }
 0x140   : > { %v681_v54 = vld [vmem:[#allocation3] sm:$0x1]  ;;  %v683_v5 = vld [vmem:[#allocation3 + $0x1] sm:$0x1]  ;;  %vm707_vm4 = vcmask 1040384  }
 0x141   : > { %v682_v47 = vmul.f32 0.001953125, %v681_v54  ;;  %v684_v6 = vmul.f32 0.001953125, %v683_v5  ;;  %v688_v14 = vld [vmem:[%s1939_s2] sm:$0x1]  ;;  %v701_v18 = vld [vmem:[%s1939_s2 + $0x1] sm:$0x1] }
 0x143   : > { %v685_v8 = vmul.f32 %v682_v47, %v682_v47 }
 0x145   : > { %v686_v9 = vsub.f32 %v684_v6, %v685_v8 }
 0x147   : > { %v687_v53 = vmax.f32 %v686_v9, 0.0 }
 0x149   : > { %v689_v2 = vadd.f32 1e-05, %v687_v53 }
 0x14b   : > { %1523 = vrsqrt.f32 %v689_v2  ;;  %vm696_vm1 = vweird.f32 %v689_v2 }
 0x151   : > { %v1524_v10 = vpop.eup %1523 }
 0x152   : > { %v691_v11 = vmul.f32 %v1524_v10, %v689_v2  ;;  %vm697_vm2 = vweird.f32 %v1524_v10 }
 0x153   : > { %vm698_vm3 = vmor %vm696_vm1, %vm697_vm2 }
 0x154   : > { %v692_v12 = vmul.f32 %v1524_v10, %v691_v11 }
 0x156   : > { %v693_v13 = vmul.f32 0.5, %v692_v12 }
 0x158   : > { %v694_v27 = vsub.f32 1.5, %v693_v13 }
 0x15a   : > { %v695_v15 = vmul.f32 %v1524_v10, %v694_v27 }
 0x15c   : > { %v699_v33 = vsel %vm698_vm3, %v1524_v10, %v695_v15 }
 0x15d   : > { %v700_v16 = vmul.f32 %v699_v33, %v688_v14 }
 0x15f   : > { %v702_v39 = vmul.f32 %v700_v16, %v682_v47 }
 0x161   : > { %v703_v19 = vsub.f32 %v701_v18, %v702_v39 }
 0x163   : > { %v705_v20 = vrot.slane %v703_v19, 7 }
 0x165   : > { %v708_v21 = vsel %vm707_vm4, %v700_v16, %v705_v20 }
 0x166   : > { %709 = vst [vmem:[#allocation4] sm:$0x3] %v708_v21 }
 0x167 PF: > { %s1188_s7 = sshll.u32 %s1549_s12, 7 }
 0x168   : > { %s1822_s8 = scalar_lea.vmem [#allocation2], %s1188_s7 }
 0x169   : > { %v1270_v23 = vld [vmem:[%s1822_s8] sm:$0xff]   ;;  %v1428_v45 = vld [vmem:[%s1822_s8 + $0x8] sm:$0xff]   ;;  %v1429_v25 = vld [vmem:[%s1822_s8 + $0x10] sm:$0xff]  }
 0x16a   : > { %v1271_v28 = vunpack.c.l.bf16 %v1270_v23  ;;  %v1272_v51 = vunpack.c.h.bf16 %v1270_v23  ;;  %v1275_v32 = vunpack.c.l.bf16 %v1428_v45  ;;  %v1276_v0 = vunpack.c.h.bf16 %v1428_v45  ;;  %v1430_v17 = vld [vmem:[%s1822_s8 + $0x18] sm:$0xff]   ;;  %v1431_v50 = vld [vmem:[%s1822_s8 + $0x20] sm:$0xff]   ;;  %v1432_v5 = vld [vmem:[%s1822_s8 + $0x28] sm:$0xff]  }
 0x16b   : > { %v1279_v34 = vunpack.c.l.bf16 %v1429_v25  ;;  %v1280_v36 = vunpack.c.h.bf16 %v1429_v25  ;;  %v1283_v38 = vunpack.c.l.bf16 %v1430_v17  ;;  %v1284_v40 = vunpack.c.h.bf16 %v1430_v17  ;;  %v1433_v53 = vld [vmem:[%s1822_s8 + $0x30] sm:$0xff]   ;;  %v1434_v13 = vld [vmem:[%s1822_s8 + $0x38] sm:$0xff]  }
 0x16c   : > { %v1287_v62 = vunpack.c.l.bf16 %v1431_v50  ;;  %v1288_v1 = vunpack.c.h.bf16 %v1431_v50  ;;  %v1291_v33 = vunpack.c.l.bf16 %v1432_v5  ;;  %v1292_v39 = vunpack.c.h.bf16 %v1432_v5  ;;  %v1438_v5 = vld [vmem:[%s1822_s8 + $0x58] sm:$0xff]  }
 0x16d   : > { %v1820_v22 = vld [vmem:[#allocation4] ss:$0 sm:$0xff]  ;;  %v1827_v30 = vld [vmem:[#allocation4 + $0x1] ss:$0 sm:$0xff]  ;;  %v1295_v19 = vunpack.c.l.bf16 %v1433_v53  ;;  %v1296_v23 = vunpack.c.h.bf16 %v1433_v53  ;;  %v1299_v45 = vunpack.c.l.bf16 %v1434_v13 }
 0x16e   : > { %v779_v31 = vmul.f32 %v1820_v22, %v1271_v28  ;;  %v780_v42 = vmul.f32 %v1820_v22, %v1272_v51  ;;  %v781_v44 = vmul.f32 %v1820_v22, %v1275_v32  ;;  %v782_v37 = vmul.f32 %v1820_v22, %v1276_v0 }
 0x16f   : > { %v783_v46 = vmul.f32 %v1820_v22, %v1279_v34  ;;  %v784_v48 = vmul.f32 %v1820_v22, %v1280_v36  ;;  %v785_v43 = vmul.f32 %v1820_v22, %v1283_v38  ;;  %v786_v26 = vmul.f32 %v1820_v22, %v1284_v40  ;;  %v1435_v38 = vld [vmem:[%s1822_s8 + $0x40] sm:$0xff]  }
 0x170   : > { %v813_v52 = vadd.f32 %v1827_v30, %v779_v31  ;;  %v814_v49 = vadd.f32 %v1827_v30, %v780_v42  ;;  %v815_v29 = vadd.f32 %v1827_v30, %v781_v44  ;;  %v816_v56 = vadd.f32 %v1827_v30, %v782_v37 }
 0x171   : > { %v817_v57 = vadd.f32 %v1827_v30, %v783_v46  ;;  %v818_v58 = vadd.f32 %v1827_v30, %v784_v48  ;;  %v819_v55 = vadd.f32 %v1827_v30, %v785_v43  ;;  %v820_v35 = vadd.f32 %v1827_v30, %v786_v26 }
 0x172   : > { %v845_v59 = vmul.f32 0.2, %v813_v52  ;;  %v846_v60 = vmul.f32 0.2, %v814_v49  ;;  %v847_v61 = vmul.f32 0.2, %v815_v29  ;;  %v787_v11 = vmul.f32 %v1820_v22, %v1287_v62 }
 0x173   : > { %v848_v7 = vmul.f32 0.2, %v816_v56  ;;  %v849_v41 = vmul.f32 0.2, %v817_v57  ;;  %v850_v63 = vmul.f32 0.2, %v818_v58  ;;  %v788_v12 = vmul.f32 %v1820_v22, %v1288_v1 }
 0x174   : > { %v877_v3 = vmax.f32 %v813_v52, %v845_v59  ;;  %v878_v4 = vmax.f32 %v814_v49, %v846_v60  ;;  %v879_v24 = vmax.f32 %v815_v29, %v847_v61  ;;  %v851_v54 = vmul.f32 0.2, %v819_v55  ;;  %v1436_v29 = vld [vmem:[%s1822_s8 + $0x48] sm:$0xff]   ;;  %v1437_v62 = vld [vmem:[%s1822_s8 + $0x50] sm:$0xff]  }
 0x175   : > { %v880_v47 = vmax.f32 %v816_v56, %v848_v7  ;;  %v881_v6 = vmax.f32 %v817_v57, %v849_v41  ;;  %v882_v8 = vmax.f32 %v818_v58, %v850_v63  ;;  %v852_v9 = vmul.f32 0.2, %v820_v35 }
 0x176   : > { %v1336_v2 = vpack.c.bf16 %v878_v4, %v877_v3  ;;  %v883_v10 = vmax.f32 %v819_v55, %v851_v54  ;;  %v821_v16 = vadd.f32 %v1827_v30, %v787_v11  ;;  %v822_v18 = vadd.f32 %v1827_v30, %v788_v12 }
 0x177   : > { %v1341_v27 = vpack.c.bf16 %v880_v47, %v879_v24  ;;  %v1346_v14 = vpack.c.bf16 %v882_v8, %v881_v6  ;;  %v884_v15 = vmax.f32 %v820_v35, %v852_v9  ;;  %v789_v21 = vmul.f32 %v1820_v22, %v1291_v33 }
 0x178   : > { %1337 = vst [vmem:[%s1629_s28] sm:$0xff] %v1336_v2   ;;  %v853_v25 = vmul.f32 0.2, %v821_v16  ;;  %v854_v28 = vmul.f32 0.2, %v822_v18  ;;  %v790_v51 = vmul.f32 %v1820_v22, %v1292_v39  ;;  %v791_v32 = vmul.f32 %v1820_v22, %v1295_v19 }
 0x179   : > { %1443 = vst [vmem:[%s1629_s28 + $0x8] sm:$0xff] %v1341_v27   ;;  %v1351_v20 = vpack.c.bf16 %v884_v15, %v883_v10  ;;  %v823_v0 = vadd.f32 %v1827_v30, %v789_v21  ;;  %v792_v17 = vmul.f32 %v1820_v22, %v1296_v23  ;;  %v1300_v34 = vunpack.c.h.bf16 %v1434_v13  ;;  %v1439_v15 = vld [vmem:[%s1822_s8 + $0x60] sm:$0xff]  }
 0x17a   : > { %1444 = vst [vmem:[%s1629_s28 + $0x10] sm:$0xff] %v1346_v14   ;;  %v793_v36 = vmul.f32 %v1820_v22, %v1299_v45  ;;  %v885_v40 = vmax.f32 %v821_v16, %v853_v25  ;;  %v886_v31 = vmax.f32 %v822_v18, %v854_v28  ;;  %v824_v42 = vadd.f32 %v1827_v30, %v790_v51 }
 0x17b   : > { %1445 = vst [vmem:[%s1629_s28 + $0x18] sm:$0xff] %v1351_v20   ;;  %v825_v44 = vadd.f32 %v1827_v30, %v791_v32  ;;  %v855_v37 = vmul.f32 0.2, %v823_v0  ;;  %v826_v46 = vadd.f32 %v1827_v30, %v792_v17  ;;  %v794_v48 = vmul.f32 %v1820_v22, %v1300_v34 }
 0x17c   : > { %v827_v43 = vadd.f32 %v1827_v30, %v793_v36  ;;  %v1356_v26 = vpack.c.bf16 %v886_v31, %v885_v40  ;;  %v856_v50 = vmul.f32 0.2, %v824_v42  ;;  %v1303_v49 = vunpack.c.l.bf16 %v1435_v38  ;;  %v1440_v36 = vld [vmem:[%s1822_s8 + $0x68] sm:$0xff]  }
 0x17d   : > { %v857_v52 = vmul.f32 0.2, %v825_v44  ;;  %v887_v56 = vmax.f32 %v823_v0, %v855_v37  ;;  %v858_v57 = vmul.f32 0.2, %v826_v46  ;;  %v828_v58 = vadd.f32 %v1827_v30, %v794_v48 }
 0x17e   : > { %v859_v55 = vmul.f32 0.2, %v827_v43  ;;  %1446 = vst [vmem:[%s1629_s28 + $0x20] sm:$0xff] %v1356_v26   ;;  %v888_v35 = vmax.f32 %v824_v42, %v856_v50  ;;  %v1304_v60 = vunpack.c.h.bf16 %v1435_v38  ;;  %v795_v61 = vmul.f32 %v1820_v22, %v1303_v49 }
 0x17f   : > { %v889_v59 = vmax.f32 %v825_v44, %v857_v52  ;;  %v890_v7 = vmax.f32 %v826_v46, %v858_v57  ;;  %v860_v41 = vmul.f32 0.2, %v828_v58  ;;  %v1307_v1 = vunpack.c.l.bf16 %v1436_v29 }
 0x180   : > { %v891_v63 = vmax.f32 %v827_v43, %v859_v55  ;;  %v1361_v3 = vpack.c.bf16 %v888_v35, %v887_v56  ;;  %v796_v4 = vmul.f32 %v1820_v22, %v1304_v60  ;;  %v829_v24 = vadd.f32 %v1827_v30, %v795_v61  ;;  %v1441_v43 = vld [vmem:[%s1822_s8 + $0x70] sm:$0xff]   ;;  %v1442_v55 = vld [vmem:[%s1822_s8 + $0x78] sm:$0xff]  }
 0x181   : > { %v1308_v54 = vunpack.c.h.bf16 %v1436_v29  ;;  %v1366_v47 = vpack.c.bf16 %v890_v7, %v889_v59  ;;  %v892_v6 = vmax.f32 %v828_v58, %v860_v41  ;;  %v797_v8 = vmul.f32 %v1820_v22, %v1307_v1 }
 0x182   : > { %v1311_v9 = vunpack.c.l.bf16 %v1437_v62  ;;  %1447 = vst [vmem:[%s1629_s28 + $0x28] sm:$0xff] %v1361_v3   ;;  %v830_v53 = vadd.f32 %v1827_v30, %v796_v4  ;;  %v861_v2 = vmul.f32 0.2, %v829_v24  ;;  %v1312_v11 = vunpack.c.h.bf16 %v1437_v62 }
 0x183   : > { %v798_v10 = vmul.f32 %v1820_v22, %v1308_v54  ;;  %1448 = vst [vmem:[%s1629_s28 + $0x30] sm:$0xff] %v1366_v47   ;;  %v1371_v12 = vpack.c.bf16 %v892_v6, %v891_v63  ;;  %v831_v13 = vadd.f32 %v1827_v30, %v797_v8  ;;  %v1315_v14 = vunpack.c.l.bf16 %v1438_v5 }
 0x184   : > { %v799_v27 = vmul.f32 %v1820_v22, %v1311_v9  ;;  %v862_v33 = vmul.f32 0.2, %v830_v53  ;;  %v893_v16 = vmax.f32 %v829_v24, %v861_v2  ;;  %v800_v39 = vmul.f32 %v1820_v22, %v1312_v11 }
 0x185   : > { %v832_v18 = vadd.f32 %v1827_v30, %v798_v10  ;;  %1449 = vst [vmem:[%s1629_s28 + $0x38] sm:$0xff] %v1371_v12   ;;  %v863_v19 = vmul.f32 0.2, %v831_v13  ;;  %v1316_v21 = vunpack.c.h.bf16 %v1438_v5  ;;  %v801_v23 = vmul.f32 %v1820_v22, %v1315_v14 }
 0x186   : > { %v833_v20 = vadd.f32 %v1827_v30, %v799_v27  ;;  %v894_v45 = vmax.f32 %v830_v53, %v862_v33  ;;  %v834_v28 = vadd.f32 %v1827_v30, %v800_v39  ;;  %v1319_v51 = vunpack.c.l.bf16 %v1439_v15 }
 0x187   : > { %v864_v25 = vmul.f32 0.2, %v832_v18  ;;  %v895_v32 = vmax.f32 %v831_v13, %v863_v19  ;;  %v802_v17 = vmul.f32 %v1820_v22, %v1316_v21  ;;  %v835_v34 = vadd.f32 %v1827_v30, %v801_v23 }
 0x188   : > { %v865_v0 = vmul.f32 0.2, %v833_v20  ;;  %v1376_v38 = vpack.c.bf16 %v894_v45, %v893_v16  ;;  %v866_v31 = vmul.f32 0.2, %v834_v28  ;;  %v1320_v42 = vunpack.c.h.bf16 %v1439_v15 }
 0x189   : > { %v896_v40 = vmax.f32 %v832_v18, %v864_v25  ;;  %v836_v37 = vadd.f32 %v1827_v30, %v802_v17  ;;  %v867_v46 = vmul.f32 0.2, %v835_v34  ;;  %v803_v48 = vmul.f32 %v1820_v22, %v1319_v51 }
 0x18a   : > { %v897_v44 = vmax.f32 %v833_v20, %v865_v0  ;;  %1450 = vst [vmem:[%s1629_s28 + $0x40] sm:$0xff] %v1376_v38   ;;  %v898_v50 = vmax.f32 %v834_v28, %v866_v31  ;;  %v804_v52 = vmul.f32 %v1820_v22, %v1320_v42  ;;  %v1323_v49 = vunpack.c.l.bf16 %v1440_v36 }
 0x18b   : > { %v1381_v26 = vpack.c.bf16 %v896_v40, %v895_v32  ;;  %v868_v29 = vmul.f32 0.2, %v836_v37  ;;  %v899_v56 = vmax.f32 %v835_v34, %v867_v46  ;;  %v837_v57 = vadd.f32 %v1827_v30, %v803_v48 }
 0x18c   : > { %v1324_v58 = vunpack.c.h.bf16 %v1440_v36  ;;  %v1386_v35 = vpack.c.bf16 %v898_v50, %v897_v44  ;;  %v838_v59 = vadd.f32 %v1827_v30, %v804_v52  ;;  %v805_v60 = vmul.f32 %v1820_v22, %v1323_v49 }
 0x18d   : > { %1451 = vst [vmem:[%s1629_s28 + $0x48] sm:$0xff] %v1381_v26   ;;  %v1327_v61 = vunpack.c.l.bf16 %v1441_v43  ;;  %v900_v62 = vmax.f32 %v836_v37, %v868_v29  ;;  %v869_v7 = vmul.f32 0.2, %v837_v57  ;;  %v1328_v63 = vunpack.c.h.bf16 %v1441_v43 }
 0x18e   : > { %v806_v41 = vmul.f32 %v1820_v22, %v1324_v58  ;;  %1452 = vst [vmem:[%s1629_s28 + $0x50] sm:$0xff] %v1386_v35   ;;  %v870_v1 = vmul.f32 0.2, %v838_v59  ;;  %v839_v3 = vadd.f32 %v1827_v30, %v805_v60  ;;  %v1331_v24 = vunpack.c.l.bf16 %v1442_v55 }
 0x18f   : > { %v807_v4 = vmul.f32 %v1820_v22, %v1327_v61  ;;  %v1391_v54 = vpack.c.bf16 %v900_v62, %v899_v56  ;;  %v901_v5 = vmax.f32 %v837_v57, %v869_v7  ;;  %v808_v6 = vmul.f32 %v1820_v22, %v1328_v63 }
 0x190   : > { %v840_v47 = vadd.f32 %v1827_v30, %v806_v41  ;;  %v902_v8 = vmax.f32 %v838_v59, %v870_v1  ;;  %v871_v9 = vmul.f32 0.2, %v839_v3  ;;  %v1332_v2 = vunpack.c.h.bf16 %v1442_v55 }
 0x191   : > { %v841_v53 = vadd.f32 %v1827_v30, %v807_v4  ;;  %1453 = vst [vmem:[%s1629_s28 + $0x58] sm:$0xff] %v1391_v54   ;;  %v842_v11 = vadd.f32 %v1827_v30, %v808_v6  ;;  %v809_v12 = vmul.f32 %v1820_v22, %v1331_v24 }
 0x192   : > { %v872_v10 = vmul.f32 0.2, %v840_v47  ;;  %v1396_v13 = vpack.c.bf16 %v902_v8, %v901_v5  ;;  %v903_v27 = vmax.f32 %v839_v3, %v871_v9  ;;  %v810_v15 = vmul.f32 %v1820_v22, %v1332_v2 }
 0x193   : > { %v873_v14 = vmul.f32 0.2, %v841_v53  ;;  %v874_v16 = vmul.f32 0.2, %v842_v11  ;;  %v843_v18 = vadd.f32 %v1827_v30, %v809_v12 }
 0x194   : > { %v904_v33 = vmax.f32 %v840_v47, %v872_v10  ;;  %1454 = vst [vmem:[%s1629_s28 + $0x60] sm:$0xff] %v1396_v13   ;;  %v844_v19 = vadd.f32 %v1827_v30, %v810_v15 }
 0x195   : > { %v905_v39 = vmax.f32 %v841_v53, %v873_v14  ;;  %v906_v21 = vmax.f32 %v842_v11, %v874_v16  ;;  %v875_v23 = vmul.f32 0.2, %v843_v18 }
 0x196   : > { %v1401_v20 = vpack.c.bf16 %v904_v33, %v903_v27  ;;  %v876_v45 = vmul.f32 0.2, %v844_v19 }
 0x197   : > { %v1406_v25 = vpack.c.bf16 %v906_v21, %v905_v39  ;;  %v907_v28 = vmax.f32 %v843_v18, %v875_v23 }
 0x198   : > { %1455 = vst [vmem:[%s1629_s28 + $0x68] sm:$0xff] %v1401_v20   ;;  %v908_v51 = vmax.f32 %v844_v19, %v876_v45 }
 0x199   : > { %1456 = vst [vmem:[%s1629_s28 + $0x70] sm:$0xff] %v1406_v25  }
 0x19a   : > { %v1411_v32 = vpack.c.bf16 %v908_v51, %v907_v28 }
 0x19c   : > { %1457 = vst [vmem:[%s1629_s28 + $0x78] sm:$0xff] %v1411_v32  }
 0x19d PF: > { %s13_s16 = sadd.s32 1, %s1565_s16   ;;  %s1941_s12 = smov %s1557_s14 }
 0x19e   : > { %p10_p11 = scmp.ge.s32.totalorder %s13_s16, 6   ;;  %s1942_s13 = smov %s1561_s15 }
 0x19f   : > { %s1943_s14 = smov %s1946_s17  ;;  %s1944_s15 = smov %s1950_s18 }
 0x1a0   :  { %12 = sbr.rel (!%p10_p11) target bundleno = 3 (0x3), region = 80 }

// kernel: improved_discriminator_forward.6
= control target key start
LH: loop header
LB: loop body
LE: loop exit
PB: predicated region body
PF: predicated region fallthrough
CT: control target
= control target key end

     0   :  { %s1022_s12 = smov 0   ;;  %s1024_s13 = smov 0   ;;  %s1171_s0 = inlined_call_operand.vmem [shape: bf16[128,256], index: 0, kind: input, shape index: {}]   ;;  %s1172_s1 = inlined_call_operand.vmem [shape: bf16[256,128], index: 1, kind: input, shape index: {}]   ;;  %s1173_s2 = inlined_call_operand.vmem [shape: f32[2,128], index: 2, kind: input, shape index: {}]   ;;  %s1174_s3 = inlined_call_operand.vmem [shape: bf16[128,128], index: 3, kind: output, shape index: {}]  }
   0x1   :  { %s1026_s14 = smov 0   ;;  %s1028_s15 = smov 0  }
   0x2   :  { %s1030_s16 = smov 0  }
   0x3 LB: > { %s22_s17 = sadd.s32 1, %s991_s14  ;;  %s25_s18 = sadd.s32 1, %s995_s15  ;;  %s999_s16 = sphi %s1030_s16, %s13_s16   ;;  %s995_s15 = sphi %s1028_s15, %s1178_s15   ;;  %s991_s14 = sphi %s1026_s14, %s1177_s14   ;;  %s987_s13 = sphi %s1024_s13, %s1176_s13   ;;  %s983_s12 = sphi %s1022_s12, %s1175_s12  }
   0x4   : > { %p23_p0 = scmp.ge.s32.totalorder %s22_s17, 2  ;;  %p696_p1 = scmp.ge.s32.totalorder %s999_s16, 1 }
   0x5   : > { %p161_p2 = scmp.lt.s32.totalorder %s999_s16, 5 }
   0x6   : > { %s1180_s17 = smov (%p23_p0, %s22_s17), 0  ;;  %s1182_s18 = smov (!%p23_p0, %s25_s18), %s995_s15 }
   0x7   : > { %p162_p3 = pnand %p696_p1, %p161_p2  ;;  %p27_p4 = scmp.ge.s32.totalorder %s1182_s18, 2 }
   0x8   : > { %s189_s19 = ssub.s32 (!%p162_p3), 1, %s987_s13  ;;  %s200_s20 = smul.u32 (!%p162_p3), %s983_s12, %s987_s13 }
   0x9   : > { %s1184_s18 = smov (%p27_p4, %s1182_s18), 0  ;;  %165 = sbr.rel (%p162_p3) target bundleno = 311 (0x137), region = 32 }
   0xa   : > { %s190_s21 = smul.u32 (!%p162_p3), %s983_s12, %s189_s19  ;;  %s700_s22 = sshll.u32 (!%p162_p3), %s200_s20, 3 }
   0xb   : > { %p202_p5 = scmp.lt.s32.totalorder (!%p162_p3), %s700_s22, 15  ;;  %p702_p7 = scmp.ne.s32.totalorder (!%p162_p3), %s987_s13, 0 }
   0xc   : > { %s697_s23 = sshll.u32 (!%p162_p3), %s190_s21, 3 }
   0xd   : > { %p192_p6 = scmp.lt.s32.totalorder (!%p162_p3), %s697_s23, 15 }
   0xe   : > { %s1186_s22 = smov (!%p202_p5, %s700_s22), 15  ;;  %211 = sbr.rel (%p702_p7) target bundleno = 239 (0xef), region = 36 }
   0xf   : > { %s1188_s23 = smov (!%p192_p6, %s697_s23), 15  ;;  %s701_s24 = sshll.u32 %s1186_s22, 2 }
  0x10   : > { %s808_s25 = sshll.u32 %s1188_s23, 3  ;;  %s1063_s28 = scalar_lea.vmem %s1174_s3, %s701_s24 }
  0x11   : > { %s1068_s4 = scalar_lea.vmem %s1171_s0, %s808_s25  ;;  %p703_p8 = scmp.ne.s32.totalorder (!%p702_p7), %s983_s12, 0 }
  0x13   : > { %215 = sbr.rel (%p703_p8) target bundleno = 26 (0x1a), region = 40 }
  0x18   : > { %v1001_v0 = vmov 0.0  }
  0x19   : > { %216 = vst [vmem:[#allocation3] sm:$0x3] %v1001_v0 }
  0x1a PF: > { %v824_v1 = vld [vmem:[%s1172_s1 + $0x38] sm:$0xff]  ;;  %v823_v3 = vld [vmem:[%s1172_s1 + $0x30] sm:$0xff]  ;;  %v822_v5 = vld [vmem:[%s1172_s1 + $0x28] sm:$0xff]  ;;  %s833_s26 = sshll.u32 %s983_s12, 5  ;;  %vm486_vm0 = vcmask 1040384  }
  0x1b   : > { %v832_v2 = vld [vmem:[%s1172_s1 + $0x78] sm:$0xff]  ;;  %393 = vmatpush.bf16.msra.mxu0 %v824_v1  ;;  %900 = vmatpush.bf16.msra.mxu2 %v824_v1  ;;  %v831_v4 = vld [vmem:[%s1172_s1 + $0x70] sm:$0xff]  ;;  %v830_v6 = vld [vmem:[%s1172_s1 + $0x68] sm:$0xff]  ;;  %s1137_s27 = scalar_lea.vmem [#allocation2], %s833_s26 }
  0x1c   : > { %422 = vmatpush.bf16.msra.mxu1 %v832_v2  ;;  %908 = vmatpush.bf16.msra.mxu3 %v832_v2  ;;  %v821_v7 = vld [vmem:[%s1172_s1 + $0x20] sm:$0xff]  ;;  %v820_v9 = vld [vmem:[%s1172_s1 + $0x18] sm:$0xff]  ;;  %v819_v11 = vld [vmem:[%s1172_s1 + $0x10] sm:$0xff] }
  0x1d   : > { %v829_v8 = vld [vmem:[%s1172_s1 + $0x60] sm:$0xff]  ;;  %v828_v10 = vld [vmem:[%s1172_s1 + $0x58] sm:$0xff]  ;;  %v827_v12 = vld [vmem:[%s1172_s1 + $0x50] sm:$0xff] }
  0x1e   : > { %v818_v13 = vld [vmem:[%s1172_s1 + $0x8] sm:$0xff]  ;;  %v817_v15 = vld [vmem:[%s1172_s1] sm:$0xff]  ;;  %v714_v29 = vld [vmem:[%s1068_s4 + $0x10] sm:$0xf] }
  0x1f   : > { %394 = vmatpush.bf16.msra.mxu0 %v823_v3  ;;  %901 = vmatpush.bf16.msra.mxu2 %v823_v3  ;;  %v826_v14 = vld [vmem:[%s1172_s1 + $0x48] sm:$0xff]  ;;  %v825_v16 = vld [vmem:[%s1172_s1 + $0x40] sm:$0xff]  ;;  %v812_v30 = vld [vmem:[%s1068_s4 + $0x14] sm:$0xf0] }
  0x20   : > { %423 = vmatpush.bf16.msra.mxu1 %v831_v4  ;;  %909 = vmatpush.bf16.msra.mxu3 %v831_v4  ;;  %v706_v17 = vld [vmem:[%s1068_s4] sm:$0xf]  ;;  %v810_v18 = vld [vmem:[%s1068_s4 + $0x4] sm:$0xf0]  ;;  %v809_v21 = vld [vmem:[%s1068_s4 + $0x4] sm:$0xf]  ;;  %v715_v37 = vor.u32 %v812_v30, %v714_v29 }
  0x21   : > { %v722_v19 = vld [vmem:[%s1068_s4 + $0x20] sm:$0xf]  ;;  %v814_v20 = vld [vmem:[%s1068_s4 + $0x24] sm:$0xf0]  ;;  %v708_v22 = vld [vmem:[%s1068_s4 + $0x8] sm:$0xf0]  ;;  %v707_v25 = vor.u32 %v810_v18, %v706_v17 }
  0x22   : > { %v813_v23 = vld [vmem:[%s1068_s4 + $0x24] sm:$0xf]  ;;  %v724_v24 = vld [vmem:[%s1068_s4 + $0x28] sm:$0xf0]  ;;  %v723_v26 = vor.u32 %v814_v20, %v722_v19  ;;  %v711_v27 = vor.u32 %v809_v21, %v708_v22  ;;  %v730_v31 = vld [vmem:[%s1068_s4 + $0x30] sm:$0xf] }
  0x23   : > { %395 = vmatpush.bf16.msra.mxu0 %v822_v5  ;;  %902 = vmatpush.bf16.msra.mxu2 %v822_v5  ;;  %v727_v28 = vor.u32 %v813_v23, %v724_v24  ;;  %v816_v32 = vld [vmem:[%s1068_s4 + $0x34] sm:$0xf0]  ;;  %v811_v33 = vld [vmem:[%s1068_s4 + $0x14] sm:$0xf]  ;;  %v716_v34 = vld [vmem:[%s1068_s4 + $0x18] sm:$0xf0] }
  0x24   : > { %424 = vmatpush.bf16.msra.mxu1 %v830_v6  ;;  %910 = vmatpush.bf16.msra.mxu3 %v830_v6  ;;  %v815_v35 = vld [vmem:[%s1068_s4 + $0x34] sm:$0xf]  ;;  %v732_v36 = vld [vmem:[%s1068_s4 + $0x38] sm:$0xf0]  ;;  %v731_v38 = vor.u32 %v816_v32, %v730_v31  ;;  %v719_v39 = vor.u32 %v811_v33, %v716_v34 }
  0x25   : > { %v735_v40 = vor.u32 %v815_v35, %v732_v36 }
  0x27   : > { %396 = vmatpush.bf16.msra.mxu0 %v821_v7  ;;  %903 = vmatpush.bf16.msra.mxu2 %v821_v7 }
  0x28   : > { %425 = vmatpush.bf16.msra.mxu1 %v829_v8  ;;  %911 = vmatpush.bf16.msra.mxu3 %v829_v8 }
  0x2b   : > { %397 = vmatpush.bf16.msra.mxu0 %v820_v9  ;;  %904 = vmatpush.bf16.msra.mxu2 %v820_v9 }
  0x2c   : > { %426 = vmatpush.bf16.msra.mxu1 %v828_v10  ;;  %912 = vmatpush.bf16.msra.mxu3 %v828_v10 }
  0x2f   : > { %398 = vmatpush.bf16.msra.mxu0 %v819_v11  ;;  %905 = vmatpush.bf16.msra.mxu2 %v819_v11 }
  0x30   : > { %427 = vmatpush.bf16.msra.mxu1 %v827_v12  ;;  %913 = vmatpush.bf16.msra.mxu3 %v827_v12 }
  0x33   : > { %399 = vmatpush.bf16.msra.mxu0 %v818_v13  ;;  %906 = vmatpush.bf16.msra.mxu2 %v818_v13 }
  0x34   : > { %428 = vmatpush.bf16.msra.mxu1 %v826_v14  ;;  %914 = vmatpush.bf16.msra.mxu3 %v826_v14 }
  0x37   : > { %400 = vmatpush.bf16.msra.mxu0 %v817_v15  ;;  %907 = vmatpush.bf16.msra.mxu2 %v817_v15 }
  0x38   : > { %429 = vmatpush.bf16.msra.mxu1 %v825_v16  ;;  %915 = vmatpush.bf16.msra.mxu3 %v825_v16 }
  0x3a   : > { %401 = vmatmul.bf16.vlgmr.msra.gmra.mxu0 %v707_v25  ;;  %411 = vmatmul.bf16.vlgmr.msra.gmra.mxu2 %v723_v26 }
  0x3b   : > { %430 = vmatmul.bf16.vlgmr.msra.gmra.mxu1 %v711_v27  ;;  %440 = vmatmul.bf16.vlgmr.msra.gmra.mxu3 %v727_v28 }
  0x4a   : > { %406 = vmatmul.bf16.gmra.mxu0 %v715_v37  ;;  %416 = vmatmul.bf16.gmra.mxu2 %v731_v38 }
  0x4b   : > { %435 = vmatmul.bf16.gmra.mxu1 %v719_v39  ;;  %445 = vmatmul.bf16.gmra.mxu3 %v735_v40  ;;  %v485_v39 = vld [vmem:[#allocation3] sm:$0x3] }
  0xb7   : > { %v402_v41 = vpop.f32.mrf.mxu0 }
  0xb8   : > { %v431_v42 = vpop.f32.mrf.mxu1 }
  0xb9   : > { %v432_v47 = vadd.f32 %v431_v42, %v402_v41 }
  0xbb   : > { %v464_v61 = vmul.f32 %v432_v47, %v432_v47 }
  0xbd   : > { %v412_v43 = vpop.f32.mrf.mxu2 }
  0xbe   : > { %v441_v44 = vpop.f32.mrf.mxu3 }
  0xbf   : > { %v404_v45 = vpop.f32.mrf.mxu0  ;;  %v442_v52 = vadd.f32 %v441_v44, %v412_v43 }
  0xc0   : > { %v433_v46 = vpop.f32.mrf.mxu1 }
  0xc1   : > { %v434_v48 = vadd.f32 %v433_v46, %v404_v45  ;;  %v468_v9 = vmul.f32 %v442_v52, %v442_v52 }
  0xc3   : > { %v838_v49 = vpack.c.bf16 %v434_v48, %v432_v47  ;;  %v465_v58 = vmul.f32 %v434_v48, %v434_v48  ;;  %v451_v62 = vadd.f32 %v434_v48, %v432_v47 }
  0xc5   : > { %839 = vst [vmem:[%s1137_s27] sm:$0xff] %v838_v49   ;;  %v414_v50 = vpop.f32.mrf.mxu2  ;;  %v472_v2 = vadd.f32 %v465_v58, %v464_v61 }
  0xc6   : > { %v443_v51 = vpop.f32.mrf.mxu3 }
  0xc7   : > { %v444_v53 = vadd.f32 %v443_v51, %v414_v50  ;;  %v407_v54 = vpop.f32.mrf.mxu0 }
  0xc8   : > { %v436_v55 = vpop.f32.mrf.mxu1 }
  0xc9   : > { %v848_v56 = vpack.c.bf16 %v444_v53, %v442_v52  ;;  %v437_v57 = vadd.f32 %v436_v55, %v407_v54  ;;  %v469_v15 = vmul.f32 %v444_v53, %v444_v53 }
  0xcb   : > { %892 = vst [vmem:[%s1137_s27 + $0x10] sm:$0xff] %v848_v56   ;;  %v466_v63 = vmul.f32 %v437_v57, %v437_v57  ;;  %v452_v3 = vadd.f32 %v451_v62, %v437_v57 }
  0xcd   : > { %v417_v59 = vpop.f32.mrf.mxu2  ;;  %v473_v5 = vadd.f32 %v472_v2, %v466_v63 }
  0xce   : > { %v446_v60 = vpop.f32.mrf.mxu3 }
  0xcf   : > { %v409_v0 = vpop.f32.mrf.mxu0  ;;  %v447_v10 = vadd.f32 %v446_v60, %v417_v59 }
  0xd0   : > { %v438_v1 = vpop.f32.mrf.mxu1 }
  0xd1   : > { %v439_v4 = vadd.f32 %v438_v1, %v409_v0  ;;  %v470_v19 = vmul.f32 %v447_v10, %v447_v10 }
  0xd3   : > { %v453_v6 = vadd.f32 %v452_v3, %v439_v4  ;;  %v467_v7 = vmul.f32 %v439_v4, %v439_v4  ;;  %v843_v8 = vpack.c.bf16 %v439_v4, %v437_v57 }
  0xd5   : > { %v454_v11 = vadd.f32 %v453_v6, %v442_v52  ;;  %v474_v12 = vadd.f32 %v473_v5, %v467_v7  ;;  %891 = vst [vmem:[%s1137_s27 + $0x8] sm:$0xff] %v843_v8   ;;  %v419_v13 = vpop.f32.mrf.mxu2 }
  0xd6   : > { %v448_v14 = vpop.f32.mrf.mxu3 }
  0xd7   : > { %v475_v16 = vadd.f32 %v474_v12, %v468_v9  ;;  %v449_v17 = vadd.f32 %v448_v14, %v419_v13  ;;  %v455_v18 = vadd.f32 %v454_v11, %v444_v53 }
  0xd9   : > { %v456_v20 = vadd.f32 %v455_v18, %v447_v10  ;;  %v476_v21 = vadd.f32 %v475_v16, %v469_v15  ;;  %v853_v22 = vpack.c.bf16 %v449_v17, %v447_v10  ;;  %v471_v24 = vmul.f32 %v449_v17, %v449_v17 }
  0xdb   : > { %v457_v23 = vadd.f32 %v456_v20, %v449_v17  ;;  %v477_v25 = vadd.f32 %v476_v21, %v470_v19  ;;  %893 = vst [vmem:[%s1137_s27 + $0x18] sm:$0xff] %v853_v22  }
  0xdd   : > { %v458_v26 = vrot.slane %v457_v23, 4  ;;  %v478_v27 = vadd.f32 %v477_v25, %v471_v24 }
  0xdf   : > { %v459_v28 = vadd.f32 %v458_v26, %v457_v23  ;;  %v479_v29 = vrot.slane %v478_v27, 4 }
  0xe1   : > { %v460_v30 = vrot.slane %v459_v28, 2  ;;  %v480_v31 = vadd.f32 %v479_v29, %v478_v27 }
  0xe3   : > { %v461_v32 = vadd.f32 %v460_v30, %v459_v28  ;;  %v481_v33 = vrot.slane %v480_v31, 2 }
  0xe5   : > { %v462_v34 = vrot.slane %v461_v32, 1  ;;  %v482_v35 = vadd.f32 %v481_v33, %v480_v31 }
  0xe7   : > { %v483_v36 = vrot.slane %v482_v35, 1  ;;  %v463_v37 = vadd.f32 %v462_v34, %v461_v32 }
  0xe9   : > { %v484_v38 = vadd.f32 %v483_v36, %v482_v35 }
  0xeb   : > { %v487_v40 = vsel %vm486_vm0, %v463_v37, %v484_v38 }
  0xec   : > { %v488_v41 = vadd.f32 %v487_v40, %v485_v39 }
  0xee   : > { %489 = vst [vmem:[#allocation3] sm:$0x3] %v488_v41 }
  0xef PF: > { %p802_p9 = scmp.ne.s32.totalorder %s987_s13, 1 }
  0xf0   : > { %p803_p10 = scmp.ne.s32.totalorder (!%p802_p9), %s983_s12, 0 }
  0xf1   : > { %512 = sbr.rel (%p802_p9) target bundleno = 311 (0x137), region = 44 }
  0xf6   : > { %516 = sbr.rel (%p803_p10) target bundleno = 290 (0x122), region = 48 }
  0xfb   : > { %v517_v42 = vld [vmem:[#allocation3] sm:$0x1]  ;;  %v519_v43 = vld [vmem:[#allocation3 + $0x1] sm:$0x1]  ;;  %vm543_vm4 = vcmask 1040384  }
  0xfc   : > { %v518_v44 = vmul.f32 0.0078125, %v517_v42  ;;  %v520_v45 = vmul.f32 0.0078125, %v519_v43  ;;  %v524_v55 = vld [vmem:[%s1173_s2] sm:$0x1]  ;;  %v537_v59 = vld [vmem:[%s1173_s2 + $0x1] sm:$0x1] }
  0xfe   : > { %v521_v46 = vmul.f32 %v518_v44, %v518_v44 }
 0x100   : > { %v522_v47 = vsub.f32 %v520_v45, %v521_v46 }
 0x102   : > { %v523_v48 = vmax.f32 %v522_v47, 0.0 }
 0x104   : > { %v525_v49 = vadd.f32 1e-05, %v523_v48 }
 0x106   : > { %957 = vrsqrt.f32 %v525_v49  ;;  %vm532_vm1 = vweird.f32 %v525_v49 }
 0x10c   : > { %v958_v50 = vpop.eup %957 }
 0x10d   : > { %v527_v51 = vmul.f32 %v958_v50, %v525_v49  ;;  %vm533_vm2 = vweird.f32 %v958_v50 }
 0x10e   : > { %vm534_vm3 = vmor %vm532_vm1, %vm533_vm2 }
 0x10f   : > { %v528_v52 = vmul.f32 %v958_v50, %v527_v51 }
 0x111   : > { %v529_v53 = vmul.f32 0.5, %v528_v52 }
 0x113   : > { %v530_v54 = vsub.f32 1.5, %v529_v53 }
 0x115   : > { %v531_v56 = vmul.f32 %v958_v50, %v530_v54 }
 0x117   : > { %v535_v57 = vsel %vm534_vm3, %v958_v50, %v531_v56 }
 0x118   : > { %v536_v58 = vmul.f32 %v535_v57, %v524_v55 }
 0x11a   : > { %v538_v60 = vmul.f32 %v536_v58, %v518_v44 }
 0x11c   : > { %v539_v61 = vsub.f32 %v537_v59, %v538_v60 }
 0x11e   : > { %v541_v62 = vrot.slane %v539_v61, 7 }
 0x120   : > { %v544_v63 = vsel %vm543_vm4, %v536_v58, %v541_v62 }
 0x121   : > { %545 = vst [vmem:[#allocation4] sm:$0x3] %v544_v63 }
 0x122 PF: > { %s834_s5 = sshll.u32 %s983_s12, 5 }
 0x123   : > { %s548_s6 = scalar_lea.vmem [#allocation2], %s834_s5 }
 0x124   : > { %v856_v1 = vld [vmem:[%s548_s6] sm:$0xff]   ;;  %v894_v2 = vld [vmem:[%s548_s6 + $0x8] sm:$0xff]   ;;  %v895_v3 = vld [vmem:[%s548_s6 + $0x10] sm:$0xff]  }
 0x125   : > { %v857_v4 = vunpack.c.l.bf16 %v856_v1  ;;  %v858_v5 = vunpack.c.h.bf16 %v856_v1  ;;  %v861_v7 = vunpack.c.l.bf16 %v894_v2  ;;  %v862_v8 = vunpack.c.h.bf16 %v894_v2  ;;  %v896_v9 = vld [vmem:[%s548_s6 + $0x18] sm:$0xff]  }
 0x126   : > { %v865_v10 = vunpack.c.l.bf16 %v895_v3  ;;  %v866_v11 = vunpack.c.h.bf16 %v895_v3  ;;  %v869_v12 = vunpack.c.l.bf16 %v896_v9  ;;  %v870_v13 = vunpack.c.h.bf16 %v896_v9 }
 0x128   : > { %v959_v0 = vld [vmem:[#allocation4] ss:$0 sm:$0xff]  ;;  %v960_v6 = vld [vmem:[#allocation4 + $0x1] ss:$0 sm:$0xff] }
 0x129   : > { %v567_v14 = vmul.f32 %v959_v0, %v857_v4  ;;  %v568_v15 = vmul.f32 %v959_v0, %v858_v5  ;;  %v569_v16 = vmul.f32 %v959_v0, %v861_v7  ;;  %v570_v17 = vmul.f32 %v959_v0, %v862_v8 }
 0x12a   : > { %v571_v18 = vmul.f32 %v959_v0, %v865_v10  ;;  %v572_v19 = vmul.f32 %v959_v0, %v866_v11  ;;  %v573_v20 = vmul.f32 %v959_v0, %v869_v12  ;;  %v574_v21 = vmul.f32 %v959_v0, %v870_v13 }
 0x12b   : > { %v577_v22 = vadd.f32 %v960_v6, %v567_v14  ;;  %v578_v23 = vadd.f32 %v960_v6, %v568_v15  ;;  %v579_v24 = vadd.f32 %v960_v6, %v569_v16  ;;  %v580_v25 = vadd.f32 %v960_v6, %v570_v17 }
 0x12c   : > { %v581_v26 = vadd.f32 %v960_v6, %v571_v18  ;;  %v582_v27 = vadd.f32 %v960_v6, %v572_v19  ;;  %v583_v28 = vadd.f32 %v960_v6, %v573_v20  ;;  %v584_v29 = vadd.f32 %v960_v6, %v574_v21 }
 0x12d   : > { %v585_v30 = vmul.f32 0.2, %v577_v22  ;;  %v586_v31 = vmul.f32 0.2, %v578_v23  ;;  %v587_v32 = vmul.f32 0.2, %v579_v24 }
 0x12e   : > { %v588_v33 = vmul.f32 0.2, %v580_v25  ;;  %v589_v34 = vmul.f32 0.2, %v581_v26  ;;  %v590_v35 = vmul.f32 0.2, %v582_v27 }
 0x12f   : > { %v593_v36 = vmax.f32 %v577_v22, %v585_v30  ;;  %v594_v37 = vmax.f32 %v578_v23, %v586_v31  ;;  %v595_v38 = vmax.f32 %v579_v24, %v587_v32  ;;  %v591_v39 = vmul.f32 0.2, %v583_v28 }
 0x130   : > { %v596_v40 = vmax.f32 %v580_v25, %v588_v33  ;;  %v597_v41 = vmax.f32 %v581_v26, %v589_v34  ;;  %v598_v42 = vmax.f32 %v582_v27, %v590_v35  ;;  %v592_v43 = vmul.f32 0.2, %v584_v29 }
 0x131   : > { %v874_v44 = vpack.c.bf16 %v594_v37, %v593_v36  ;;  %v599_v45 = vmax.f32 %v583_v28, %v591_v39 }
 0x132   : > { %v879_v46 = vpack.c.bf16 %v596_v40, %v595_v38  ;;  %v884_v47 = vpack.c.bf16 %v598_v42, %v597_v41  ;;  %v600_v48 = vmax.f32 %v584_v29, %v592_v43 }
 0x133   : > { %875 = vst [vmem:[%s1063_s28] sm:$0xff] %v874_v44  }
 0x134   : > { %897 = vst [vmem:[%s1063_s28 + $0x8] sm:$0xff] %v879_v46   ;;  %v889_v49 = vpack.c.bf16 %v600_v48, %v599_v45 }
 0x135   : > { %898 = vst [vmem:[%s1063_s28 + $0x10] sm:$0xff] %v884_v47  }
 0x136   : > { %899 = vst [vmem:[%s1063_s28 + $0x18] sm:$0xff] %v889_v49  }
 0x137 PF: > { %s13_s16 = sadd.s32 1, %s999_s16   ;;  %s1175_s12 = smov %s991_s14 }
 0x138   : > { %p10_p11 = scmp.ge.s32.totalorder %s13_s16, 6   ;;  %s1176_s13 = smov %s995_s15 }
 0x139   : > { %s1177_s14 = smov %s1180_s17  ;;  %s1178_s15 = smov %s1184_s18 }
 0x13a   :  { %12 = sbr.rel (!%p10_p11) target bundleno = 3 (0x3), region = 80 }

// kernel: improved_discriminator_forward.7
= control target key start
LH: loop header
LB: loop body
LE: loop exit
PB: predicated region body
PF: predicated region fallthrough
CT: control target
= control target key end

     0   :  { %s1039_s12 = smov 0   ;;  %s1041_s13 = smov 0   ;;  %s1219_s0 = inlined_call_operand.vmem [shape: bf16[32,512], index: 0, kind: input, shape index: {}]   ;;  %s1220_s1 = inlined_call_operand.vmem [shape: bf16[512,128], index: 1, kind: input, shape index: {}]   ;;  %s1221_s2 = inlined_call_operand.vmem [shape: f32[2,128], index: 2, kind: input, shape index: {}]   ;;  %s1222_s3 = inlined_call_operand.vmem [shape: bf16[32,128], index: 3, kind: output, shape index: {}]  }
   0x1   :  { %s1043_s14 = smov 0   ;;  %s1045_s15 = smov 0  }
   0x2   :  { %s1047_s16 = smov 0  }
   0x3 LB: > { %s22_s17 = sadd.s32 1, %s1008_s14  ;;  %s25_s18 = sadd.s32 1, %s1012_s15  ;;  %s1016_s16 = sphi %s1047_s16, %s13_s16   ;;  %s1012_s15 = sphi %s1045_s15, %s1226_s15   ;;  %s1008_s14 = sphi %s1043_s14, %s1225_s14   ;;  %s1004_s13 = sphi %s1041_s13, %s1224_s13   ;;  %s1000_s12 = sphi %s1039_s12, %s1223_s12  }
   0x4   : > { %p23_p0 = scmp.ge.s32.totalorder %s22_s17, 2  ;;  %p720_p1 = scmp.ge.s32.totalorder %s1016_s16, 1 }
   0x5   : > { %p161_p2 = scmp.lt.s32.totalorder %s1016_s16, 5 }
   0x6   : > { %s1228_s17 = smov (%p23_p0, %s22_s17), 0  ;;  %s1230_s18 = smov (!%p23_p0, %s25_s18), %s1012_s15 }
   0x7   : > { %p162_p3 = pnand %p720_p1, %p161_p2  ;;  %p27_p4 = scmp.ge.s32.totalorder %s1230_s18, 2 }
   0x8   : > { %s189_s19 = ssub.s32 (!%p162_p3), 1, %s1004_s13  ;;  %s200_s20 = smul.u32 (!%p162_p3), %s1000_s12, %s1004_s13 }
   0x9   : > { %s1232_s18 = smov (%p27_p4, %s1230_s18), 0  ;;  %165 = sbr.rel (%p162_p3) target bundleno = 293 (0x125), region = 32 }
   0xa   : > { %s190_s21 = smul.u32 (!%p162_p3), %s1000_s12, %s189_s19  ;;  %s724_s22 = sshll.u32 (!%p162_p3), %s200_s20, 1 }
   0xb   : > { %p202_p5 = scmp.lt.s32.totalorder (!%p162_p3), %s724_s22, 3  ;;  %p726_p7 = scmp.ne.s32.totalorder (!%p162_p3), %s1004_s13, 0 }
   0xc   : > { %s721_s23 = sshll.u32 (!%p162_p3), %s190_s21, 1 }
   0xd   : > { %p192_p6 = scmp.lt.s32.totalorder (!%p162_p3), %s721_s23, 3 }
   0xe   : > { %s1234_s22 = smov (!%p202_p5, %s724_s22), 3  ;;  %211 = sbr.rel (%p726_p7) target bundleno = 224 (0xe0), region = 36 }
   0xf   : > { %s1236_s23 = smov (!%p192_p6, %s721_s23), 3  ;;  %s725_s24 = sshll.u32 %s1234_s22, 2 }
  0x10   : > { %s880_s25 = sshll.u32 %s1236_s23, 4  ;;  %s1080_s28 = scalar_lea.vmem %s1222_s3, %s725_s24 }
  0x11   : > { %s1085_s4 = scalar_lea.vmem %s1219_s0, %s880_s25  ;;  %p727_p8 = scmp.ne.s32.totalorder (!%p726_p7), %s1000_s12, 0 }
  0x13   : > { %215 = sbr.rel (%p727_p8) target bundleno = 26 (0x1a), region = 40 }
  0x18   : > { %v1018_v0 = vmov 0.0  }
  0x19   : > { %216 = vst [vmem:[#allocation3] sm:$0x3] %v1018_v0 }
  0x1a PF: > { %v892_v1 = vld [vmem:[%s1220_s1 + $0x38] sm:$0xff]  ;;  %v891_v5 = vld [vmem:[%s1220_s1 + $0x30] sm:$0xff]  ;;  %v890_v9 = vld [vmem:[%s1220_s1 + $0x28] sm:$0xff]  ;;  %vm570_vm0 = vcmask 1040384  }
  0x1b   : > { %v900_v2 = vld [vmem:[%s1220_s1 + $0x78] sm:$0xff]  ;;  %497 = vmatpush.bf16.msra.mxu0 %v892_v1  ;;  %v899_v6 = vld [vmem:[%s1220_s1 + $0x70] sm:$0xff]  ;;  %v898_v10 = vld [vmem:[%s1220_s1 + $0x68] sm:$0xff] }
  0x1c   : > { %v908_v3 = vld [vmem:[%s1220_s1 + $0xb8] sm:$0xff]  ;;  %511 = vmatpush.bf16.msra.mxu1 %v900_v2  ;;  %v907_v7 = vld [vmem:[%s1220_s1 + $0xb0] sm:$0xff]  ;;  %v906_v11 = vld [vmem:[%s1220_s1 + $0xa8] sm:$0xff] }
  0x1d   : > { %v916_v4 = vld [vmem:[%s1220_s1 + $0xf8] sm:$0xff]  ;;  %525 = vmatpush.bf16.msra.mxu2 %v908_v3  ;;  %v915_v8 = vld [vmem:[%s1220_s1 + $0xf0] sm:$0xff]  ;;  %v914_v12 = vld [vmem:[%s1220_s1 + $0xe8] sm:$0xff] }
  0x1e   : > { %539 = vmatpush.bf16.msra.mxu3 %v916_v4  ;;  %v889_v13 = vld [vmem:[%s1220_s1 + $0x20] sm:$0xff]  ;;  %v888_v17 = vld [vmem:[%s1220_s1 + $0x18] sm:$0xff]  ;;  %v887_v21 = vld [vmem:[%s1220_s1 + $0x10] sm:$0xff] }
  0x1f   : > { %498 = vmatpush.bf16.msra.mxu0 %v891_v5  ;;  %v897_v14 = vld [vmem:[%s1220_s1 + $0x60] sm:$0xff]  ;;  %v896_v18 = vld [vmem:[%s1220_s1 + $0x58] sm:$0xff]  ;;  %v895_v22 = vld [vmem:[%s1220_s1 + $0x50] sm:$0xff] }
  0x20   : > { %512 = vmatpush.bf16.msra.mxu1 %v899_v6  ;;  %v905_v15 = vld [vmem:[%s1220_s1 + $0xa0] sm:$0xff]  ;;  %v904_v19 = vld [vmem:[%s1220_s1 + $0x98] sm:$0xff]  ;;  %v903_v23 = vld [vmem:[%s1220_s1 + $0x90] sm:$0xff] }
  0x21   : > { %526 = vmatpush.bf16.msra.mxu2 %v907_v7  ;;  %v913_v16 = vld [vmem:[%s1220_s1 + $0xe0] sm:$0xff]  ;;  %v912_v20 = vld [vmem:[%s1220_s1 + $0xd8] sm:$0xff]  ;;  %v911_v24 = vld [vmem:[%s1220_s1 + $0xd0] sm:$0xff] }
  0x22   : > { %540 = vmatpush.bf16.msra.mxu3 %v915_v8  ;;  %v886_v25 = vld [vmem:[%s1220_s1 + $0x8] sm:$0xff]  ;;  %v885_v29 = vld [vmem:[%s1220_s1] sm:$0xff]  ;;  %v883_v34 = vld [vmem:[%s1085_s4 + $0xc] sm:$0xf0] }
  0x23   : > { %499 = vmatpush.bf16.msra.mxu0 %v890_v9  ;;  %v894_v26 = vld [vmem:[%s1220_s1 + $0x48] sm:$0xff]  ;;  %v893_v30 = vld [vmem:[%s1220_s1 + $0x40] sm:$0xff]  ;;  %v732_v36 = vld [vmem:[%s1085_s4 + $0x10] sm:$0xf0] }
  0x24   : > { %513 = vmatpush.bf16.msra.mxu1 %v898_v10  ;;  %v902_v27 = vld [vmem:[%s1220_s1 + $0x88] sm:$0xff]  ;;  %v901_v31 = vld [vmem:[%s1220_s1 + $0x80] sm:$0xff]  ;;  %v884_v38 = vld [vmem:[%s1085_s4 + $0x14] sm:$0xf0] }
  0x25   : > { %527 = vmatpush.bf16.msra.mxu2 %v906_v11  ;;  %v910_v28 = vld [vmem:[%s1220_s1 + $0xc8] sm:$0xff]  ;;  %v909_v32 = vld [vmem:[%s1220_s1 + $0xc0] sm:$0xff]  ;;  %v740_v40 = vld [vmem:[%s1085_s4 + $0x18] sm:$0xf0] }
  0x26   : > { %541 = vmatpush.bf16.msra.mxu3 %v914_v12  ;;  %v730_v33 = vld [vmem:[%s1085_s4] sm:$0xf]  ;;  %v881_v35 = vld [vmem:[%s1085_s4 + $0x4] sm:$0xf]  ;;  %v738_v37 = vld [vmem:[%s1085_s4 + $0x8] sm:$0xf] }
  0x27   : > { %500 = vmatpush.bf16.msra.mxu0 %v889_v13  ;;  %v882_v39 = vld [vmem:[%s1085_s4 + $0xc] sm:$0xf]  ;;  %v731_v41 = vor.u32 %v883_v34, %v730_v33  ;;  %v735_v42 = vor.u32 %v881_v35, %v732_v36  ;;  %v739_v43 = vor.u32 %v884_v38, %v738_v37  ;;  %s917_s4 = sshll.u32 %s1000_s12, 3  ;;  %v569_v12 = vld [vmem:[#allocation3] sm:$0x3] }
  0x28   : > { %514 = vmatpush.bf16.msra.mxu1 %v897_v14  ;;  %v743_v44 = vor.u32 %v882_v39, %v740_v40  ;;  %s578_s22 = scalar_lea.vmem [#allocation2], %s917_s4 }
  0x29   : > { %528 = vmatpush.bf16.msra.mxu2 %v905_v15 }
  0x2a   : > { %542 = vmatpush.bf16.msra.mxu3 %v913_v16 }
  0x2b   : > { %501 = vmatpush.bf16.msra.mxu0 %v888_v17 }
  0x2c   : > { %515 = vmatpush.bf16.msra.mxu1 %v896_v18 }
  0x2d   : > { %529 = vmatpush.bf16.msra.mxu2 %v904_v19 }
  0x2e   : > { %543 = vmatpush.bf16.msra.mxu3 %v912_v20 }
  0x2f   : > { %502 = vmatpush.bf16.msra.mxu0 %v887_v21 }
  0x30   : > { %516 = vmatpush.bf16.msra.mxu1 %v895_v22 }
  0x31   : > { %530 = vmatpush.bf16.msra.mxu2 %v903_v23 }
  0x32   : > { %544 = vmatpush.bf16.msra.mxu3 %v911_v24 }
  0x33   : > { %503 = vmatpush.bf16.msra.mxu0 %v886_v25 }
  0x34   : > { %517 = vmatpush.bf16.msra.mxu1 %v894_v26 }
  0x35   : > { %531 = vmatpush.bf16.msra.mxu2 %v902_v27 }
  0x36   : > { %545 = vmatpush.bf16.msra.mxu3 %v910_v28 }
  0x37   : > { %504 = vmatpush.bf16.msra.mxu0 %v885_v29 }
  0x38   : > { %518 = vmatpush.bf16.msra.mxu1 %v893_v30 }
  0x39   : > { %532 = vmatpush.bf16.msra.mxu2 %v901_v31 }
  0x3a   : > { %546 = vmatpush.bf16.msra.mxu3 %v909_v32  ;;  %505 = vmatmul.bf16.vlgmr.msra.gmra.mxu0 %v731_v41 }
  0x3b   : > { %519 = vmatmul.bf16.vlgmr.msra.gmra.mxu1 %v735_v42 }
  0x3c   : > { %533 = vmatmul.bf16.vlgmr.msra.gmra.mxu2 %v739_v43 }
  0x3d   : > { %547 = vmatmul.bf16.vlgmr.msra.gmra.mxu3 %v743_v44 }
  0xb7   : > { %v506_v45 = vpop.f32.mrf.mxu0 }
  0xb8   : > { %v520_v46 = vpop.f32.mrf.mxu1 }
  0xb9   : > { %v521_v49 = vadd.f32 %v520_v46, %v506_v45 }
  0xbf   : > { %v534_v47 = vpop.f32.mrf.mxu2  ;;  %v508_v50 = vpop.f32.mrf.mxu0 }
  0xc0   : > { %v548_v48 = vpop.f32.mrf.mxu3  ;;  %v522_v51 = vpop.f32.mrf.mxu1  ;;  %v535_v52 = vadd.f32 %v534_v47, %v521_v49 }
  0xc1   : > { %v523_v53 = vadd.f32 %v522_v51, %v508_v50 }
  0xc2   : > { %v549_v55 = vadd.f32 %v548_v48, %v535_v52 }
  0xc4   : > { %v560_v59 = vmul.f32 %v549_v55, %v549_v55 }
  0xc7   : > { %v536_v54 = vpop.f32.mrf.mxu2 }
  0xc8   : > { %v537_v56 = vadd.f32 %v536_v54, %v523_v53  ;;  %v550_v57 = vpop.f32.mrf.mxu3 }
  0xca   : > { %v551_v58 = vadd.f32 %v550_v57, %v537_v56 }
  0xcc   : > { %v553_v60 = vadd.f32 %v551_v58, %v549_v55  ;;  %v561_v61 = vmul.f32 %v551_v58, %v551_v58  ;;  %v922_v62 = vpack.c.bf16 %v551_v58, %v549_v55 }
  0xce   : > { %v554_v63 = vrot.slane %v553_v60, 4  ;;  %v562_v0 = vadd.f32 %v561_v61, %v560_v59  ;;  %923 = vst [vmem:[%s578_s22] sm:$0xff] %v922_v62  }
  0xd0   : > { %v555_v1 = vadd.f32 %v554_v63, %v553_v60  ;;  %v563_v2 = vrot.slane %v562_v0, 4 }
  0xd2   : > { %v556_v3 = vrot.slane %v555_v1, 2  ;;  %v564_v4 = vadd.f32 %v563_v2, %v562_v0 }
  0xd4   : > { %v557_v5 = vadd.f32 %v556_v3, %v555_v1  ;;  %v565_v6 = vrot.slane %v564_v4, 2 }
  0xd6   : > { %v558_v7 = vrot.slane %v557_v5, 1  ;;  %v566_v8 = vadd.f32 %v565_v6, %v564_v4 }
  0xd8   : > { %v567_v9 = vrot.slane %v566_v8, 1  ;;  %v559_v10 = vadd.f32 %v558_v7, %v557_v5 }
  0xda   : > { %v568_v11 = vadd.f32 %v567_v9, %v566_v8 }
  0xdc   : > { %v571_v13 = vsel %vm570_vm0, %v559_v10, %v568_v11 }
  0xdd   : > { %v572_v14 = vadd.f32 %v571_v13, %v569_v12 }
  0xdf   : > { %573 = vst [vmem:[#allocation3] sm:$0x3] %v572_v14 }
  0xe0 PF: > { %p874_p9 = scmp.ne.s32.totalorder %s1004_s13, 1 }
  0xe1   : > { %p875_p10 = scmp.ne.s32.totalorder (!%p874_p9), %s1000_s12, 0 }
  0xe2   : > { %584 = sbr.rel (%p874_p9) target bundleno = 293 (0x125), region = 44 }
  0xe7   : > { %588 = sbr.rel (%p875_p10) target bundleno = 275 (0x113), region = 48 }
  0xec   : > { %v589_v15 = vld [vmem:[#allocation3] sm:$0x1]  ;;  %v591_v16 = vld [vmem:[#allocation3 + $0x1] sm:$0x1]  ;;  %v596_v28 = vld [vmem:[%s1221_s2] sm:$0x1] }
  0xed   : > { %v590_v17 = vmul.f32 0.03125, %v589_v15  ;;  %v592_v18 = vmul.f32 0.03125, %v591_v16  ;;  %v609_v32 = vld [vmem:[%s1221_s2 + $0x1] sm:$0x1]  ;;  %vm615_vm4 = vcmask 1040384  }
  0xef   : > { %v593_v19 = vmul.f32 %v590_v17, %v590_v17 }
  0xf1   : > { %v594_v20 = vsub.f32 %v592_v18, %v593_v19 }
  0xf3   : > { %v595_v21 = vmax.f32 %v594_v20, 0.0 }
  0xf5   : > { %v597_v22 = vadd.f32 1e-05, %v595_v21 }
  0xf7   : > { %974 = vrsqrt.f32 %v597_v22  ;;  %vm604_vm1 = vweird.f32 %v597_v22 }
  0xfd   : > { %v975_v23 = vpop.eup %974 }
  0xfe   : > { %v599_v24 = vmul.f32 %v975_v23, %v597_v22  ;;  %vm605_vm2 = vweird.f32 %v975_v23 }
  0xff   : > { %vm606_vm3 = vmor %vm604_vm1, %vm605_vm2 }
 0x100   : > { %v600_v25 = vmul.f32 %v975_v23, %v599_v24 }
 0x102   : > { %v601_v26 = vmul.f32 0.5, %v600_v25 }
 0x104   : > { %v602_v27 = vsub.f32 1.5, %v601_v26 }
 0x106   : > { %v603_v29 = vmul.f32 %v975_v23, %v602_v27 }
 0x108   : > { %v607_v30 = vsel %vm606_vm3, %v975_v23, %v603_v29 }
 0x109   : > { %v608_v31 = vmul.f32 %v607_v30, %v596_v28 }
 0x10b   : > { %v610_v33 = vmul.f32 %v608_v31, %v590_v17 }
 0x10d   : > { %v611_v34 = vsub.f32 %v609_v32, %v610_v33 }
 0x10f   : > { %v613_v35 = vrot.slane %v611_v34, 7 }
 0x111   : > { %v616_v36 = vsel %vm615_vm4, %v608_v31, %v613_v35 }
 0x112   : > { %617 = vst [vmem:[#allocation4] sm:$0x3] %v616_v36 }
 0x113 PF: > { %s918_s26 = sshll.u32 %s1000_s12, 3 }
 0x114   : > { %s620_s27 = scalar_lea.vmem [#allocation2], %s918_s26 }
 0x115   : > { %v925_v38 = vld [vmem:[%s620_s27] sm:$0xff]  }
 0x116   : > { %v926_v39 = vunpack.c.l.bf16 %v925_v38  ;;  %v927_v40 = vunpack.c.h.bf16 %v925_v38 }
 0x119   : > { %v976_v37 = vld [vmem:[#allocation4] ss:$0 sm:$0xff]  ;;  %v977_v41 = vld [vmem:[#allocation4 + $0x1] ss:$0 sm:$0xff] }
 0x11a   : > { %v627_v42 = vmul.f32 %v976_v37, %v926_v39  ;;  %v628_v43 = vmul.f32 %v976_v37, %v927_v40 }
 0x11c   : > { %v631_v44 = vadd.f32 %v977_v41, %v627_v42  ;;  %v632_v45 = vadd.f32 %v977_v41, %v628_v43 }
 0x11e   : > { %v633_v46 = vmul.f32 0.2, %v631_v44  ;;  %v634_v47 = vmul.f32 0.2, %v632_v45 }
 0x120   : > { %v635_v48 = vmax.f32 %v631_v44, %v633_v46  ;;  %v636_v49 = vmax.f32 %v632_v45, %v634_v47 }
 0x122   : > { %v931_v50 = vpack.c.bf16 %v636_v49, %v635_v48 }
 0x124   : > { %932 = vst [vmem:[%s1080_s28] sm:$0xff] %v931_v50  }
 0x125 PF: > { %s13_s16 = sadd.s32 1, %s1016_s16   ;;  %s1223_s12 = smov %s1008_s14 }
 0x126   : > { %p10_p11 = scmp.ge.s32.totalorder %s13_s16, 6   ;;  %s1224_s13 = smov %s1012_s15 }
 0x127   : > { %s1225_s14 = smov %s1228_s17  ;;  %s1226_s15 = smov %s1232_s18 }
 0x128   :  { %12 = sbr.rel (!%p10_p11) target bundleno = 3 (0x3), region = 80 }

</bundles_post_ra>
